<compile_context>
chip_gen: v7x
topology: tpu7x:2x2x1
jax: 0.10.0
libtpu: 0.0.40
codegen_flags: <defaults>
</compile_context>

<pallas_src>
import functools

import jax
import jax.numpy as jnp
from jax import lax
from jax.experimental import pallas as pl
from jax.experimental.pallas import tpu as pltpu


def _round_up(x, m):
    return (x + m - 1) // m * m


# ----------------------------- Pallas kernel ------------------------------ #

def _pyconv3_fused_kernel(x_ref, w_ref, o_ref, *, H, KH):
    """Fused PyConv3 for a block of B batch elements.

    x_ref: (B, H+KH-1, Kp)    zero-padded, lane-folded input rows (VMEM)
    w_ref: (KH, Kp, W*Cout)   band-lowered fused weight (grid-invariant, 1-buffered)
    o_ref: (B, H, W*Cout)     lane-dense output rows
    """
    B, _, Kp = x_ref.shape
    WC = w_ref.shape[2]
    BH = B * H

    def tap(kh):
        # Sublane-shifted window.  H % 8 == 0 is enforced by the wrapper when
        # B > 1, so the (B, H, Kp) -> (B*H, Kp) collapse is layout-preserving.
        # (Pre-staging the 7 shifted views is only worth it if a bundle dump
        # shows vld/XLU saturation — not done here.)
        rows = x_ref[:, kh:kh + H, :].reshape(BH, Kp)
        return jnp.dot(rows, w_ref[kh], preferred_element_type=jnp.float32)

    acc = tap(0)                      # kh = 0 initializes the accumulator
    for kh in range(1, KH):           # KH = 7 taps, unrolled
        acc = acc + tap(kh)
    o_ref[...] = acc.reshape(B, H, WC).astype(o_ref.dtype)


# ------------------------------ weight prep -------------------------------- #

def grouped_oihw_to_dense_hwio(w_oihw, groups):
    """(Cout, Cin/groups, KH, KW) grouped weight -> dense block-diag (KH,KW,Cin,Cout).

    TODO(synk): at production channel counts, skip this densification (it
    inflates the contraction dim by `groups` for the g=4/g=8 branches) and
    lower each branch's band separately into its Cout column slice.
    """
    Cout, Cin_g, KH, KW = w_oihw.shape
    Cout_g = Cout // groups
    w_r = w_oihw.reshape(groups, Cout_g, Cin_g, KH, KW)
    w_hwgio = jnp.transpose(w_r, (3, 4, 0, 2, 1))            # (KH,KW,g,Cin_g,Cout_g)
    eye = jnp.eye(groups, dtype=w_oihw.dtype)
    dense = jnp.einsum('hwgio,gk->hwgiko', w_hwgio, eye)     # block-diag in one op
    return dense.reshape(KH, KW, groups * Cin_g, groups * Cout_g)


def build_fused_hwio_weight(weights, pyconv_kernels, pyconv_groups):
    """Fuse the 3 branch weights into one (Kmax,Kmax,Cin,Cout_total) HWIO weight."""
    kmax = max(pyconv_kernels)
    branches = []
    for w, k, g in zip(weights, pyconv_kernels, pyconv_groups):
        dense = grouped_oihw_to_dense_hwio(w, g)             # (k,k,Cin,cout_b)
        off = (kmax - k) // 2                                # center in kmax x kmax
        dense = jnp.pad(dense, ((off, off), (off, off), (0, 0), (0, 0)))
        branches.append(dense)
    return jnp.concatenate(branches, axis=-1)                # cat order == torch.cat


def lower_band_weight(w_hwio, out_w):
    """(KH,KW,Cin,Cout) -> (KH, Wp*Cin, W*Cout) band matrix.

    Realizes the stride-1 'same' convolution along width as one matmul per kh:
        out[i, j*Cout+co] = sum_kh  X[i+kh] @ band[kh]
    """
    KH, KW, Cin, Cout = w_hwio.shape
    Wp = out_w + KW - 1
    ic = jnp.arange(Wp)[:, None]            # padded input column
    oc = jnp.arange(out_w)[None, :]         # output column
    kw = ic - oc                            # (Wp, W)
    valid = (kw >= 0) & (kw < KW)
    kw_safe = jnp.where(valid, kw, 0)
    g = w_hwio[:, kw_safe]                  # (KH, Wp, W, Cin, Cout) gather on KW
    g = g * valid[None, :, :, None, None].astype(w_hwio.dtype)
    g = jnp.transpose(g, (0, 1, 3, 2, 4))   # (KH, Wp, Cin, W, Cout)
    return g.reshape(KH, Wp * Cin, out_w * Cout)


def prepare_pyconv3_weights(weights, out_w,
                            pyconv_kernels=(3, 5, 7),
                            pyconv_groups=(1, 4, 8),
                            use_bf16=True):
    """One-time weight prep (hoisted out of the forward hot path).

    Returns the band-lowered fused weight (KH, Kp, W*Cout_total) with the
    contraction dim Kp = Wp*Cin rounded up to a multiple of 128 and cast to
    the MXU operand dtype (bf16 by default on every generation; accumulation
    stays f32 inside the kernel).
    """
    w_fused = build_fused_hwio_weight(weights, pyconv_kernels, pyconv_groups)
    w_band = lower_band_weight(w_fused, out_w)               # (KH, Wp*Cin, W*Cout)
    KH, K, WC = w_band.shape
    Kp = _round_up(K, 128)
    if Kp > K:
        w_band = jnp.pad(w_band, ((0, 0), (0, Kp - K), (0, 0)))
    w_band = w_band.astype(jnp.bfloat16 if use_bf16 else jnp.float32)
    if w_band.size * w_band.dtype.itemsize > (48 << 20):
        # TODO(synk): fall back to per-kw tap accumulation (no O(W^2) band
        # lowering) with row-strip tiling when the band weight cannot fit
        # VMEM (v7x: 64 MiB per TensorCore).
        raise NotImplementedError("band-lowered PyConv3 weight exceeds VMEM budget")
    return w_band


def init_pyconv3_params(key, inplans, planes,
                        out_planes_div=(4, 4, 2),
                        pyconv_kernels=(3, 5, 7),
                        pyconv_groups=(1, 4, 8)):
    """Deterministic weights, PyTorch Conv2d shapes (Cout, Cin/groups, KH, KW)."""
    keys = jax.random.split(key, 3)
    weights = []
    for kk, div, k, g in zip(keys, out_planes_div, pyconv_kernels, pyconv_groups):
        cout = planes // div
        cin_g = inplans // g
        fan_in = cin_g * k * k
        w = jax.random.normal(kk, (cout, cin_g, k, k), jnp.float32) / jnp.sqrt(fan_in)
        weights.append(w)
    return weights


# ------------------------------ forward ------------------------------------ #

def _pick_batch_block(N, H):
    """Largest divisor B of N with B*H <= 128 (B <= 8); prefer >= 2 grid steps
    (v7x megacore) when that keeps the matmul M >= 64."""
    if H % 8 != 0:
        return 1
    max_b = max(1, min(8, 128 // H))
    b = 1
    for cand in range(1, max_b + 1):
        if N % cand == 0:
            b = cand
    if b > 1 and N // b < 2:
        for cand in range(b - 1, 0, -1):
            if N % cand == 0 and N // cand >= 2 and cand * H >= 64:
                b = cand
                break
    return b


@functools.partial(jax.jit, static_argnames=("data_format",))
def pyconv3_forward(x, w_band, data_format="NCHW"):
    """Matches PyConv3.forward: concat of the three branch convs on channels.

    x: (N, Cin, H, W) for "NCHW" (PyTorch layout) or (N, H, W, Cin) for "NHWC"
       (fast path: no layout transposes).
    w_band: output of prepare_pyconv3_weights (its dtype picks bf16/f32 operands).
    """
    if data_format == "NCHW":
        x_nhwc = jnp.transpose(x, (0, 2, 3, 1))
    else:
        x_nhwc = x
    N, H, W, Cin = x_nhwc.shape
    KH, Kp, WC = w_band.shape
    p = KH // 2
    Hp, Wp = H + 2 * p, W + 2 * p
    K = Wp * Cin
    assert Kp >= K and Kp % 128 == 0, (w_band.shape, x_nhwc.shape)
    assert WC % W == 0, (w_band.shape, x_nhwc.shape)
    Cout = WC // W

    compute_dtype = w_band.dtype
    out_dtype = x.dtype

    # Pad spatially ('same' for the 7x7 envelope), fold (W, Cin) into the lane
    # dim, pad the contraction dim up to the lane-aligned Kp, and cast to the
    # MXU operand dtype.  All of this fuses under this jit with the pallas_call.
    xp = jnp.pad(x_nhwc, ((0, 0), (p, p), (p, p), (0, 0)))
    xp2d = xp.reshape(N, Hp, K)
    if Kp > K:
        xp2d = jnp.pad(xp2d, ((0, 0), (0, 0), (0, Kp - K)))
    xp2d = xp2d.astype(compute_dtype)

    B = _pick_batch_block(N, H)
    assert N % B == 0
    grid = (N // B,)

    # VMEM budget: band weight single-buffered; input/output blocks double-buffered.
    itm = jnp.dtype(compute_dtype).itemsize
    w_bytes = KH * Kp * WC * itm
    needed = (w_bytes
              + 2 * B * Hp * Kp * itm
              + 2 * B * H * WC * jnp.dtype(out_dtype).itemsize)
    if needed > (56 << 20):
        # TODO(synk): per-kw tap accumulation with row-strip tiling (and
        # per-branch, non-densified band weights) for resolutions / channel
        # counts whose O(W^2) band weight does not fit v7x's 64 MiB VMEM.
        raise NotImplementedError("PyConv3 band kernel exceeds VMEM budget")
    vmem_limit = min(64 << 20, max(32 << 20, (needed * 3) // 2))

    cost = pl.CostEstimate(
        flops=2 * N * KH * H * Kp * WC,
        transcendentals=0,
        bytes_accessed=(N * Hp * Kp * itm + w_bytes
                        + N * H * WC * jnp.dtype(out_dtype).itemsize),
    )

    kernel = functools.partial(_pyconv3_fused_kernel, H=H, KH=KH)
    out2d = pl.pallas_call(
        kernel,
        out_shape=jax.ShapeDtypeStruct((N, H, WC), out_dtype),
        grid_spec=pltpu.PrefetchScalarGridSpec(
            num_scalar_prefetch=0,
            grid=grid,                                   # parallel batch-block axis
            in_specs=[
                pl.BlockSpec((B, Hp, Kp), lambda n: (n, 0, 0)),
                # Grid-invariant weight: single-buffered (index_map is constant).
                pl.BlockSpec((KH, Kp, WC), lambda n: (0, 0, 0),
                             pipeline_mode=pl.Buffered(1)),
            ],
            out_specs=pl.BlockSpec((B, H, WC), lambda n: (n, 0, 0)),
        ),
        compiler_params=pltpu.CompilerParams(
            dimension_semantics=("parallel",),
            vmem_limit_bytes=vmem_limit,
        ),
        cost_estimate=cost,
    )(xp2d, w_band)

    out = out2d.reshape(N, H, W, Cout)
    if data_format == "NCHW":
        out = jnp.transpose(out, (0, 3, 1, 2))
    return out


def pyconv3_reference(x_nchw, weights,
                      pyconv_kernels=(3, 5, 7),
                      pyconv_groups=(1, 4, 8)):
    """Pure-XLA reference (lax.conv_general_dilated) for a correctness check."""
    outs = []
    for w, k, g in zip(weights, pyconv_kernels, pyconv_groups):
        p = k // 2
        outs.append(lax.conv_general_dilated(
            x_nchw, w,
            window_strides=(1, 1),
            padding=((p, p), (p, p)),
            dimension_numbers=("NCHW", "OIHW", "NCHW"),
            feature_group_count=g,
        ))
    return jnp.concatenate(outs, axis=1)


# --------------------------------- main ------------------------------------ #

if __name__ == "__main__":
    key = jax.random.PRNGKey(0)
    k_x, k_w = jax.random.split(key)

    N, C, Hs, Ws = 2, 16, 16, 16      # inplans=16 (divisible by groups 1/4/8)
    planes = 16                       # out channels: 16//4 + 16//4 + 16//2 = 16

    x = jax.random.normal(k_x, (N, C, Hs, Ws), jnp.float32)
    weights = init_pyconv3_params(k_w, inplans=C, planes=planes)

    ref = jax.block_until_ready(pyconv3_reference(x, weights))

    # Strict check: f32 operands (exact same math as the XLA reference).
    w_band_f32 = jax.block_until_ready(
        prepare_pyconv3_weights(weights, out_w=Ws, use_bf16=False))
    out_f32 = jax.block_until_ready(pyconv3_forward(x, w_band_f32))
    assert out_f32.shape == (N, planes, Hs, Ws), out_f32.shape
    assert jnp.allclose(out_f32, ref, atol=1e-4, rtol=1e-4), \
        float(jnp.max(jnp.abs(out_f32 - ref)))

    # Default fast path: bf16 operands, f32 accumulation (loosened tolerance).
    w_band_bf16 = jax.block_until_ready(
        prepare_pyconv3_weights(weights, out_w=Ws, use_bf16=True))
    out_bf16 = jax.block_until_ready(pyconv3_forward(x, w_band_bf16))
    assert out_bf16.shape == (N, planes, Hs, Ws), out_bf16.shape
    assert jnp.allclose(out_bf16, ref, atol=5e-2, rtol=5e-2), \
        float(jnp.max(jnp.abs(out_bf16 - ref)))

    print("KERNEL_OK")
</pallas_src>

<mosaic_0001>
module attributes {stable_mosaic.version = 11 : i64} {
  func.func @_pyconv3_fused_kernel(%arg0: i32, %arg1: memref<2x22x384xf32, #tpu.memory_space<vmem>>, %arg2: memref<7x384x256xf32, #tpu.memory_space<vmem>>, %arg3: memref<2x16x256xf32, #tpu.memory_space<vmem>>) attributes {dimension_semantics = [#tpu.dimension_semantics<parallel>], iteration_bounds = array<i64: 1>, scalar_prefetch = 0 : i64, scratch_operands = 0 : i64, tpu.core_type = #tpu.core_type<tc>, window_params = [{transform_indices = @transform_0, window_bounds = array<i64: 2, 22, 384>}, {pipeline_mode = #tpu.pipeline_mode<synchronous>, transform_indices = @transform_1, window_bounds = array<i64: 7, 384, 256>}, {transform_indices = @transform_2, window_bounds = array<i64: 2, 16, 256>}]} {
    %c0 = arith.constant 0 : index
    %c0_0 = arith.constant 0 : index
    %c0_1 = arith.constant 0 : index
    %0 = vector.load %arg1[%c0, %c0_0, %c0_1] : memref<2x22x384xf32, #tpu.memory_space<vmem>>, vector<2x16x384xf32>
    %1 = vector.shape_cast %0 : vector<2x16x384xf32> to vector<32x384xf32>
    %c0_2 = arith.constant 0 : index
    %c0_3 = arith.constant 0 : index
    %c0_4 = arith.constant 0 : index
    %2 = vector.load %arg2[%c0_2, %c0_3, %c0_4] : memref<7x384x256xf32, #tpu.memory_space<vmem>>, vector<1x384x256xf32>
    %3 = vector.shape_cast %2 : vector<1x384x256xf32> to vector<384x256xf32>
    %cst = arith.constant dense<0.000000e+00> : vector<32x256xf32>
    %4 = tpu.matmul %1, %3, %cst {dimension_numbers = #tpu.dot_dimension_numbers<[1], [0], [0], [1], [0, 0, 1, 1], [], []>} : vector<32x384xf32>, vector<384x256xf32>, vector<32x256xf32> -> vector<32x256xf32>
    %c0_5 = arith.constant 0 : index
    %c1 = arith.constant 1 : index
    %c0_6 = arith.constant 0 : index
    %5 = vector.load %arg1[%c0_5, %c1, %c0_6] : memref<2x22x384xf32, #tpu.memory_space<vmem>>, vector<2x16x384xf32>
    %6 = vector.shape_cast %5 : vector<2x16x384xf32> to vector<32x384xf32>
    %c1_7 = arith.constant 1 : index
    %c0_8 = arith.constant 0 : index
    %c0_9 = arith.constant 0 : index
    %7 = vector.load %arg2[%c1_7, %c0_8, %c0_9] : memref<7x384x256xf32, #tpu.memory_space<vmem>>, vector<1x384x256xf32>
    %8 = vector.shape_cast %7 : vector<1x384x256xf32> to vector<384x256xf32>
    %cst_10 = arith.constant dense<0.000000e+00> : vector<32x256xf32>
    %9 = tpu.matmul %6, %8, %cst_10 {dimension_numbers = #tpu.dot_dimension_numbers<[1], [0], [0], [1], [0, 0, 1, 1], [], []>} : vector<32x384xf32>, vector<384x256xf32>, vector<32x256xf32> -> vector<32x256xf32>
    %10 = arith.addf %4, %9 : vector<32x256xf32>
    %c0_11 = arith.constant 0 : index
    %c2 = arith.constant 2 : index
    %c0_12 = arith.constant 0 : index
    %11 = vector.load %arg1[%c0_11, %c2, %c0_12] : memref<2x22x384xf32, #tpu.memory_space<vmem>>, vector<2x16x384xf32>
    %12 = vector.shape_cast %11 : vector<2x16x384xf32> to vector<32x384xf32>
    %c2_13 = arith.constant 2 : index
    %c0_14 = arith.constant 0 : index
    %c0_15 = arith.constant 0 : index
    %13 = vector.load %arg2[%c2_13, %c0_14, %c0_15] : memref<7x384x256xf32, #tpu.memory_space<vmem>>, vector<1x384x256xf32>
    %14 = vector.shape_cast %13 : vector<1x384x256xf32> to vector<384x256xf32>
    %cst_16 = arith.constant dense<0.000000e+00> : vector<32x256xf32>
    %15 = tpu.matmul %12, %14, %cst_16 {dimension_numbers = #tpu.dot_dimension_numbers<[1], [0], [0], [1], [0, 0, 1, 1], [], []>} : vector<32x384xf32>, vector<384x256xf32>, vector<32x256xf32> -> vector<32x256xf32>
    %16 = arith.addf %10, %15 : vector<32x256xf32>
    %c0_17 = arith.constant 0 : index
    %c3 = arith.constant 3 : index
    %c0_18 = arith.constant 0 : index
    %17 = vector.load %arg1[%c0_17, %c3, %c0_18] : memref<2x22x384xf32, #tpu.memory_space<vmem>>, vector<2x16x384xf32>
    %18 = vector.shape_cast %17 : vector<2x16x384xf32> to vector<32x384xf32>
    %c3_19 = arith.constant 3 : index
    %c0_20 = arith.constant 0 : index
    %c0_21 = arith.constant 0 : index
    %19 = vector.load %arg2[%c3_19, %c0_20, %c0_21] : memref<7x384x256xf32, #tpu.memory_space<vmem>>, vector<1x384x256xf32>
    %20 = vector.shape_cast %19 : vector<1x384x256xf32> to vector<384x256xf32>
    %cst_22 = arith.constant dense<0.000000e+00> : vector<32x256xf32>
    %21 = tpu.matmul %18, %20, %cst_22 {dimension_numbers = #tpu.dot_dimension_numbers<[1], [0], [0], [1], [0, 0, 1, 1], [], []>} : vector<32x384xf32>, vector<384x256xf32>, vector<32x256xf32> -> vector<32x256xf32>
    %22 = arith.addf %16, %21 : vector<32x256xf32>
    %c0_23 = arith.constant 0 : index
    %c4 = arith.constant 4 : index
    %c0_24 = arith.constant 0 : index
    %23 = vector.load %arg1[%c0_23, %c4, %c0_24] : memref<2x22x384xf32, #tpu.memory_space<vmem>>, vector<2x16x384xf32>
    %24 = vector.shape_cast %23 : vector<2x16x384xf32> to vector<32x384xf32>
    %c4_25 = arith.constant 4 : index
    %c0_26 = arith.constant 0 : index
    %c0_27 = arith.constant 0 : index
    %25 = vector.load %arg2[%c4_25, %c0_26, %c0_27] : memref<7x384x256xf32, #tpu.memory_space<vmem>>, vector<1x384x256xf32>
    %26 = vector.shape_cast %25 : vector<1x384x256xf32> to vector<384x256xf32>
    %cst_28 = arith.constant dense<0.000000e+00> : vector<32x256xf32>
    %27 = tpu.matmul %24, %26, %cst_28 {dimension_numbers = #tpu.dot_dimension_numbers<[1], [0], [0], [1], [0, 0, 1, 1], [], []>} : vector<32x384xf32>, vector<384x256xf32>, vector<32x256xf32> -> vector<32x256xf32>
    %28 = arith.addf %22, %27 : vector<32x256xf32>
    %c0_29 = arith.constant 0 : index
    %c5 = arith.constant 5 : index
    %c0_30 = arith.constant 0 : index
    %29 = vector.load %arg1[%c0_29, %c5, %c0_30] : memref<2x22x384xf32, #tpu.memory_space<vmem>>, vector<2x16x384xf32>
    %30 = vector.shape_cast %29 : vector<2x16x384xf32> to vector<32x384xf32>
    %c5_31 = arith.constant 5 : index
    %c0_32 = arith.constant 0 : index
    %c0_33 = arith.constant 0 : index
    %31 = vector.load %arg2[%c5_31, %c0_32, %c0_33] : memref<7x384x256xf32, #tpu.memory_space<vmem>>, vector<1x384x256xf32>
    %32 = vector.shape_cast %31 : vector<1x384x256xf32> to vector<384x256xf32>
    %cst_34 = arith.constant dense<0.000000e+00> : vector<32x256xf32>
    %33 = tpu.matmul %30, %32, %cst_34 {dimension_numbers = #tpu.dot_dimension_numbers<[1], [0], [0], [1], [0, 0, 1, 1], [], []>} : vector<32x384xf32>, vector<384x256xf32>, vector<32x256xf32> -> vector<32x256xf32>
    %34 = arith.addf %28, %33 : vector<32x256xf32>
    %c0_35 = arith.constant 0 : index
    %c6 = arith.constant 6 : index
    %c0_36 = arith.constant 0 : index
    %35 = vector.load %arg1[%c0_35, %c6, %c0_36] : memref<2x22x384xf32, #tpu.memory_space<vmem>>, vector<2x16x384xf32>
    %36 = vector.shape_cast %35 : vector<2x16x384xf32> to vector<32x384xf32>
    %c6_37 = arith.constant 6 : index
    %c0_38 = arith.constant 0 : index
    %c0_39 = arith.constant 0 : index
    %37 = vector.load %arg2[%c6_37, %c0_38, %c0_39] : memref<7x384x256xf32, #tpu.memory_space<vmem>>, vector<1x384x256xf32>
    %38 = vector.shape_cast %37 : vector<1x384x256xf32> to vector<384x256xf32>
    %cst_40 = arith.constant dense<0.000000e+00> : vector<32x256xf32>
    %39 = tpu.matmul %36, %38, %cst_40 {dimension_numbers = #tpu.dot_dimension_numbers<[1], [0], [0], [1], [0, 0, 1, 1], [], []>} : vector<32x384xf32>, vector<384x256xf32>, vector<32x256xf32> -> vector<32x256xf32>
    %40 = arith.addf %34, %39 : vector<32x256xf32>
    %41 = vector.shape_cast %40 : vector<32x256xf32> to vector<2x16x256xf32>
    %c0_41 = arith.constant 0 : index
    %c0_42 = arith.constant 0 : index
    %c0_43 = arith.constant 0 : index
    %42 = vector.load %arg3[%c0_41, %c0_42, %c0_43] : memref<2x16x256xf32, #tpu.memory_space<vmem>>, vector<2x16x256xf32>
    tpu.vector_store %arg3[%c0_41, %c0_42, %c0_43], %41 {strides = array<i32>} : memref<2x16x256xf32, #tpu.memory_space<vmem>>, vector<2x16x256xf32>,
    return
  }
  func.func @transform_0(%arg0: i32) -> (i32, i32, i32) {
    %c0_i32 = arith.constant 0 : i32
    %c0_i32_0 = arith.constant 0 : i32
    %c0_i32_1 = arith.constant 0 : i32
    return %arg0, %c0_i32, %c0_i32_0 : i32, i32, i32
  }
  func.func @transform_1(%arg0: i32) -> (i32, i32, i32) {
    %c0_i32 = arith.constant 0 : i32
    %c0_i32_0 = arith.constant 0 : i32
    %c0_i32_1 = arith.constant 0 : i32
    %c0_i32_2 = arith.constant 0 : i32
    return %c0_i32, %c0_i32_0, %c0_i32_1 : i32, i32, i32
  }
  func.func @transform_2(%arg0: i32) -> (i32, i32, i32) {
    %c0_i32 = arith.constant 0 : i32
    %c0_i32_0 = arith.constant 0 : i32
    %c0_i32_1 = arith.constant 0 : i32
    return %arg0, %c0_i32, %c0_i32_0 : i32, i32, i32
  }
}

</mosaic_0001>

<bundles_post_ra>
// kernel: pyconv3_forward.1
= control target key start
LH: loop header
LB: loop body
LE: loop exit
PB: predicated region body
PF: predicated region fallthrough
CT: control target
= control target key end

     0   :  { %7 = vsyncpa [#allocation3], 0  ;;  %s3254_s9 = smov [#allocation2]   ;;  %s3901_s0 = inlined_call_operand.vmem [shape: f32[2,22,384], index: 0, kind: input, shape index: {}]   ;;  %s3902_s1 = inlined_call_operand.hbm [shape: f32[7,384,256], index: 1, kind: input, shape index: {}]   ;;  %s3903_s2 = inlined_call_operand.vmem [shape: f32[2,16,256], index: 2, kind: output, shape index: {}]  }
   0x1   :  { %s15_s10 = sshll.u32 %s3254_s9, 4  ;;  %s3230_s13 = scalar_lea.hbm %s3902_s1, 86016  ;;  %s16_s10 = int_to_ptr.vmem [resolvable:$true] %s15_s10 }
   0x2   :  { %p3231_p0 = scmp.ne.s32.totalorder %s3902_s1, %s3230_s13  ;;  %p3234_p1 = scmp.lt.u32.totalorder %s3230_s13, %s3902_s1 }
   0x4   :  { %p3236_p2 = pnand %p3234_p1, %p3231_p0 }
   0x6   :  { %3239 = shalt.err (!%p3236_p2)
}
   0x7   :  { %s3240_s18 = scalar_lea.vmem %s16_s10, 86016  ;;  %p3245_p4 = scmp.lt.s32.totalorder %s16_s10, %s16_s10 }
   0x8   :  { %p3241_p3 = scmp.ne.s32.totalorder %s16_s10, %s3240_s18  ;;  %p3246_p5 = scmp.lt.s32.totalorder %s3240_s18, %s3240_s18 }
   0xa   :  { %p3247_p6 = por %p3246_p5, %p3245_p4 }
   0xc   :  { %p3248_p7 = pnand %p3247_p6, %p3241_p3 }
   0xe   :  { %3251 = shalt.err (!%p3248_p7)
}
   0xf   :  { %s3255_s19 = smov 256   ;;  %s3256_s20 = smov 16  }
  0x10   :  { %21 = dma.hbm_to_vmem [thread:$0]  %s3902_s1, 86016, %s16_s10, [#allocation3], %s3255_s19, %s3255_s19, %s3256_s20  }
  0x11   :  { %3252 = dma.done.wait [#allocation3], 86016  }
  0x12   :  { %3253 = vsyncadd [#allocation3], 4294881280  ;;  %v3257_v0 = vmov 0.0   ;;  %v208_v1 = vld [vmem:[#allocation2 + $0x308] sm:$0xff]  ;;  %v210_v2 = vld [vmem:[#allocation2 + $0x318] sm:$0xff]  ;;  %vm163_vm0 = vcmask 1046528  }
  0x13   :  { %456 = vmatprep.mubr.f32.mxu0 %v3257_v0  ;;  %v272_v3 = vld [vmem:[#allocation2 + $0x508] sm:$0xff]  ;;  %v2422_v4 = vpack.c.bf16 %v210_v2, %v208_v1  ;;  %v274_v5 = vld [vmem:[#allocation2 + $0x518] sm:$0xff]  ;;  %v207_v6 = vld [vmem:[#allocation2 + $0x300] sm:$0xff]  ;;  %vm683_vm1 = vcmask 1045504   ;;  %vm1033_vm2 = vcmask 1044480   ;;  %vm1383_vm3 = vcmask 1043456  }
  0x14   :  { %v209_v7 = vld [vmem:[#allocation2 + $0x310] sm:$0xff]  ;;  %v2486_v8 = vpack.c.bf16 %v274_v5, %v272_v3  ;;  %v271_v10 = vld [vmem:[#allocation2 + $0x500] sm:$0xff]  ;;  %v212_v12 = vld [vmem:[#allocation2 + $0x328] sm:$0xff]  ;;  %vm1733_vm4 = vcmask 1042432   ;;  %vm2083_vm5 = vcmask 1041408  }
  0x15   :  { %v2424_v9 = vpack.c.bf16 %v209_v7, %v207_v6  ;;  %v273_v11 = vld [vmem:[#allocation2 + $0x510] sm:$0xff]  ;;  %2423 = vmatprep.subr.bf16.mxu1 %v2422_v4  ;;  %v214_v14 = vld [vmem:[#allocation2 + $0x338] sm:$0xff]  ;;  %v276_v15 = vld [vmem:[#allocation2 + $0x528] sm:$0xff] }
  0x16   :  { %v2488_v13 = vpack.c.bf16 %v273_v11, %v271_v10  ;;  %v278_v16 = vld [vmem:[#allocation2 + $0x538] sm:$0xff]  ;;  %2487 = vmatprep.subr.bf16.mxu0 %v2486_v8  ;;  %v2426_v17 = vpack.c.bf16 %v214_v14, %v212_v12  ;;  %v211_v19 = vld [vmem:[#allocation2 + $0x320] sm:$0xff]  ;;  %v213_v20 = vld [vmem:[#allocation2 + $0x330] sm:$0xff] }
  0x17   :  { %2425 = vmatpush1.bf16.msra.mxu1 %v2424_v9  ;;  %v2490_v18 = vpack.c.bf16 %v278_v16, %v276_v15  ;;  %v275_v21 = vld [vmem:[#allocation2 + $0x520] sm:$0xff]  ;;  %v2428_v22 = vpack.c.bf16 %v213_v20, %v211_v19  ;;  %v277_v23 = vld [vmem:[#allocation2 + $0x530] sm:$0xff]  ;;  %v216_v24 = vld [vmem:[#allocation2 + $0x348] sm:$0xff] }
  0x18   :  { %2489 = vmatpush1.bf16.msra.mxu0 %v2488_v13  ;;  %v218_v25 = vld [vmem:[#allocation2 + $0x358] sm:$0xff]  ;;  %2427 = vmatprep.subr.bf16.mxu1 %v2426_v17  ;;  %v2492_v26 = vpack.c.bf16 %v277_v23, %v275_v21  ;;  %v280_v28 = vld [vmem:[#allocation2 + $0x548] sm:$0xff]  ;;  %v215_v30 = vld [vmem:[#allocation2 + $0x340] sm:$0xff] }
  0x19   :  { %2491 = vmatprep.subr.bf16.mxu0 %v2490_v18  ;;  %v2430_v27 = vpack.c.bf16 %v218_v25, %v216_v24  ;;  %v282_v29 = vld [vmem:[#allocation2 + $0x558] sm:$0xff]  ;;  %v217_v32 = vld [vmem:[#allocation2 + $0x350] sm:$0xff]  ;;  %v279_v33 = vld [vmem:[#allocation2 + $0x540] sm:$0xff] }
  0x1a   :  { %v2494_v31 = vpack.c.bf16 %v282_v29, %v280_v28  ;;  %v281_v34 = vld [vmem:[#allocation2 + $0x550] sm:$0xff]  ;;  %v2432_v35 = vpack.c.bf16 %v217_v32, %v215_v30  ;;  %v220_v36 = vld [vmem:[#allocation2 + $0x368] sm:$0xff]  ;;  %v222_v37 = vld [vmem:[#allocation2 + $0x378] sm:$0xff] }
  0x1b   :  { %2429 = vmatpush1.bf16.msra.mxu1 %v2428_v22  ;;  %v284_v38 = vld [vmem:[#allocation2 + $0x568] sm:$0xff]  ;;  %v2496_v39 = vpack.c.bf16 %v281_v34, %v279_v33  ;;  %v2434_v40 = vpack.c.bf16 %v222_v37, %v220_v36  ;;  %v286_v41 = vld [vmem:[#allocation2 + $0x578] sm:$0xff]  ;;  %v219_v42 = vld [vmem:[#allocation2 + $0x360] sm:$0xff] }
  0x1c   :  { %2493 = vmatpush1.bf16.msra.mxu0 %v2492_v26  ;;  %2431 = vmatprep.subr.bf16.mxu1 %v2430_v27  ;;  %v221_v43 = vld [vmem:[#allocation2 + $0x370] sm:$0xff]  ;;  %v2498_v44 = vpack.c.bf16 %v286_v41, %v284_v38  ;;  %v283_v45 = vld [vmem:[#allocation2 + $0x560] sm:$0xff]  ;;  %v224_v47 = vld [vmem:[#allocation2 + $0x388] sm:$0xff] }
  0x1d   :  { %2495 = vmatprep.subr.bf16.mxu0 %v2494_v31  ;;  %v285_v46 = vld [vmem:[#allocation2 + $0x570] sm:$0xff]  ;;  %v226_v48 = vld [vmem:[#allocation2 + $0x398] sm:$0xff]  ;;  %v288_v49 = vld [vmem:[#allocation2 + $0x588] sm:$0xff]  ;;  %v2436_v51 = vpack.c.bf16 %v221_v43, %v219_v42 }
  0x1e   :  { %v290_v50 = vld [vmem:[#allocation2 + $0x598] sm:$0xff]  ;;  %v2500_v52 = vpack.c.bf16 %v285_v46, %v283_v45  ;;  %v2438_v53 = vpack.c.bf16 %v226_v48, %v224_v47  ;;  %v223_v54 = vld [vmem:[#allocation2 + $0x380] sm:$0xff]  ;;  %v225_v55 = vld [vmem:[#allocation2 + $0x390] sm:$0xff] }
  0x1f   :  { %2433 = vmatpush1.bf16.msra.mxu1 %v2432_v35  ;;  %v287_v56 = vld [vmem:[#allocation2 + $0x580] sm:$0xff]  ;;  %v2502_v57 = vpack.c.bf16 %v290_v50, %v288_v49  ;;  %v289_v58 = vld [vmem:[#allocation2 + $0x590] sm:$0xff]  ;;  %v228_v59 = vld [vmem:[#allocation2 + $0x3a8] sm:$0xff]  ;;  %v2440_v63 = vpack.c.bf16 %v225_v55, %v223_v54 }
  0x20   :  { %2497 = vmatpush1.bf16.msra.mxu0 %v2496_v39  ;;  %2435 = vmatprep.subr.bf16.mxu1 %v2434_v40  ;;  %v230_v60 = vld [vmem:[#allocation2 + $0x3b8] sm:$0xff]  ;;  %v292_v61 = vld [vmem:[#allocation2 + $0x5a8] sm:$0xff]  ;;  %v2504_v1 = vpack.c.bf16 %v289_v58, %v287_v56  ;;  %v227_v3 = vld [vmem:[#allocation2 + $0x3a0] sm:$0xff] }
  0x21   :  { %2499 = vmatprep.subr.bf16.mxu0 %v2498_v44  ;;  %v294_v62 = vld [vmem:[#allocation2 + $0x5b8] sm:$0xff]  ;;  %v2442_v2 = vpack.c.bf16 %v230_v60, %v228_v59  ;;  %v229_v4 = vld [vmem:[#allocation2 + $0x3b0] sm:$0xff]  ;;  %v291_v5 = vld [vmem:[#allocation2 + $0x5a0] sm:$0xff] }
  0x22   :  { %v2506_v6 = vpack.c.bf16 %v294_v62, %v292_v61  ;;  %v293_v7 = vld [vmem:[#allocation2 + $0x5b0] sm:$0xff]  ;;  %v232_v8 = vld [vmem:[#allocation2 + $0x3c8] sm:$0xff]  ;;  %v234_v9 = vld [vmem:[#allocation2 + $0x3d8] sm:$0xff]  ;;  %v2444_v12 = vpack.c.bf16 %v229_v4, %v227_v3 }
  0x23   :  { %2437 = vmatpush1.bf16.msra.mxu1 %v2436_v51  ;;  %v296_v10 = vld [vmem:[#allocation2 + $0x5c8] sm:$0xff]  ;;  %v298_v11 = vld [vmem:[#allocation2 + $0x5d8] sm:$0xff]  ;;  %v2508_v13 = vpack.c.bf16 %v293_v7, %v291_v5  ;;  %v2446_v14 = vpack.c.bf16 %v234_v9, %v232_v8  ;;  %v231_v15 = vld [vmem:[#allocation2 + $0x3c0] sm:$0xff] }
  0x24   :  { %2501 = vmatpush1.bf16.msra.mxu0 %v2500_v52  ;;  %2439 = vmatprep.subr.bf16.mxu1 %v2438_v53  ;;  %v233_v16 = vld [vmem:[#allocation2 + $0x3d0] sm:$0xff]  ;;  %v295_v17 = vld [vmem:[#allocation2 + $0x5c0] sm:$0xff]  ;;  %v2510_v18 = vpack.c.bf16 %v298_v11, %v296_v10  ;;  %v236_v20 = vld [vmem:[#allocation2 + $0x3e8] sm:$0xff] }
  0x25   :  { %2503 = vmatprep.subr.bf16.mxu0 %v2502_v57  ;;  %v297_v19 = vld [vmem:[#allocation2 + $0x5d0] sm:$0xff]  ;;  %v238_v21 = vld [vmem:[#allocation2 + $0x3f8] sm:$0xff]  ;;  %v300_v22 = vld [vmem:[#allocation2 + $0x5e8] sm:$0xff]  ;;  %v2448_v24 = vpack.c.bf16 %v233_v16, %v231_v15 }
  0x26   :  { %v302_v23 = vld [vmem:[#allocation2 + $0x5f8] sm:$0xff]  ;;  %v235_v25 = vld [vmem:[#allocation2 + $0x3e0] sm:$0xff]  ;;  %v237_v26 = vld [vmem:[#allocation2 + $0x3f0] sm:$0xff]  ;;  %v2512_v27 = vpack.c.bf16 %v297_v19, %v295_v17  ;;  %v2450_v28 = vpack.c.bf16 %v238_v21, %v236_v20 }
  0x27   :  { %2441 = vmatpush1.bf16.msra.mxu1 %v2440_v63  ;;  %v299_v29 = vld [vmem:[#allocation2 + $0x5e0] sm:$0xff]  ;;  %v301_v30 = vld [vmem:[#allocation2 + $0x5f0] sm:$0xff]  ;;  %v240_v31 = vld [vmem:[#allocation2 + $0x408] sm:$0xff]  ;;  %v2514_v32 = vpack.c.bf16 %v302_v23, %v300_v22  ;;  %v2452_v38 = vpack.c.bf16 %v237_v26, %v235_v25 }
  0x28   :  { %2505 = vmatpush1.bf16.msra.mxu0 %v2504_v1  ;;  %2443 = vmatprep.subr.bf16.mxu1 %v2442_v2  ;;  %v242_v33 = vld [vmem:[#allocation2 + $0x418] sm:$0xff]  ;;  %v3289_v34 = vld [vmem:[%s3901_s0 + $0x28] sm:$0xff]  ;;  %v135_v35 = vld [vmem:[%s3901_s0 + $0x10] sm:$0xfe]  ;;  %v2516_v39 = vpack.c.bf16 %v301_v30, %v299_v29 }
  0x29   :  { %2507 = vmatprep.subr.bf16.mxu0 %v2506_v6  ;;  %v102_v36 = vld [vmem:[#allocation2 + $0x208] sm:$0xff]  ;;  %v104_v37 = vld [vmem:[#allocation2 + $0x218] sm:$0xff]  ;;  %v2454_v40 = vpack.c.bf16 %v242_v33, %v240_v31  ;;  %v170_v41 = vrot.slane %v135_v35, 1  ;;  %v171_v42 = vrot.slane %v3289_v34, 1  ;;  %v239_v43 = vld [vmem:[#allocation2 + $0x400] sm:$0xff] }
  0x2a   :  { %v241_v44 = vld [vmem:[#allocation2 + $0x410] sm:$0xff]  ;;  %v101_v45 = vld [vmem:[#allocation2 + $0x200] sm:$0xff]  ;;  %v2582_v46 = vpack.c.bf16 %v104_v37, %v102_v36  ;;  %v244_v48 = vld [vmem:[#allocation2 + $0x428] sm:$0xff] }
  0x2b   :  { %2445 = vmatpush1.bf16.msra.mxu1 %v2444_v12  ;;  %v103_v47 = vld [vmem:[#allocation2 + $0x210] sm:$0xff]  ;;  %v246_v49 = vld [vmem:[#allocation2 + $0x438] sm:$0xff]  ;;  %v106_v50 = vld [vmem:[#allocation2 + $0x228] sm:$0xff]  ;;  %v2456_v52 = vpack.c.bf16 %v241_v44, %v239_v43  ;;  %v172_v53 = vsel %vm163_vm0, %v170_v41, %v171_v42 }
  0x2c   :  { %2509 = vmatpush1.bf16.msra.mxu0 %v2508_v13  ;;  %2447 = vmatprep.subr.bf16.mxu1 %v2446_v14  ;;  %v108_v51 = vld [vmem:[#allocation2 + $0x238] sm:$0xff]  ;;  %v2584_v54 = vpack.c.bf16 %v103_v47, %v101_v45  ;;  %v2458_v55 = vpack.c.bf16 %v246_v49, %v244_v48  ;;  %v243_v56 = vld [vmem:[#allocation2 + $0x420] sm:$0xff]  ;;  %v245_v57 = vld [vmem:[#allocation2 + $0x430] sm:$0xff] }
  0x2d   :  { %2511 = vmatprep.subr.bf16.mxu0 %v2510_v18  ;;  %v105_v58 = vld [vmem:[#allocation2 + $0x220] sm:$0xff]  ;;  %v2586_v59 = vpack.c.bf16 %v108_v51, %v106_v50  ;;  %v107_v60 = vld [vmem:[#allocation2 + $0x230] sm:$0xff]  ;;  %v248_v61 = vld [vmem:[#allocation2 + $0x448] sm:$0xff]  ;;  %v2460_v2 = vpack.c.bf16 %v245_v57, %v243_v56 }
  0x2e   :  { %v250_v62 = vld [vmem:[#allocation2 + $0x458] sm:$0xff]  ;;  %v110_v63 = vld [vmem:[#allocation2 + $0x248] sm:$0xff]  ;;  %v247_v3 = vld [vmem:[#allocation2 + $0x440] sm:$0xff]  ;;  %v2588_v5 = vpack.c.bf16 %v107_v60, %v105_v58 }
  0x2f   :  { %2449 = vmatpush1.bf16.msra.mxu1 %v2448_v24  ;;  %v112_v1 = vld [vmem:[#allocation2 + $0x258] sm:$0xff]  ;;  %v138_v4 = vld [vmem:[%s3901_s0 + $0x40] sm:$0x1]  ;;  %v2462_v6 = vpack.c.bf16 %v250_v62, %v248_v61  ;;  %v249_v7 = vld [vmem:[#allocation2 + $0x450] sm:$0xff] }
  0x30   :  { %2513 = vmatpush1.bf16.msra.mxu0 %v2512_v27  ;;  %2451 = vmatprep.subr.bf16.mxu1 %v2450_v28  ;;  %v109_v8 = vld [vmem:[#allocation2 + $0x240] sm:$0xff]  ;;  %v111_v9 = vld [vmem:[#allocation2 + $0x250] sm:$0xff]  ;;  %v177_v10 = vrot.slane %v138_v4, 1  ;;  %v2590_v11 = vpack.c.bf16 %v112_v1, %v110_v63  ;;  %v252_v12 = vld [vmem:[#allocation2 + $0x468] sm:$0xff]  ;;  %v2464_v19 = vpack.c.bf16 %v249_v7, %v247_v3 }
  0x31   :  { %2515 = vmatprep.subr.bf16.mxu0 %v2514_v32  ;;  %v254_v13 = vld [vmem:[#allocation2 + $0x478] sm:$0xff]  ;;  %v114_v14 = vld [vmem:[#allocation2 + $0x268] sm:$0xff]  ;;  %v3304_v17 = vld [vmem:[%s3901_s0 + $0x70] sm:$0xff]  ;;  %v2592_v23 = vpack.c.bf16 %v111_v9, %v109_v8 }
  0x32   :  { %v116_v15 = vld [vmem:[#allocation2 + $0x278] sm:$0xff]  ;;  %v178_v16 = vsel %vm163_vm0, %v171_v42, %v177_v10  ;;  %v251_v20 = vld [vmem:[#allocation2 + $0x460] sm:$0xff]  ;;  %v186_v22 = vrot.slane %v3304_v17, 1  ;;  %v2466_v24 = vpack.c.bf16 %v254_v13, %v252_v12  ;;  %v253_v25 = vld [vmem:[#allocation2 + $0x470] sm:$0xff] }
  0x33   :  { %2453 = vmatpush1.bf16.msra.mxu1 %v2452_v38  ;;  %v141_v18 = vld [vmem:[%s3901_s0 + $0x58] sm:$0xfe]  ;;  %v113_v26 = vld [vmem:[#allocation2 + $0x260] sm:$0xff]  ;;  %v115_v27 = vld [vmem:[#allocation2 + $0x270] sm:$0xff]  ;;  %v2594_v28 = vpack.c.bf16 %v116_v15, %v114_v14  ;;  %v2468_v37 = vpack.c.bf16 %v253_v25, %v251_v20 }
  0x34   :  { %2517 = vmatpush1.bf16.msra.mxu0 %v2516_v39  ;;  %2455 = vmatprep.subr.bf16.mxu1 %v2454_v40  ;;  %v185_v21 = vrot.slane %v141_v18, 1  ;;  %v256_v29 = vld [vmem:[#allocation2 + $0x488] sm:$0xff]  ;;  %v258_v30 = vld [vmem:[#allocation2 + $0x498] sm:$0xff]  ;;  %v255_v38 = vld [vmem:[#allocation2 + $0x480] sm:$0xff]  ;;  %v2596_v40 = vpack.c.bf16 %v115_v27, %v113_v26 }
  0x35   :  { %2583 = vmatprep.subr.bf16.mxu0 %v2582_v46  ;;  %v144_v32 = vld [vmem:[%s3901_s0 + $0x88] sm:$0x1]  ;;  %v120_v35 = vld [vmem:[#allocation2 + $0x298] sm:$0xff]  ;;  %v3318_v39 = vld [vmem:[%s3901_s0 + $0x20] sm:$0xff]  ;;  %v2470_v41 = vpack.c.bf16 %v258_v30, %v256_v29 }
  0x36   :  { %v187_v31 = vsel %vm163_vm0, %v185_v21, %v186_v22  ;;  %v118_v33 = vld [vmem:[#allocation2 + $0x288] sm:$0xff]  ;;  %v192_v36 = vrot.slane %v144_v32, 1  ;;  %v257_v42 = vld [vmem:[#allocation2 + $0x490] sm:$0xff]  ;;  %v117_v43 = vld [vmem:[#allocation2 + $0x280] sm:$0xff]  ;;  %v168_v46 = vrot.slane %v3318_v39, 1 }
  0x37   :  { %457 = vmatmul.mubr.f32.vlgmr.msra.gmra.mrb[0].mxu0 %v172_v53  ;;  %2457 = vmatpush1.bf16.msra.mxu1 %v2456_v52  ;;  %v134_v45 = vld [vmem:[%s3901_s0 + $0x8] sm:$0xfe]  ;;  %v2598_v47 = vpack.c.bf16 %v120_v35, %v118_v33  ;;  %v119_v48 = vld [vmem:[#allocation2 + $0x290] sm:$0xff]  ;;  %v262_v50 = vld [vmem:[#allocation2 + $0x4b8] sm:$0xff] }
  0x38   :  { %2585 = vmatpush1.bf16.msra.mxu0 %v2584_v54  ;;  %2459 = vmatprep.subr.bf16.mxu1 %v2458_v55  ;;  %v193_v44 = vsel %vm163_vm0, %v186_v22, %v192_v36  ;;  %v260_v49 = vld [vmem:[#allocation2 + $0x4a8] sm:$0xff]  ;;  %v167_v51 = vrot.slane %v134_v45, 1  ;;  %v124_v53 = vld [vmem:[#allocation2 + $0x2b8] sm:$0xff]  ;;  %v2472_v54 = vpack.c.bf16 %v257_v42, %v255_v38  ;;  %v2600_v56 = vpack.c.bf16 %v119_v48, %v117_v43  ;;  %v259_v58 = vld [vmem:[#allocation2 + $0x4a0] sm:$0xff] }
  0x39   :  { %2587 = vmatprep.subr.bf16.mxu0 %v2586_v59  ;;  %462 = vmatprep.mubr.f32.mxu0 %v3257_v0  ;;  %v122_v52 = vld [vmem:[#allocation2 + $0x2a8] sm:$0xff]  ;;  %v2474_v57 = vpack.c.bf16 %v262_v50, %v260_v49  ;;  %v261_v59 = vld [vmem:[#allocation2 + $0x4b0] sm:$0xff]  ;;  %v121_v60 = vld [vmem:[#allocation2 + $0x2a0] sm:$0xff] }
  0x3a   :  { %v169_v55 = vsel %vm163_vm0, %v167_v51, %v168_v46  ;;  %v2602_v61 = vpack.c.bf16 %v124_v53, %v122_v52  ;;  %v123_v62 = vld [vmem:[#allocation2 + $0x2b0] sm:$0xff]  ;;  %v264_v63 = vld [vmem:[#allocation2 + $0x4c8] sm:$0xff]  ;;  %v266_v1 = vld [vmem:[#allocation2 + $0x4d8] sm:$0xff]  ;;  %v2476_v4 = vpack.c.bf16 %v261_v59, %v259_v58 }
  0x3b   :  { %2461 = vmatpush1.bf16.msra.mxu1 %v2460_v2  ;;  %463 = vmatmul.mubr.f32.gmra.mrb[2].mxu0 %v178_v16  ;;  %v126_v2 = vld [vmem:[#allocation2 + $0x2c8] sm:$0xff]  ;;  %v128_v3 = vld [vmem:[#allocation2 + $0x2d8] sm:$0xff]  ;;  %v263_v7 = vld [vmem:[#allocation2 + $0x4c0] sm:$0xff] }
  0x3c   :  { %2589 = vmatpush1.bf16.msra.mxu0 %v2588_v5  ;;  %2463 = vmatprep.subr.bf16.mxu1 %v2462_v6  ;;  %v2604_v5 = vpack.c.bf16 %v123_v62, %v121_v60  ;;  %v2478_v6 = vpack.c.bf16 %v266_v1, %v264_v63  ;;  %v265_v8 = vld [vmem:[#allocation2 + $0x4d0] sm:$0xff]  ;;  %v125_v9 = vld [vmem:[#allocation2 + $0x2c0] sm:$0xff]  ;;  %v2606_v10 = vpack.c.bf16 %v128_v3, %v126_v2  ;;  %v268_v12 = vld [vmem:[#allocation2 + $0x4e8] sm:$0xff] }
  0x3d   :  { %2591 = vmatprep.subr.bf16.mxu0 %v2590_v11  ;;  %468 = vmatprep.mubr.f32.mxu0 %v3257_v0  ;;  %v127_v11 = vld [vmem:[#allocation2 + $0x2d0] sm:$0xff]  ;;  %v270_v13 = vld [vmem:[#allocation2 + $0x4f8] sm:$0xff]  ;;  %v130_v14 = vld [vmem:[#allocation2 + $0x2e8] sm:$0xff]  ;;  %v2480_v16 = vpack.c.bf16 %v265_v8, %v263_v7 }
  0x3e   :  { %367 = vmatprep.mubr.f32.mxu1 %v169_v55  ;;  %v132_v15 = vld [vmem:[#allocation2 + $0x2f8] sm:$0xff]  ;;  %v267_v18 = vld [vmem:[#allocation2 + $0x4e0] sm:$0xff]  ;;  %v2608_v20 = vpack.c.bf16 %v127_v11, %v125_v9  ;;  %v2482_v21 = vpack.c.bf16 %v270_v13, %v268_v12  ;;  %v131_v26 = vld [vmem:[#allocation2 + $0x2f0] sm:$0xff] }
  0x3f   :  { %2465 = vmatpush1.bf16.msra.mxu1 %v2464_v19  ;;  %469 = vmatmul.mubr.f32.gmra.mrb[4].mxu0 %v187_v31  ;;  %v269_v19 = vld [vmem:[#allocation2 + $0x4f0] sm:$0xff]  ;;  %v129_v22 = vld [vmem:[#allocation2 + $0x2e0] sm:$0xff]  ;;  %v2610_v25 = vpack.c.bf16 %v132_v15, %v130_v14  ;;  %v38_v27 = vld [vmem:[#allocation2 + $0x8] sm:$0xff] }
  0x40   :  { %2593 = vmatpush1.bf16.msra.mxu0 %v2592_v23  ;;  %2467 = vmatprep.subr.bf16.mxu1 %v2466_v24  ;;  %v3333_v23 = vld [vmem:[%s3901_s0 + $0x18] sm:$0xff]  ;;  %v133_v24 = vld [vmem:[%s3901_s0] sm:$0xfe]  ;;  %v792_v29 = vld [vmem:[#allocation2 + $0x808] sm:$0xff]  ;;  %v2484_v32 = vpack.c.bf16 %v269_v19, %v267_v18  ;;  %v2612_v38 = vpack.c.bf16 %v131_v26, %v129_v22 }
  0x41   :  { %2595 = vmatprep.subr.bf16.mxu0 %v2594_v28  ;;  %474 = vmatprep.mubr.f32.mxu0 %v3257_v0  ;;  %v40_v28 = vld [vmem:[#allocation2 + $0x18] sm:$0xff]  ;;  %v164_v33 = vrot.slane %v133_v24, 1  ;;  %v165_v35 = vrot.slane %v3333_v23, 1  ;;  %v37_v36 = vld [vmem:[#allocation2] sm:$0xff]  ;;  %v793_v42 = vld [vmem:[#allocation2 + $0x810] sm:$0xff] }
  0x42   :  { %v794_v30 = vld [vmem:[#allocation2 + $0x818] sm:$0xff]  ;;  %v136_v43 = vld [vmem:[%s3901_s0 + $0x30] sm:$0x1]  ;;  %v3348_v48 = vld [vmem:[%s3901_s0 + $0x68] sm:$0xff] }
  0x43   :  { %2469 = vmatpush1.bf16.msra.mxu1 %v2468_v37  ;;  %475 = vmatmul.mubr.f32.gmra.mrb[6].mxu0 %v193_v44  ;;  %v137_v31 = vld [vmem:[%s3901_s0 + $0x38] sm:$0x1]  ;;  %v39_v37 = vld [vmem:[#allocation2 + $0x10] sm:$0xff]  ;;  %v2678_v44 = vpack.c.bf16 %v794_v30, %v792_v29  ;;  %v796_v52 = vld [vmem:[#allocation2 + $0x828] sm:$0xff]  ;;  %v183_v63 = vrot.slane %v3348_v48, 1 }
  0x44   :  { %2597 = vmatpush1.bf16.msra.mxu0 %v2596_v40  ;;  %2471 = vmatprep.subr.bf16.mxu1 %v2470_v41  ;;  %v2518_v40 = vpack.c.bf16 %v40_v28, %v38_v27  ;;  %v791_v41 = vld [vmem:[#allocation2 + $0x800] sm:$0xff]  ;;  %v175_v45 = vrot.slane %v137_v31, 1  ;;  %v140_v49 = vld [vmem:[%s3901_s0 + $0x50] sm:$0xfe]  ;;  %v44_v51 = vld [vmem:[#allocation2 + $0x38] sm:$0xff]  ;;  %v2520_v55 = vpack.c.bf16 %v39_v37, %v37_v36 }
  0x45   :  { %2599 = vmatprep.subr.bf16.mxu0 %v2598_v47  ;;  %634 = vmatprep.mubr.f32.mxu0 %v3257_v0  ;;  %v42_v47 = vld [vmem:[#allocation2 + $0x28] sm:$0xff]  ;;  %v27_v50 = vld [vmem:[%s3901_s0 + $0x10] sm:$0xff]  ;;  %v798_v53 = vld [vmem:[#allocation2 + $0x838] sm:$0xff]  ;;  %v2680_v60 = vpack.c.bf16 %v793_v42, %v791_v41  ;;  %v182_v62 = vrot.slane %v140_v49, 1 }
  0x46   :  { %v43_v58 = vld [vmem:[#allocation2 + $0x30] sm:$0xff]  ;;  %v795_v59 = vld [vmem:[#allocation2 + $0x820] sm:$0xff]  ;;  %v139_v2 = vld [vmem:[%s3901_s0 + $0x48] sm:$0xfe]  ;;  %v176_v3 = vsel %vm163_vm0, %v168_v46, %v175_v45 }
  0x47   :  { %2473 = vmatpush1.bf16.msra.mxu1 %v2472_v54  ;;  %v166_v54 = vsel %vm163_vm0, %v164_v33, %v165_v35  ;;  %v3361_v1 = vld [vmem:[%s3901_s0 + $0x60] sm:$0xff]  ;;  %v48_v7 = vld [vmem:[#allocation2 + $0x58] sm:$0xff]  ;;  %v800_v9 = vld [vmem:[#allocation2 + $0x848] sm:$0xff]  ;;  %v179_v13 = vrot.slane %v139_v2, 1 }
  0x48   :  { %2601 = vmatpush1.bf16.msra.mxu0 %v2600_v56  ;;  %2475 = vmatprep.subr.bf16.mxu1 %v2474_v57  ;;  %v173_v56 = vrot.slane %v136_v43, 1  ;;  %v41_v57 = vld [vmem:[#allocation2 + $0x20] sm:$0xff]  ;;  %v180_v14 = vrot.slane %v3361_v1, 1  ;;  %v47_v19 = vld [vmem:[#allocation2 + $0x50] sm:$0xff]  ;;  %v142_v22 = vld [vmem:[%s3901_s0 + $0x78] sm:$0x1] }
  0x49   :  { %2603 = vmatprep.subr.bf16.mxu0 %v2602_v61  ;;  %v797_v61 = vld [vmem:[#allocation2 + $0x830] sm:$0xff]  ;;  %v143_v8 = vld [vmem:[%s3901_s0 + $0x80] sm:$0x1]  ;;  %v2524_v12 = vpack.c.bf16 %v43_v58, %v41_v57  ;;  %v50_v26 = vld [vmem:[#allocation2 + $0x68] sm:$0xff] }
  0x4a   :  { %v174_v11 = vsel %vm163_vm0, %v165_v35, %v173_v56  ;;  %v45_v46 = vld [vmem:[#allocation2 + $0x40] sm:$0xff]  ;;  %v2684_v15 = vpack.c.bf16 %v797_v61, %v795_v59  ;;  %v52_v27 = vld [vmem:[#allocation2 + $0x78] sm:$0xff]  ;;  %v804_v28 = vld [vmem:[#allocation2 + $0x868] sm:$0xff]  ;;  %v181_v30 = vsel %vm163_vm0, %v179_v13, %v180_v14 }
  0x4b   :  { %2477 = vmatpush1.bf16.msra.mxu1 %v2476_v4  ;;  %v2522_v4 = vpack.c.bf16 %v44_v51, %v42_v47  ;;  %v806_v29 = vld [vmem:[#allocation2 + $0x878] sm:$0xff]  ;;  %v2528_v31 = vpack.c.bf16 %v47_v19, %v45_v46  ;;  %v2530_v36 = vpack.c.bf16 %v52_v27, %v50_v26  ;;  %v49_v37 = vld [vmem:[#allocation2 + $0x60] sm:$0xff]  ;;  %v805_v42 = vld [vmem:[#allocation2 + $0x870] sm:$0xff] }
  0x4c   :  { %2605 = vmatpush1.bf16.msra.mxu0 %v2604_v5  ;;  %2479 = vmatprep.subr.bf16.mxu1 %v2478_v6  ;;  %v2682_v5 = vpack.c.bf16 %v798_v53, %v796_v52  ;;  %v46_v6 = vld [vmem:[#allocation2 + $0x48] sm:$0xff]  ;;  %v2690_v41 = vpack.c.bf16 %v806_v29, %v804_v28  ;;  %v810_v47 = vld [vmem:[#allocation2 + $0x898] sm:$0xff]  ;;  %v807_v56 = vld [vmem:[#allocation2 + $0x880] sm:$0xff] }
  0x4d   :  { %2607 = vmatprep.subr.bf16.mxu0 %v2606_v10  ;;  %v802_v10 = vld [vmem:[#allocation2 + $0x858] sm:$0xff]  ;;  %v2526_v18 = vpack.c.bf16 %v48_v7, %v46_v6  ;;  %v54_v43 = vld [vmem:[#allocation2 + $0x88] sm:$0xff]  ;;  %v809_v58 = vld [vmem:[#allocation2 + $0x890] sm:$0xff] }
  0x4e   :  { %v2686_v24 = vpack.c.bf16 %v802_v10, %v800_v9  ;;  %v808_v45 = vld [vmem:[#allocation2 + $0x888] sm:$0xff]  ;;  %v33_v49 = vld [vmem:[%s3901_s0 + $0x58] sm:$0xff]  ;;  %v2696_v2 = vpack.c.bf16 %v809_v58, %v807_v56  ;;  %v811_v6 = vld [vmem:[#allocation2 + $0x8a0] sm:$0xff] }
  0x4f   :  { %2481 = vmatpush1.bf16.msra.mxu1 %v2480_v16  ;;  %v184_v16 = vsel %vm163_vm0, %v182_v62, %v183_v63  ;;  %v2694_v57 = vpack.c.bf16 %v810_v47, %v808_v45  ;;  %v58_v59 = vld [vmem:[#allocation2 + $0xa8] sm:$0xff]  ;;  %v814_v62 = vld [vmem:[#allocation2 + $0x8b8] sm:$0xff]  ;;  %v65_v27 = vld [vmem:[#allocation2 + $0xe0] sm:$0xff] }
  0x50   :  { %2609 = vmatpush1.bf16.msra.mxu0 %v2608_v20  ;;  %2483 = vmatprep.subr.bf16.mxu1 %v2482_v21  ;;  %v799_v20 = vld [vmem:[#allocation2 + $0x840] sm:$0xff]  ;;  %v190_v21 = vrot.slane %v143_v8, 1  ;;  %v812_v61 = vld [vmem:[#allocation2 + $0x8a8] sm:$0xff]  ;;  %v813_v8 = vld [vmem:[#allocation2 + $0x8b0] sm:$0xff] }
  0x51   :  { %2611 = vmatprep.subr.bf16.mxu0 %v2610_v25  ;;  %v801_v25 = vld [vmem:[#allocation2 + $0x850] sm:$0xff]  ;;  %v2698_v7 = vpack.c.bf16 %v814_v62, %v812_v61  ;;  %v62_v9 = vld [vmem:[#allocation2 + $0xc8] sm:$0xff]  ;;  %v64_v10 = vld [vmem:[#allocation2 + $0xd8] sm:$0xff] }
  0x52   :  { %v2688_v33 = vpack.c.bf16 %v801_v25, %v799_v20  ;;  %v191_v35 = vsel %vm163_vm0, %v183_v63, %v190_v21  ;;  %v2542_v46 = vpack.c.bf16 %v64_v10, %v62_v9  ;;  %v817_v20 = vld [vmem:[#allocation2 + $0x8d0] sm:$0xff]  ;;  %v66_v21 = vld [vmem:[#allocation2 + $0xe8] sm:$0xff]  ;;  %v822_v25 = vld [vmem:[#allocation2 + $0x8f8] sm:$0xff] }
  0x53   :  { %2485 = vmatpush1.bf16.msra.mxu1 %v2484_v32  ;;  %v188_v32 = vrot.slane %v142_v22, 1  ;;  %v68_v22 = vld [vmem:[#allocation2 + $0xf8] sm:$0xff]  ;;  %v664_v56 = vld [vmem:[%s3901_s0 + $0x40] sm:$0x3]  ;;  %v1150_v10 = vld [vmem:[#allocation2 + $0xb48] sm:$0xff] }
  0x54   :  { %2613 = vmatpush1.bf16.msra.mxu0 %v2612_v38  ;;  %2519 = vmatprep.subr.bf16.mxu1 %v2518_v40  ;;  %v51_v38 = vld [vmem:[#allocation2 + $0x70] sm:$0xff]  ;;  %v803_v40 = vld [vmem:[#allocation2 + $0x860] sm:$0xff]  ;;  %v2546_v29 = vpack.c.bf16 %v68_v22, %v66_v21  ;;  %v1148_v58 = vld [vmem:[#allocation2 + $0xb38] sm:$0xff] }
  0x55   :  { %2679 = vmatprep.subr.bf16.mxu0 %v2678_v44  ;;  %v56_v44 = vld [vmem:[#allocation2 + $0x98] sm:$0xff]  ;;  %v2532_v51 = vpack.c.bf16 %v51_v38, %v49_v37  ;;  %v2692_v52 = vpack.c.bf16 %v805_v42, %v803_v40  ;;  %v661_v37 = vld [vmem:[%s3901_s0 + $0x10] sm:$0xfc]  ;;  %v1142_v38 = vld [vmem:[#allocation2 + $0xb08] sm:$0xff] }
  0x56   :  { %368 = vmatmul.mubr.f32.vlgmr.msra.gmra.mrb[0].mxu1 %v166_v54  ;;  %v2534_v53 = vpack.c.bf16 %v56_v44, %v54_v43  ;;  %v53_v54 = vld [vmem:[#allocation2 + $0x80] sm:$0xff]  ;;  %v1144_v40 = vld [vmem:[#allocation2 + $0xb18] sm:$0xff]  ;;  %v71_v43 = vld [vmem:[#allocation2 + $0x110] sm:$0xff]  ;;  %v690_v47 = vrot.slane %v661_v37, 2 }
  0x57   :  { %635 = vmatmul.mubr.f32.vlgmr.msra.gmra.mrb[8].mxu0 %v27_v50  ;;  %2521 = vmatpush1.bf16.msra.mxu1 %v2520_v55  ;;  %v189_v50 = vsel %vm163_vm0, %v180_v14, %v188_v32  ;;  %v55_v55 = vld [vmem:[#allocation2 + $0x90] sm:$0xff]  ;;  %v2700_v14 = vpack.c.bf16 %v813_v8, %v811_v6  ;;  %v69_v42 = vld [vmem:[#allocation2 + $0x100] sm:$0xff]  ;;  %v80_v8 = vld [vmem:[#allocation2 + $0x158] sm:$0xff] }
  0x58   :  { %2681 = vmatpush1.bf16.msra.mxu0 %v2680_v60  ;;  %373 = vmatprep.mubr.f32.mxu1 %v176_v3  ;;  %v60_v60 = vld [vmem:[#allocation2 + $0xb8] sm:$0xff]  ;;  %v2536_v63 = vpack.c.bf16 %v55_v55, %v53_v54  ;;  %v821_v32 = vld [vmem:[#allocation2 + $0x8f0] sm:$0xff]  ;;  %v74_v54 = vld [vmem:[#allocation2 + $0x128] sm:$0xff] }
  0x59   :  { %2523 = vmatprep.subr.bf16.mxu1 %v2522_v4  ;;  %2683 = vmatprep.subr.bf16.mxu0 %v2682_v5  ;;  %v2538_v3 = vpack.c.bf16 %v60_v60, %v58_v59  ;;  %v57_v4 = vld [vmem:[#allocation2 + $0xa0] sm:$0xff]  ;;  %v59_v5 = vld [vmem:[#allocation2 + $0xb0] sm:$0xff]  ;;  %v76_v55 = vld [vmem:[#allocation2 + $0x138] sm:$0xff]  ;;  %v2552_v59 = vpack.c.bf16 %v71_v43, %v69_v42 }
  0x5a   :  { %374 = vmatmul.mubr.f32.gmra.mrb[2].mxu1 %v174_v11  ;;  %640 = vmatprep.mubr.f32.mxu0 %v3257_v0  ;;  %v816_v11 = vld [vmem:[#allocation2 + $0x8c8] sm:$0xff]  ;;  %v2540_v13 = vpack.c.bf16 %v59_v5, %v57_v4  ;;  %v73_v60 = vld [vmem:[#allocation2 + $0x120] sm:$0xff]  ;;  %v1147_v4 = vld [vmem:[#allocation2 + $0xb30] sm:$0xff]  ;;  %v697_v5 = vrot.slane %v664_v56, 2 }
  0x5b   :  { %2525 = vmatpush1.bf16.msra.mxu1 %v2524_v12  ;;  %379 = vmatprep.mubr.f32.mxu1 %v184_v16  ;;  %v818_v12 = vld [vmem:[#allocation2 + $0x8d8] sm:$0xff]  ;;  %v63_v16 = vld [vmem:[#allocation2 + $0xd0] sm:$0xff]  ;;  %v1158_v43 = vld [vmem:[#allocation2 + $0xb88] sm:$0xff] }
  0x5c   :  { %2685 = vmatpush1.bf16.msra.mxu0 %v2684_v15  ;;  %2527 = vmatprep.subr.bf16.mxu1 %v2526_v18  ;;  %v61_v15 = vld [vmem:[#allocation2 + $0xc0] sm:$0xff]  ;;  %v2702_v19 = vpack.c.bf16 %v818_v12, %v816_v11  ;;  %v667_v9 = vld [vmem:[%s3901_s0 + $0x58] sm:$0xfc]  ;;  %v90_v56 = vld [vmem:[#allocation2 + $0x1a8] sm:$0xff] }
  0x5d   :  { %2687 = vmatprep.subr.bf16.mxu0 %v2686_v24  ;;  %641 = vmatmul.mubr.f32.gmra.mrb[10].mxu0 %v3289_v34  ;;  %v815_v18 = vld [vmem:[#allocation2 + $0x8c0] sm:$0xff]  ;;  %v820_v24 = vld [vmem:[#allocation2 + $0x8e8] sm:$0xff]  ;;  %v2544_v26 = vpack.c.bf16 %v63_v16, %v61_v15  ;;  %v1152_v11 = vld [vmem:[#allocation2 + $0xb58] sm:$0xff]  ;;  %v705_v21 = vrot.slane %v667_v9, 2 }
  0x5e   :  { %380 = vmatmul.mubr.f32.gmra.mrb[4].mxu1 %v181_v30  ;;  %646 = vmatprep.mubr.f32.mxu0 %v3257_v0  ;;  %v2704_v28 = vpack.c.bf16 %v817_v20, %v815_v18  ;;  %v67_v30 = vld [vmem:[#allocation2 + $0xf0] sm:$0xff]  ;;  %v1149_v18 = vld [vmem:[#allocation2 + $0xb40] sm:$0xff]  ;;  %v2782_v22 = vpack.c.bf16 %v1152_v11, %v1150_v10  ;;  %v88_v42 = vld [vmem:[#allocation2 + $0x198] sm:$0xff] }
  0x5f   :  { %2529 = vmatpush1.bf16.msra.mxu1 %v2528_v31  ;;  %385 = vmatprep.mubr.f32.mxu1 %v191_v35  ;;  %v819_v31 = vld [vmem:[#allocation2 + $0x8e0] sm:$0xff]  ;;  %v70_v35 = vld [vmem:[#allocation2 + $0x108] sm:$0xff]  ;;  %v79_v16 = vld [vmem:[#allocation2 + $0x150] sm:$0xff] }
  0x60   :  { %2689 = vmatpush1.bf16.msra.mxu0 %v2688_v33  ;;  %2531 = vmatprep.subr.bf16.mxu1 %v2530_v36  ;;  %v2706_v33 = vpack.c.bf16 %v822_v25, %v820_v24  ;;  %v72_v36 = vld [vmem:[#allocation2 + $0x118] sm:$0xff]  ;;  %v2708_v44 = vpack.c.bf16 %v821_v32, %v819_v31  ;;  %v82_v24 = vld [vmem:[#allocation2 + $0x168] sm:$0xff]  ;;  %v81_v32 = vld [vmem:[#allocation2 + $0x160] sm:$0xff] }
  0x61   :  { %2691 = vmatprep.subr.bf16.mxu0 %v2690_v41  ;;  %647 = vmatmul.mubr.f32.gmra.mrb[12].mxu0 %v33_v49  ;;  %v2548_v41 = vpack.c.bf16 %v67_v30, %v65_v27  ;;  %v2550_v45 = vpack.c.bf16 %v72_v36, %v70_v35  ;;  %v691_v49 = vrot.slane %v3289_v34, 2  ;;  %v84_v25 = vld [vmem:[#allocation2 + $0x178] sm:$0xff]  ;;  %v1154_v27 = vld [vmem:[#allocation2 + $0xb68] sm:$0xff]  ;;  %v1153_v35 = vld [vmem:[#allocation2 + $0xb60] sm:$0xff] }
  0x62   :  { %386 = vmatmul.mubr.f32.gmra.mrb[6].mxu1 %v189_v50  ;;  %652 = vmatprep.mubr.f32.mxu0 %v3257_v0  ;;  %v1141_v50 = vld [vmem:[#allocation2 + $0xb00] sm:$0xff]  ;;  %v2562_v31 = vpack.c.bf16 %v84_v25, %v82_v24  ;;  %v1168_v9 = vld [vmem:[#allocation2 + $0xbd8] sm:$0xff] }
  0x63   :  { %2533 = vmatpush1.bf16.msra.mxu1 %v2532_v51  ;;  %v1143_v51 = vld [vmem:[#allocation2 + $0xb10] sm:$0xff]  ;;  %v692_v61 = vsel %vm683_vm1, %v690_v47, %v691_v49  ;;  %v698_v20 = vsel %vm683_vm1, %v691_v49, %v697_v5  ;;  %v97_v24 = vld [vmem:[#allocation2 + $0x1e0] sm:$0xff] }
  0x64   :  { %2693 = vmatpush1.bf16.msra.mxu0 %v2692_v52  ;;  %2535 = vmatprep.subr.bf16.mxu1 %v2534_v53  ;;  %v26_v52 = vld [vmem:[%s3901_s0 + $0x8] sm:$0xff]  ;;  %v2774_v53 = vpack.c.bf16 %v1144_v40, %v1142_v38  ;;  %v2776_v62 = vpack.c.bf16 %v1143_v51, %v1141_v50  ;;  %v1155_v40 = vld [vmem:[#allocation2 + $0xb70] sm:$0xff]  ;;  %v85_v50 = vld [vmem:[#allocation2 + $0x180] sm:$0xff] }
  0x65   :  { %2695 = vmatprep.subr.bf16.mxu0 %v2694_v57  ;;  %653 = vmatmul.mubr.f32.gmra.mrb[14].mxu0 %v3304_v17  ;;  %v1146_v57 = vld [vmem:[#allocation2 + $0xb28] sm:$0xff]  ;;  %v2788_v47 = vpack.c.bf16 %v1155_v40, %v1153_v35  ;;  %v87_v51 = vld [vmem:[#allocation2 + $0x190] sm:$0xff] }
  0x66   :  { %976 = vmatprep.mubr.f32.mxu0 %v3257_v0  ;;  %545 = vmatprep.mubr.f32.mxu1 %v26_v52  ;;  %v2778_v6 = vpack.c.bf16 %v1148_v58, %v1146_v57  ;;  %v1157_v52 = vld [vmem:[#allocation2 + $0xb80] sm:$0xff]  ;;  %v92_v57 = vld [vmem:[#allocation2 + $0x1b8] sm:$0xff]  ;;  %v1162_v58 = vld [vmem:[#allocation2 + $0xba8] sm:$0xff] }
  0x67   :  { %2537 = vmatpush1.bf16.msra.mxu1 %v2536_v63  ;;  %v2554_v63 = vpack.c.bf16 %v76_v55, %v74_v54  ;;  %v1159_v55 = vld [vmem:[#allocation2 + $0xb90] sm:$0xff]  ;;  %v1492_v35 = vld [vmem:[#allocation2 + $0xe08] sm:$0xff] }
  0x68   :  { %2697 = vmatpush1.bf16.msra.mxu0 %v2696_v2  ;;  %2539 = vmatprep.subr.bf16.mxu1 %v2538_v3  ;;  %v75_v2 = vld [vmem:[#allocation2 + $0x130] sm:$0xff]  ;;  %v1145_v3 = vld [vmem:[#allocation2 + $0xb20] sm:$0xff] }
  0x69   :  { %2699 = vmatprep.subr.bf16.mxu0 %v2698_v7  ;;  %v78_v7 = vld [vmem:[#allocation2 + $0x148] sm:$0xff]  ;;  %v2556_v12 = vpack.c.bf16 %v75_v2, %v73_v60  ;;  %v2568_v60 = vpack.c.bf16 %v87_v51, %v85_v50  ;;  %v91_v2 = vld [vmem:[#allocation2 + $0x1b0] sm:$0xff]  ;;  %v734_v51 = vld [vmem:[#allocation2 + $0x638] sm:$0xff] }
  0x6a   :  { %v2558_v15 = vpack.c.bf16 %v80_v8, %v78_v7  ;;  %v1163_v5 = vld [vmem:[#allocation2 + $0xbb0] sm:$0xff]  ;;  %v96_v7 = vld [vmem:[#allocation2 + $0x1d8] sm:$0xff]  ;;  %v1166_v8 = vld [vmem:[#allocation2 + $0xbc8] sm:$0xff] }
  0x6b   :  { %2541 = vmatpush1.bf16.msra.mxu1 %v2540_v13  ;;  %v77_v13 = vld [vmem:[#allocation2 + $0x140] sm:$0xff]  ;;  %v732_v50 = vld [vmem:[#allocation2 + $0x628] sm:$0xff] }
  0x6c   :  { %2701 = vmatpush1.bf16.msra.mxu0 %v2700_v14  ;;  %2543 = vmatprep.subr.bf16.mxu1 %v2542_v46  ;;  %v706_v14 = vrot.slane %v3304_v17, 2  ;;  %v2780_v46 = vpack.c.bf16 %v1147_v4, %v1145_v3  ;;  %v1161_v3 = vld [vmem:[#allocation2 + $0xba0] sm:$0xff] }
  0x6d   :  { %2703 = vmatprep.subr.bf16.mxu0 %v2702_v19  ;;  %v1151_v19 = vld [vmem:[#allocation2 + $0xb50] sm:$0xff]  ;;  %v2796_v11 = vpack.c.bf16 %v1163_v5, %v1161_v3  ;;  %v738_v3 = vld [vmem:[#allocation2 + $0x658] sm:$0xff] }
  0x6e   :  { %v2784_v30 = vpack.c.bf16 %v1151_v19, %v1149_v18  ;;  %v707_v36 = vsel %vm683_vm1, %v705_v21, %v706_v14  ;;  %v98_v18 = vld [vmem:[#allocation2 + $0x1e8] sm:$0xff]  ;;  %v100_v19 = vld [vmem:[#allocation2 + $0x1f8] sm:$0xff] }
  0x6f   :  { %2545 = vmatpush1.bf16.msra.mxu1 %v2544_v26  ;;  %v670_v26 = vld [vmem:[%s3901_s0 + $0x88] sm:$0x3]  ;;  %v1172_v21 = vld [vmem:[#allocation2 + $0xbf8] sm:$0xff] }
  0x70   :  { %2705 = vmatpush1.bf16.msra.mxu0 %v2704_v28  ;;  %2547 = vmatprep.subr.bf16.mxu1 %v2546_v29  ;;  %v1156_v28 = vld [vmem:[#allocation2 + $0xb78] sm:$0xff]  ;;  %v2560_v29 = vpack.c.bf16 %v79_v16, %v77_v13  ;;  %v712_v37 = vrot.slane %v670_v26, 2  ;;  %v93_v13 = vld [vmem:[#allocation2 + $0x1c0] sm:$0xff]  ;;  %v1167_v16 = vld [vmem:[#allocation2 + $0xbd0] sm:$0xff]  ;;  %v2578_v26 = vpack.c.bf16 %v100_v19, %v98_v18 }
  0x71   :  { %2707 = vmatprep.subr.bf16.mxu0 %v2706_v33  ;;  %v83_v33 = vld [vmem:[#allocation2 + $0x170] sm:$0xff]  ;;  %v2786_v38 = vpack.c.bf16 %v1156_v28, %v1154_v27  ;;  %v1169_v28 = vld [vmem:[#allocation2 + $0xbe0] sm:$0xff]  ;;  %v1502_v5 = vld [vmem:[#allocation2 + $0xe58] sm:$0xff] }
  0x72   :  { %v99_v27 = vld [vmem:[#allocation2 + $0x1f0] sm:$0xff]  ;;  %v742_v18 = vld [vmem:[#allocation2 + $0x678] sm:$0xff]  ;;  %v1504_v19 = vld [vmem:[#allocation2 + $0xe68] sm:$0xff] }
  0x73   :  { %2549 = vmatpush1.bf16.msra.mxu1 %v2548_v41  ;;  %v86_v41 = vld [vmem:[#allocation2 + $0x188] sm:$0xff] }
  0x74   :  { %2709 = vmatpush1.bf16.msra.mxu0 %v2708_v44  ;;  %2551 = vmatprep.subr.bf16.mxu1 %v2550_v45  ;;  %v1160_v44 = vld [vmem:[#allocation2 + $0xb98] sm:$0xff]  ;;  %v2564_v45 = vpack.c.bf16 %v83_v33, %v81_v32  ;;  %v2566_v49 = vpack.c.bf16 %v88_v42, %v86_v41  ;;  %v1011_v33 = vld [vmem:[%s3901_s0 + $0x10] sm:$0xf8]  ;;  %v1041_v42 = vrot.slane %v3289_v34, 3  ;;  %v1014_v34 = vld [vmem:[%s3901_s0 + $0x40] sm:$0x7] }
  0x75   :  { %2775 = vmatprep.subr.bf16.mxu0 %v2774_v53  ;;  %v713_v53 = vsel %vm683_vm1, %v706_v14, %v712_v37  ;;  %v2790_v54 = vpack.c.bf16 %v1160_v44, %v1158_v43  ;;  %v95_v14 = vld [vmem:[#allocation2 + $0x1d0] sm:$0xff]  ;;  %v730_v32 = vld [vmem:[#allocation2 + $0x618] sm:$0xff]  ;;  %v2580_v37 = vpack.c.bf16 %v99_v27, %v97_v24  ;;  %v1040_v41 = vrot.slane %v1011_v33, 3  ;;  %v727_v43 = vld [vmem:[#allocation2 + $0x600] sm:$0xff] }
  0x76   :  { %v729_v44 = vld [vmem:[#allocation2 + $0x610] sm:$0xff]  ;;  %v1056_v24 = vrot.slane %v3304_v17, 3  ;;  %v744_v33 = vld [vmem:[#allocation2 + $0x688] sm:$0xff] }
  0x77   :  { %977 = vmatmul.mubr.f32.vlgmr.msra.gmra.mrb[16].mxu0 %v692_v61  ;;  %2553 = vmatpush1.bf16.msra.mxu1 %v2552_v59  ;;  %v1164_v59 = vld [vmem:[#allocation2 + $0xbb8] sm:$0xff]  ;;  %v2792_v61 = vpack.c.bf16 %v1159_v55, %v1157_v52  ;;  %v1496_v52 = vld [vmem:[#allocation2 + $0xe28] sm:$0xff]  ;;  %v2616_v55 = vpack.c.bf16 %v729_v44, %v727_v43 }
  0x78   :  { %2777 = vmatpush1.bf16.msra.mxu0 %v2776_v62  ;;  %2555 = vmatprep.subr.bf16.mxu1 %v2554_v63  ;;  %v2570_v62 = vpack.c.bf16 %v92_v57, %v90_v56  ;;  %v89_v63 = vld [vmem:[#allocation2 + $0x1a0] sm:$0xff]  ;;  %v2794_v4 = vpack.c.bf16 %v1164_v59, %v1162_v58  ;;  %v1042_v56 = vsel %vm1033_vm2, %v1040_v41, %v1041_v42  ;;  %v733_v59 = vld [vmem:[#allocation2 + $0x630] sm:$0xff] }
  0x79   :  { %2779 = vmatprep.subr.bf16.mxu0 %v2778_v6  ;;  %982 = vmatprep.mubr.f32.mxu0 %v3257_v0  ;;  %v94_v6 = vld [vmem:[#allocation2 + $0x1c8] sm:$0xff]  ;;  %v2572_v10 = vpack.c.bf16 %v91_v2, %v89_v63  ;;  %v731_v58 = vld [vmem:[#allocation2 + $0x620] sm:$0xff]  ;;  %v1497_v63 = vld [vmem:[#allocation2 + $0xe30] sm:$0xff] }
  0x7a   :  { %v736_v2 = vld [vmem:[#allocation2 + $0x648] sm:$0xff] }
  0x7b   :  { %2557 = vmatpush1.bf16.msra.mxu1 %v2556_v12  ;;  %983 = vmatmul.mubr.f32.gmra.mrb[18].mxu0 %v698_v20  ;;  %v2574_v12 = vpack.c.bf16 %v96_v7, %v94_v6  ;;  %v1170_v20 = vld [vmem:[#allocation2 + $0xbe8] sm:$0xff]  ;;  %v1047_v6 = vrot.slane %v1014_v34, 3  ;;  %v2620_v7 = vpack.c.bf16 %v733_v59, %v731_v58 }
  0x7c   :  { %2781 = vmatpush1.bf16.msra.mxu0 %v2780_v46  ;;  %2559 = vmatprep.subr.bf16.mxu1 %v2558_v15  ;;  %v1165_v46 = vld [vmem:[#allocation2 + $0xbc0] sm:$0xff]  ;;  %v2798_v15 = vpack.c.bf16 %v1168_v9, %v1166_v8  ;;  %v32_v8 = vld [vmem:[%s3901_s0 + $0x50] sm:$0xff]  ;;  %v1017_v9 = vld [vmem:[%s3901_s0 + $0x58] sm:$0xf8] }
  0x7d   :  { %2783 = vmatprep.subr.bf16.mxu0 %v2782_v22  ;;  %988 = vmatprep.mubr.f32.mxu0 %v3257_v0  ;;  %v2576_v22 = vpack.c.bf16 %v95_v14, %v93_v13  ;;  %v2800_v25 = vpack.c.bf16 %v1167_v16, %v1165_v46  ;;  %v737_v13 = vld [vmem:[#allocation2 + $0x650] sm:$0xff]  ;;  %v1499_v14 = vld [vmem:[#allocation2 + $0xe40] sm:$0xff]  ;;  %v740_v16 = vld [vmem:[#allocation2 + $0x668] sm:$0xff] }
  0x7f   :  { %2561 = vmatpush1.bf16.msra.mxu1 %v2560_v29  ;;  %989 = vmatmul.mubr.f32.gmra.mrb[20].mxu0 %v707_v36  ;;  %v1171_v29 = vld [vmem:[#allocation2 + $0xbf0] sm:$0xff]  ;;  %v1494_v36 = vld [vmem:[#allocation2 + $0xe18] sm:$0xff] }
  0x80   :  { %2785 = vmatpush1.bf16.msra.mxu0 %v2784_v30  ;;  %2563 = vmatprep.subr.bf16.mxu1 %v2562_v31  ;;  %v2802_v30 = vpack.c.bf16 %v1172_v21, %v1170_v20  ;;  %v728_v31 = vld [vmem:[#allocation2 + $0x608] sm:$0xff]  ;;  %v1506_v20 = vld [vmem:[#allocation2 + $0xe78] sm:$0xff]  ;;  %v1048_v21 = vsel %vm1033_vm2, %v1041_v42, %v1047_v6 }
  0x81   :  { %2787 = vmatprep.subr.bf16.mxu0 %v2786_v38  ;;  %994 = vmatprep.mubr.f32.mxu0 %v3257_v0  ;;  %v2804_v38 = vpack.c.bf16 %v1171_v29, %v1169_v28  ;;  %v2614_v40 = vpack.c.bf16 %v730_v32, %v728_v31  ;;  %v2626_v28 = vpack.c.bf16 %v742_v18, %v740_v16  ;;  %v739_v29 = vld [vmem:[#allocation2 + $0x660] sm:$0xff]  ;;  %v1505_v32 = vld [vmem:[#allocation2 + $0xe70] sm:$0xff]  ;;  %v660_v42 = vld [vmem:[%s3901_s0 + $0x8] sm:$0xfc] }
  0x82   :  { %v1503_v31 = vld [vmem:[#allocation2 + $0xe60] sm:$0xff]  ;;  %v2882_v17 = vpack.c.bf16 %v1506_v20, %v1504_v19  ;;  %v687_v44 = vrot.slane %v660_v42, 2  ;;  %v1518_v6 = vld [vmem:[#allocation2 + $0xed8] sm:$0xff]  ;;  %v1520_v16 = vld [vmem:[#allocation2 + $0xee8] sm:$0xff] }
  0x83   :  { %2565 = vmatpush1.bf16.msra.mxu1 %v2564_v45  ;;  %995 = vmatmul.mubr.f32.gmra.mrb[22].mxu0 %v713_v53  ;;  %v2870_v45 = vpack.c.bf16 %v1494_v36, %v1492_v35  ;;  %v1498_v53 = vld [vmem:[#allocation2 + $0xe38] sm:$0xff]  ;;  %v688_v36 = vrot.slane %v3318_v39, 2  ;;  %v755_v20 = vld [vmem:[#allocation2 + $0x6e0] sm:$0xff] }
  0x84   :  { %2789 = vmatpush1.bf16.msra.mxu0 %v2788_v47  ;;  %2567 = vmatprep.subr.bf16.mxu1 %v2566_v49  ;;  %v1491_v47 = vld [vmem:[#allocation2 + $0xe00] sm:$0xff]  ;;  %v1493_v49 = vld [vmem:[#allocation2 + $0xe10] sm:$0xff]  ;;  %v746_v35 = vld [vmem:[#allocation2 + $0x698] sm:$0xff] }
  0x85   :  { %2791 = vmatprep.subr.bf16.mxu0 %v2790_v54  ;;  %1326 = vmatprep.mubr.f32.mxu0 %v3257_v0  ;;  %v25_v54 = vld [vmem:[%s3901_s0] sm:$0xff]  ;;  %v2872_v57 = vpack.c.bf16 %v1493_v49, %v1491_v47  ;;  %v2630_v47 = vpack.c.bf16 %v746_v35, %v744_v33  ;;  %v689_v34 = vsel %vm683_vm1, %v687_v44, %v688_v36  ;;  %v1522_v18 = vld [vmem:[#allocation2 + $0xef8] sm:$0xff] }
  0x86   :  { %v743_v49 = vld [vmem:[#allocation2 + $0x680] sm:$0xff] }
  0x87   :  { %2569 = vmatpush1.bf16.msra.mxu1 %v2568_v60  ;;  %v1495_v60 = vld [vmem:[#allocation2 + $0xe20] sm:$0xff] }
  0x88   :  { %2793 = vmatpush1.bf16.msra.mxu0 %v2792_v61  ;;  %2571 = vmatprep.subr.bf16.mxu1 %v2570_v62  ;;  %v2618_v61 = vpack.c.bf16 %v734_v51, %v732_v50  ;;  %v2874_v62 = vpack.c.bf16 %v1498_v53, %v1496_v52  ;;  %v745_v50 = vld [vmem:[#allocation2 + $0x690] sm:$0xff]  ;;  %v1507_v51 = vld [vmem:[#allocation2 + $0xe80] sm:$0xff] }
  0x89   :  { %2795 = vmatprep.subr.bf16.mxu0 %v2794_v4  ;;  %v1500_v4 = vld [vmem:[#allocation2 + $0xe48] sm:$0xff]  ;;  %v1509_v53 = vld [vmem:[#allocation2 + $0xe90] sm:$0xff]  ;;  %v2632_v58 = vpack.c.bf16 %v745_v50, %v743_v49  ;;  %v1777_v42 = vld [vmem:[#allocation2 + $0xf00] sm:$0xff] }
  0x8a   :  { %v2878_v46 = vpack.c.bf16 %v1502_v5, %v1500_v4  ;;  %v2888_v59 = vpack.c.bf16 %v1509_v53, %v1507_v51  ;;  %v754_v4 = vld [vmem:[#allocation2 + $0x6d8] sm:$0xff]  ;;  %v1516_v5 = vld [vmem:[#allocation2 + $0xec8] sm:$0xff]  ;;  %v1364_v49 = vld [vmem:[%s3901_s0 + $0x40] sm:$0xf] }
  0x8b   :  { %2573 = vmatpush1.bf16.msra.mxu1 %v2572_v10  ;;  %v2876_v10 = vpack.c.bf16 %v1497_v63, %v1495_v60  ;;  %v1511_v63 = vld [vmem:[#allocation2 + $0xea0] sm:$0xff]  ;;  %v1782_v50 = vld [vmem:[#allocation2 + $0xf28] sm:$0xff]  ;;  %v1784_v51 = vld [vmem:[#allocation2 + $0xf38] sm:$0xff] }
  0x8c   :  { %2797 = vmatpush1.bf16.msra.mxu0 %v2796_v11  ;;  %2575 = vmatprep.subr.bf16.mxu1 %v2574_v12  ;;  %v2622_v11 = vpack.c.bf16 %v738_v3, %v736_v2  ;;  %v735_v12 = vld [vmem:[#allocation2 + $0x640] sm:$0xff]  ;;  %v1513_v3 = vld [vmem:[#allocation2 + $0xeb0] sm:$0xff] }
  0x8d   :  { %2799 = vmatprep.subr.bf16.mxu0 %v2798_v15  ;;  %v1501_v15 = vld [vmem:[#allocation2 + $0xe50] sm:$0xff]  ;;  %v763_v53 = vld [vmem:[#allocation2 + $0x720] sm:$0xff] }
  0x8e   :  { %v2880_v27 = vpack.c.bf16 %v1501_v15, %v1499_v14  ;;  %v1517_v14 = vld [vmem:[#allocation2 + $0xed0] sm:$0xff]  ;;  %v758_v15 = vld [vmem:[#allocation2 + $0x6f8] sm:$0xff] }
  0x8f   :  { %2577 = vmatpush1.bf16.msra.mxu1 %v2576_v22  ;;  %v1055_v22 = vrot.slane %v1017_v9, 3 }
  0x90   :  { %2801 = vmatpush1.bf16.msra.mxu0 %v2800_v25  ;;  %2579 = vmatprep.subr.bf16.mxu1 %v2578_v26  ;;  %v31_v25 = vld [vmem:[%s3901_s0 + $0x48] sm:$0xff]  ;;  %v2624_v26 = vpack.c.bf16 %v737_v13, %v735_v12  ;;  %v1515_v12 = vld [vmem:[#allocation2 + $0xec0] sm:$0xff]  ;;  %v2894_v13 = vpack.c.bf16 %v1518_v6, %v1516_v5 }
  0x91   :  { %2803 = vmatprep.subr.bf16.mxu0 %v2802_v30  ;;  %v741_v30 = vld [vmem:[#allocation2 + $0x670] sm:$0xff] }
  0x92   :  { %v2628_v43 = vpack.c.bf16 %v741_v30, %v739_v29  ;;  %v1361_v29 = vld [vmem:[%s3901_s0 + $0x10] sm:$0xf0]  ;;  %v1778_v30 = vld [vmem:[#allocation2 + $0xf08] sm:$0xff] }
  0x93   :  { %2581 = vmatpush1.bf16.msra.mxu1 %v2580_v37  ;;  %v1508_v37 = vld [vmem:[#allocation2 + $0xe88] sm:$0xff] }
  0x94   :  { %2805 = vmatpush1.bf16.msra.mxu0 %v2804_v38  ;;  %2615 = vmatprep.subr.bf16.mxu1 %v2614_v40  ;;  %v1510_v38 = vld [vmem:[#allocation2 + $0xe98] sm:$0xff]  ;;  %v1057_v40 = vsel %vm1033_vm2, %v1055_v22, %v1056_v24 }
  0x95   :  { %2871 = vmatprep.subr.bf16.mxu0 %v2870_v45  ;;  %v2884_v45 = vpack.c.bf16 %v1505_v32, %v1503_v31  ;;  %v2886_v52 = vpack.c.bf16 %v1510_v38, %v1508_v37  ;;  %v1780_v31 = vld [vmem:[#allocation2 + $0xf18] sm:$0xff]  ;;  %v759_v32 = vld [vmem:[#allocation2 + $0x700] sm:$0xff]  ;;  %v761_v37 = vld [vmem:[#allocation2 + $0x710] sm:$0xff]  ;;  %v1390_v38 = vrot.slane %v1361_v29, 4 }
  0x96   :  { %546 = vmatmul.mubr.f32.vlgmr.msra.gmra.mrb[8].mxu1 %v25_v54  ;;  %v748_v54 = vld [vmem:[#allocation2 + $0x6a8] sm:$0xff]  ;;  %v2902_v44 = vpack.c.bf16 %v1780_v31, %v1778_v30  ;;  %v1791_v29 = vld [vmem:[#allocation2 + $0xf70] sm:$0xff]  ;;  %v778_v31 = vld [vmem:[#allocation2 + $0x798] sm:$0xff] }
  0x97   :  { %1327 = vmatmul.mubr.f32.vlgmr.msra.gmra.mrb[24].mxu0 %v1042_v56  ;;  %2617 = vmatpush1.bf16.msra.mxu1 %v2616_v55  ;;  %v750_v55 = vld [vmem:[#allocation2 + $0x6b8] sm:$0xff]  ;;  %v776_v30 = vld [vmem:[#allocation2 + $0x788] sm:$0xff] }
  0x98   :  { %2873 = vmatpush1.bf16.msra.mxu0 %v2872_v57  ;;  %551 = vmatprep.mubr.f32.mxu1 %v3318_v39  ;;  %v1514_v56 = vld [vmem:[#allocation2 + $0xeb8] sm:$0xff]  ;;  %v2634_v60 = vpack.c.bf16 %v750_v55, %v748_v54  ;;  %v1818_v39 = vld [vmem:[#allocation2 + $0x1048] sm:$0xff] }
  0x99   :  { %2619 = vmatprep.subr.bf16.mxu1 %v2618_v61  ;;  %2875 = vmatprep.subr.bf16.mxu0 %v2874_v62  ;;  %v747_v61 = vld [vmem:[#allocation2 + $0x6a0] sm:$0xff]  ;;  %v749_v62 = vld [vmem:[#allocation2 + $0x6b0] sm:$0xff] }
  0x9a   :  { %552 = vmatmul.mubr.f32.gmra.mrb[10].mxu1 %v3333_v23  ;;  %1332 = vmatprep.mubr.f32.mxu0 %v3257_v0  ;;  %v1020_v23 = vld [vmem:[%s3901_s0 + $0x88] sm:$0x7] }
  0x9b   :  { %2621 = vmatpush1.bf16.msra.mxu1 %v2620_v7  ;;  %557 = vmatprep.mubr.f32.mxu1 %v32_v8  ;;  %v1062_v41 = vrot.slane %v1020_v23, 3  ;;  %v2636_v7 = vpack.c.bf16 %v749_v62, %v747_v61  ;;  %v2892_v8 = vpack.c.bf16 %v1513_v3, %v1511_v63  ;;  %v2898_v23 = vpack.c.bf16 %v1522_v18, %v1520_v16  ;;  %v770_v61 = vld [vmem:[#allocation2 + $0x758] sm:$0xff]  ;;  %v1786_v63 = vld [vmem:[#allocation2 + $0xf48] sm:$0xff] }
  0x9c   :  { %2877 = vmatpush1.bf16.msra.mxu0 %v2876_v10  ;;  %2623 = vmatprep.subr.bf16.mxu1 %v2622_v11  ;;  %v751_v10 = vld [vmem:[#allocation2 + $0x6c0] sm:$0xff]  ;;  %v753_v11 = vld [vmem:[#allocation2 + $0x6d0] sm:$0xff]  ;;  %v1367_v62 = vld [vmem:[%s3901_s0 + $0x58] sm:$0xf0] }
  0x9d   :  { %2879 = vmatprep.subr.bf16.mxu0 %v2878_v46  ;;  %1333 = vmatmul.mubr.f32.gmra.mrb[26].mxu0 %v1048_v21  ;;  %v1063_v57 = vsel %vm1033_vm2, %v1056_v24, %v1062_v41  ;;  %v756_v46 = vld [vmem:[#allocation2 + $0x6e8] sm:$0xff]  ;;  %v2640_v19 = vpack.c.bf16 %v753_v11, %v751_v10  ;;  %v2896_v21 = vpack.c.bf16 %v1517_v14, %v1515_v12  ;;  %v757_v24 = vld [vmem:[#allocation2 + $0x6f0] sm:$0xff]  ;;  %v1405_v12 = vrot.slane %v1367_v62, 4  ;;  %v1792_v18 = vld [vmem:[#allocation2 + $0xf78] sm:$0xff] }
  0x9e   :  { %558 = vmatmul.mubr.f32.gmra.mrb[12].mxu1 %v31_v25  ;;  %1338 = vmatprep.mubr.f32.mxu0 %v3257_v0  ;;  %v2642_v22 = vpack.c.bf16 %v758_v15, %v756_v46  ;;  %v1519_v25 = vld [vmem:[#allocation2 + $0xee0] sm:$0xff]  ;;  %v1787_v10 = vld [vmem:[#allocation2 + $0xf50] sm:$0xff]  ;;  %v772_v14 = vld [vmem:[#allocation2 + $0x768] sm:$0xff] }
  0x9f   :  { %2625 = vmatpush1.bf16.msra.mxu1 %v2624_v26  ;;  %563 = vmatprep.mubr.f32.mxu1 %v3348_v48  ;;  %v1512_v48 = vld [vmem:[#allocation2 + $0xea8] sm:$0xff]  ;;  %v1521_v26 = vld [vmem:[#allocation2 + $0xef0] sm:$0xff]  ;;  %v774_v46 = vld [vmem:[#allocation2 + $0x778] sm:$0xff] }
  0xa0   :  { %2881 = vmatpush1.bf16.msra.mxu0 %v2880_v27  ;;  %2627 = vmatprep.subr.bf16.mxu1 %v2626_v28  ;;  %v2890_v2 = vpack.c.bf16 %v1514_v56, %v1512_v48  ;;  %v760_v27 = vld [vmem:[#allocation2 + $0x708] sm:$0xff]  ;;  %v762_v28 = vld [vmem:[#allocation2 + $0x718] sm:$0xff]  ;;  %v2900_v33 = vpack.c.bf16 %v1521_v26, %v1519_v25  ;;  %v765_v48 = vld [vmem:[#allocation2 + $0x730] sm:$0xff] }
  0xa1   :  { %2883 = vmatprep.subr.bf16.mxu0 %v2882_v17  ;;  %1339 = vmatmul.mubr.f32.gmra.mrb[28].mxu0 %v1057_v40  ;;  %v2644_v17 = vpack.c.bf16 %v757_v24, %v755_v20  ;;  %v2646_v35 = vpack.c.bf16 %v762_v28, %v760_v27  ;;  %v3463_v40 = vld [vmem:[%s3901_s0 + $0x28] sm:$0xff]  ;;  %v1781_v56 = vld [vmem:[#allocation2 + $0xf20] sm:$0xff]  ;;  %v2652_v3 = vpack.c.bf16 %v765_v48, %v763_v53  ;;  %v773_v25 = vld [vmem:[#allocation2 + $0x770] sm:$0xff] }
  0xa2   :  { %564 = vmatmul.mubr.f32.gmra.mrb[14].mxu1 %v3361_v1  ;;  %1344 = vmatprep.mubr.f32.mxu0 %v3257_v0  ;;  %v752_v1 = vld [vmem:[#allocation2 + $0x6c8] sm:$0xff]  ;;  %v1391_v41 = vrot.slane %v3463_v40, 4  ;;  %v771_v24 = vld [vmem:[#allocation2 + $0x760] sm:$0xff] }
  0xa3   :  { %2629 = vmatpush1.bf16.msra.mxu1 %v2628_v43  ;;  %887 = vmatprep.mubr.f32.mxu1 %v689_v34  ;;  %v2638_v9 = vpack.c.bf16 %v754_v4, %v752_v1  ;;  %v1779_v43 = vld [vmem:[#allocation2 + $0xf10] sm:$0xff]  ;;  %v767_v1 = vld [vmem:[#allocation2 + $0x740] sm:$0xff]  ;;  %v1370_v15 = vld [vmem:[%s3901_s0 + $0x88] sm:$0xf] }
  0xa4   :  { %2885 = vmatpush1.bf16.msra.mxu0 %v2884_v45  ;;  %2631 = vmatprep.subr.bf16.mxu1 %v2630_v47  ;;  %v764_v45 = vld [vmem:[#allocation2 + $0x728] sm:$0xff]  ;;  %v766_v47 = vld [vmem:[#allocation2 + $0x738] sm:$0xff]  ;;  %v1392_v54 = vsel %vm1383_vm3, %v1390_v38, %v1391_v41  ;;  %v2904_v55 = vpack.c.bf16 %v1779_v43, %v1777_v42  ;;  %v3219_v4 = vld [vmem:[%s3901_s0 + $0x70] sm:$0xff]  ;;  %v1412_v27 = vrot.slane %v1370_v15, 4  ;;  %v2660_v38 = vpack.c.bf16 %v773_v25, %v771_v24 }
  0xa5   :  { %2887 = vmatprep.subr.bf16.mxu0 %v2886_v52  ;;  %1345 = vmatmul.mubr.f32.gmra.mrb[30].mxu0 %v1063_v57  ;;  %v2648_v52 = vpack.c.bf16 %v761_v37, %v759_v32  ;;  %v2650_v34 = vpack.c.bf16 %v766_v47, %v764_v45  ;;  %v1783_v57 = vld [vmem:[#allocation2 + $0xf30] sm:$0xff]  ;;  %v1406_v5 = vrot.slane %v3219_v4, 4  ;;  %v1790_v16 = vld [vmem:[#allocation2 + $0xf68] sm:$0xff]  ;;  %v1789_v26 = vld [vmem:[#allocation2 + $0xf60] sm:$0xff]  ;;  %v2662_v42 = vpack.c.bf16 %v778_v31, %v776_v30 }
  0xa6   :  { %1676 = vmatprep.mubr.f32.mxu0 %v3257_v0  ;;  %v2908_v6 = vpack.c.bf16 %v1783_v57, %v1781_v56  ;;  %v1710_v20 = vld [vmem:[%s3901_s0 + $0x8] sm:$0xe0]  ;;  %v2914_v28 = vpack.c.bf16 %v1792_v18, %v1790_v16  ;;  %v1796_v32 = vld [vmem:[#allocation2 + $0xf98] sm:$0xff]  ;;  %v775_v43 = vld [vmem:[#allocation2 + $0x780] sm:$0xff] }
  0xa7   :  { %2633 = vmatpush1.bf16.msra.mxu1 %v2632_v58  ;;  %v1397_v58 = vrot.slane %v1364_v49, 4  ;;  %v1793_v45 = vld [vmem:[#allocation2 + $0xf80] sm:$0xff]  ;;  %v1413_v47 = vsel %vm1383_vm3, %v1406_v5, %v1412_v27  ;;  %v1798_v53 = vld [vmem:[#allocation2 + $0xfa8] sm:$0xff]  ;;  %v789_v16 = vld [vmem:[#allocation2 + $0x7f0] sm:$0xff] }
  0xa8   :  { %2889 = vmatpush1.bf16.msra.mxu0 %v2888_v59  ;;  %2635 = vmatprep.subr.bf16.mxu1 %v2634_v60  ;;  %v2906_v59 = vpack.c.bf16 %v1784_v51, %v1782_v50  ;;  %v768_v60 = vld [vmem:[#allocation2 + $0x748] sm:$0xff]  ;;  %v1795_v50 = vld [vmem:[#allocation2 + $0xf90] sm:$0xff]  ;;  %v779_v57 = vld [vmem:[#allocation2 + $0x7a0] sm:$0xff] }
  0xa9   :  { %2891 = vmatprep.subr.bf16.mxu0 %v2890_v2  ;;  %v1788_v2 = vld [vmem:[#allocation2 + $0xf58] sm:$0xff]  ;;  %v1398_v11 = vsel %vm1383_vm3, %v1391_v41, %v1397_v58  ;;  %v2916_v41 = vpack.c.bf16 %v1791_v29, %v1789_v26  ;;  %v780_v51 = vld [vmem:[#allocation2 + $0x7a8] sm:$0xff]  ;;  %v2920_v48 = vpack.c.bf16 %v1795_v50, %v1793_v45  ;;  %v781_v58 = vld [vmem:[#allocation2 + $0x7b0] sm:$0xff] }
  0xaa   :  { %v784_v62 = vld [vmem:[#allocation2 + $0x7c8] sm:$0xff]  ;;  %v787_v15 = vld [vmem:[#allocation2 + $0x7e0] sm:$0xff]  ;;  %v1080_v26 = vld [vmem:[#allocation2 + $0x918] sm:$0xff] }
  0xab   :  { %2637 = vmatpush1.bf16.msra.mxu1 %v2636_v7  ;;  %v2654_v7 = vpack.c.bf16 %v770_v61, %v768_v60  ;;  %v1799_v61 = vld [vmem:[#allocation2 + $0xfb0] sm:$0xff]  ;;  %v1078_v25 = vld [vmem:[#allocation2 + $0x908] sm:$0xff]  ;;  %v2676_v29 = vpack.c.bf16 %v789_v16, %v787_v15  ;;  %v3506_v31 = vld [vmem:[%s3901_s0 + $0x18] sm:$0xff] }
  0xac   :  { %2893 = vmatpush1.bf16.msra.mxu0 %v2892_v8  ;;  %2639 = vmatprep.subr.bf16.mxu1 %v2638_v9  ;;  %v769_v8 = vld [vmem:[#allocation2 + $0x750] sm:$0xff]  ;;  %v1785_v9 = vld [vmem:[#allocation2 + $0xf40] sm:$0xff]  ;;  %v1810_v27 = vld [vmem:[#allocation2 + $0x1008] sm:$0xff] }
  0xad   :  { %2895 = vmatprep.subr.bf16.mxu0 %v2894_v13  ;;  %v2910_v13 = vpack.c.bf16 %v1788_v2, %v1786_v63  ;;  %v786_v63 = vld [vmem:[#allocation2 + $0x7d8] sm:$0xff]  ;;  %v1802_v2 = vld [vmem:[#allocation2 + $0xfc8] sm:$0xff]  ;;  %v662_v45 = vld [vmem:[%s3901_s0 + $0x30] sm:$0x3] }
  0xae   :  { %v1084_v50 = vld [vmem:[#allocation2 + $0x938] sm:$0xff]  ;;  %v1817_v16 = vld [vmem:[#allocation2 + $0x1040] sm:$0xff] }
  0xaf   :  { %2641 = vmatpush1.bf16.msra.mxu1 %v2640_v19  ;;  %v2656_v19 = vpack.c.bf16 %v769_v8, %v767_v1  ;;  %v2668_v1 = vpack.c.bf16 %v781_v58, %v779_v57  ;;  %v1801_v8 = vld [vmem:[#allocation2 + $0xfc0] sm:$0xff]  ;;  %v3519_v57 = vld [vmem:[%s3901_s0 + $0x68] sm:$0xff] }
  0xb0   :  { %2897 = vmatpush1.bf16.msra.mxu0 %v2896_v21  ;;  %2643 = vmatprep.subr.bf16.mxu1 %v2642_v22  ;;  %v2912_v21 = vpack.c.bf16 %v1787_v10, %v1785_v9  ;;  %v2658_v22 = vpack.c.bf16 %v774_v46, %v772_v14  ;;  %v1803_v10 = vld [vmem:[#allocation2 + $0xfd0] sm:$0xff]  ;;  %v1808_v14 = vld [vmem:[#allocation2 + $0xff8] sm:$0xff]  ;;  %v703_v58 = vrot.slane %v3519_v57, 2 }
  0xb1   :  { %2899 = vmatprep.subr.bf16.mxu0 %v2898_v23  ;;  %v1407_v23 = vsel %vm1383_vm3, %v1405_v12, %v1406_v5  ;;  %v2670_v5 = vpack.c.bf16 %v786_v63, %v784_v62  ;;  %v790_v12 = vld [vmem:[#allocation2 + $0x7f8] sm:$0xff]  ;;  %v2928_v18 = vpack.c.bf16 %v1803_v10, %v1801_v8  ;;  %v1813_v62 = vld [vmem:[#allocation2 + $0x1020] sm:$0xff]  ;;  %v1815_v63 = vld [vmem:[#allocation2 + $0x1030] sm:$0xff] }
  0xb2   :  { %v3535_v10 = vld [vmem:[%s3901_s0 + $0x60] sm:$0xff] }
  0xb3   :  { %2645 = vmatpush1.bf16.msra.mxu1 %v2644_v17  ;;  %v1794_v17 = vld [vmem:[#allocation2 + $0xf88] sm:$0xff] }
  0xb4   :  { %2901 = vmatpush1.bf16.msra.mxu0 %v2900_v33  ;;  %2647 = vmatprep.subr.bf16.mxu1 %v2646_v35  ;;  %v1737_v33 = vrot.slane %v1710_v20, 5  ;;  %v3489_v35 = vld [vmem:[%s3901_s0 + $0x20] sm:$0xff]  ;;  %v2918_v49 = vpack.c.bf16 %v1796_v32, %v1794_v17  ;;  %v685_v17 = vrot.slane %v3506_v31, 2 }
  0xb5   :  { %2903 = vmatprep.subr.bf16.mxu0 %v2902_v44  ;;  %v1738_v37 = vrot.slane %v3489_v35, 5  ;;  %v777_v44 = vld [vmem:[#allocation2 + $0x790] sm:$0xff]  ;;  %v1805_v20 = vld [vmem:[#allocation2 + $0xfe0] sm:$0xff] }
  0xb6   :  { %v1077_v32 = vld [vmem:[#allocation2 + $0x900] sm:$0xff] }
  0xb7   :  { %2649 = vmatpush1.bf16.msra.mxu1 %v2648_v52  ;;  %1677 = vmatmul.mubr.f32.vlgmr.msra.gmra.mrb[32].mxu0 %v1392_v54  ;;  %v782_v52 = vld [vmem:[#allocation2 + $0x7b8] sm:$0xff] }
  0xb8   :  { %2905 = vmatpush1.bf16.msra.mxu0 %v2904_v55  ;;  %2651 = vmatprep.subr.bf16.mxu1 %v2650_v34  ;;  %v1800_v54 = vld [vmem:[#allocation2 + $0xfb8] sm:$0xff]  ;;  %v1739_v55 = vsel %vm1733_vm4, %v1737_v33, %v1738_v37  ;;  %v2664_v34 = vpack.c.bf16 %v777_v44, %v775_v43  ;;  %v2666_v56 = vpack.c.bf16 %v782_v52, %v780_v51  ;;  %v1079_v33 = vld [vmem:[#allocation2 + $0x910] sm:$0xff]  ;;  %v1814_v52 = vld [vmem:[#allocation2 + $0x1028] sm:$0xff] }
  0xb9   :  { %2907 = vmatprep.subr.bf16.mxu0 %v2906_v59  ;;  %1682 = vmatprep.mubr.f32.mxu0 %v3257_v0  ;;  %v1797_v59 = vld [vmem:[#allocation2 + $0xfa0] sm:$0xff]  ;;  %v2922_v60 = vpack.c.bf16 %v1800_v54, %v1798_v53  ;;  %v1811_v43 = vld [vmem:[#allocation2 + $0x1010] sm:$0xff]  ;;  %v1816_v53 = vld [vmem:[#allocation2 + $0x1038] sm:$0xff] }
  0xba   :  { %v2924_v4 = vpack.c.bf16 %v1799_v61, %v1797_v59  ;;  %v666_v51 = vld [vmem:[%s3901_s0 + $0x50] sm:$0xfc] }
  0xbb   :  { %2653 = vmatpush1.bf16.msra.mxu1 %v2652_v3  ;;  %1683 = vmatmul.mubr.f32.gmra.mrb[34].mxu0 %v1398_v11  ;;  %v1804_v3 = vld [vmem:[#allocation2 + $0xfd8] sm:$0xff]  ;;  %v788_v11 = vld [vmem:[#allocation2 + $0x7e8] sm:$0xff] }
  0xbc   :  { %2909 = vmatpush1.bf16.msra.mxu0 %v2908_v6  ;;  %2655 = vmatprep.subr.bf16.mxu1 %v2654_v7  ;;  %v783_v6 = vld [vmem:[#allocation2 + $0x7c0] sm:$0xff]  ;;  %v785_v7 = vld [vmem:[#allocation2 + $0x7d0] sm:$0xff]  ;;  %v2926_v9 = vpack.c.bf16 %v1804_v3, %v1802_v2  ;;  %v702_v2 = vrot.slane %v666_v51, 2  ;;  %v665_v3 = vld [vmem:[%s3901_s0 + $0x48] sm:$0xfc] }
  0xbd   :  { %2911 = vmatprep.subr.bf16.mxu0 %v2910_v13  ;;  %1688 = vmatprep.mubr.f32.mxu0 %v3257_v0  ;;  %v1806_v13 = vld [vmem:[#allocation2 + $0xfe8] sm:$0xff]  ;;  %v2672_v46 = vpack.c.bf16 %v785_v7, %v783_v6  ;;  %v669_v6 = vld [vmem:[%s3901_s0 + $0x80] sm:$0x3]  ;;  %v1820_v7 = vld [vmem:[#allocation2 + $0x1058] sm:$0xff] }
  0xbe   :  { %v2930_v24 = vpack.c.bf16 %v1808_v14, %v1806_v13  ;;  %v1087_v13 = vld [vmem:[#allocation2 + $0x950] sm:$0xff]  ;;  %v2940_v14 = vpack.c.bf16 %v1815_v63, %v1813_v62  ;;  %v1828_v51 = vld [vmem:[#allocation2 + $0x1098] sm:$0xff]  ;;  %v1830_v63 = vld [vmem:[#allocation2 + $0x10a8] sm:$0xff] }
  0xbf   :  { %2657 = vmatpush1.bf16.msra.mxu1 %v2656_v19  ;;  %1689 = vmatmul.mubr.f32.gmra.mrb[36].mxu0 %v1407_v23  ;;  %v2674_v19 = vpack.c.bf16 %v790_v12, %v788_v11  ;;  %v663_v23 = vld [vmem:[%s3901_s0 + $0x38] sm:$0x3]  ;;  %v700_v11 = vrot.slane %v3535_v10, 2  ;;  %v1085_v12 = vld [vmem:[#allocation2 + $0x940] sm:$0xff] }
  0xc0   :  { %2913 = vmatpush1.bf16.msra.mxu0 %v2912_v21  ;;  %2659 = vmatprep.subr.bf16.mxu1 %v2658_v22  ;;  %v1807_v21 = vld [vmem:[#allocation2 + $0xff0] sm:$0xff]  ;;  %v659_v22 = vld [vmem:[%s3901_s0] sm:$0xfc]  ;;  %v695_v44 = vrot.slane %v663_v23, 2  ;;  %v1824_v23 = vld [vmem:[#allocation2 + $0x1078] sm:$0xff] }
  0xc1   :  { %2915 = vmatprep.subr.bf16.mxu0 %v2914_v28  ;;  %1694 = vmatprep.mubr.f32.mxu0 %v3257_v0  ;;  %v1812_v28 = vld [vmem:[#allocation2 + $0x1018] sm:$0xff]  ;;  %v684_v30 = vrot.slane %v659_v22, 2  ;;  %v1090_v22 = vld [vmem:[#allocation2 + $0x968] sm:$0xff] }
  0xc2   :  { %v1100_v62 = vld [vmem:[#allocation2 + $0x9b8] sm:$0xff] }
  0xc3   :  { %2661 = vmatpush1.bf16.msra.mxu1 %v2660_v38  ;;  %1695 = vmatmul.mubr.f32.gmra.mrb[38].mxu0 %v1413_v47  ;;  %v2932_v38 = vpack.c.bf16 %v1807_v21, %v1805_v20  ;;  %v2934_v47 = vpack.c.bf16 %v1812_v28, %v1810_v27  ;;  %v686_v54 = vsel %vm683_vm1, %v684_v30, %v685_v17  ;;  %v668_v20 = vld [vmem:[%s3901_s0 + $0x78] sm:$0x3]  ;;  %v1038_v30 = vrot.slane %v3489_v35, 3 }
  0xc4   :  { %2917 = vmatpush1.bf16.msra.mxu0 %v2916_v41  ;;  %2663 = vmatprep.subr.bf16.mxu1 %v2662_v42  ;;  %v2710_v41 = vpack.c.bf16 %v1080_v26, %v1078_v25  ;;  %v1809_v42 = vld [vmem:[#allocation2 + $0x1000] sm:$0xff]  ;;  %v2942_v21 = vpack.c.bf16 %v1820_v7, %v1818_v39  ;;  %v1010_v25 = vld [vmem:[%s3901_s0 + $0x8] sm:$0xf8]  ;;  %v2720_v28 = vpack.c.bf16 %v1087_v13, %v1085_v12  ;;  %v1836_v12 = vld [vmem:[#allocation2 + $0x10d8] sm:$0xff] }
  0xc5   :  { %2919 = vmatprep.subr.bf16.mxu0 %v2918_v49  ;;  %1937 = vmatprep.mubr.f32.mxu0 %v1739_v55  ;;  %v1082_v49 = vld [vmem:[#allocation2 + $0x928] sm:$0xff]  ;;  %v2712_v55 = vpack.c.bf16 %v1079_v33, %v1077_v32  ;;  %v2936_v59 = vpack.c.bf16 %v1811_v43, %v1809_v42  ;;  %v1821_v42 = vld [vmem:[#allocation2 + $0x1060] sm:$0xff]  ;;  %v1037_v43 = vrot.slane %v1010_v25, 3  ;;  %v1840_v25 = vld [vmem:[#allocation2 + $0x10f8] sm:$0xff] }
  0xc6   :  { %v2714_v61 = vpack.c.bf16 %v1084_v50, %v1082_v49  ;;  %v1822_v26 = vld [vmem:[#allocation2 + $0x1068] sm:$0xff]  ;;  %v1096_v49 = vld [vmem:[#allocation2 + $0x998] sm:$0xff]  ;;  %v1829_v39 = vld [vmem:[#allocation2 + $0x10a0] sm:$0xff] }
  0xc7   :  { %2665 = vmatpush1.bf16.msra.mxu1 %v2664_v34  ;;  %v693_v34 = vrot.slane %v662_v45, 2  ;;  %v1823_v45 = vld [vmem:[#allocation2 + $0x1070] sm:$0xff]  ;;  %v1826_v50 = vld [vmem:[#allocation2 + $0x1088] sm:$0xff] }
  0xc8   :  { %2921 = vmatpush1.bf16.msra.mxu0 %v2920_v48  ;;  %2667 = vmatprep.subr.bf16.mxu1 %v2666_v56  ;;  %v1081_v48 = vld [vmem:[#allocation2 + $0x920] sm:$0xff]  ;;  %v1083_v56 = vld [vmem:[#allocation2 + $0x930] sm:$0xff] }
  0xc9   :  { %2923 = vmatprep.subr.bf16.mxu0 %v2922_v60  ;;  %v696_v60 = vsel %vm683_vm1, %v688_v36, %v695_v44  ;;  %v694_v36 = vsel %vm683_vm1, %v685_v17, %v693_v34  ;;  %v2716_v8 = vpack.c.bf16 %v1083_v56, %v1081_v48  ;;  %v2946_v44 = vpack.c.bf16 %v1824_v23, %v1822_v26  ;;  %v1093_v34 = vld [vmem:[#allocation2 + $0x980] sm:$0xff]  ;;  %v1095_v48 = vld [vmem:[#allocation2 + $0x990] sm:$0xff] }
  0xca   :  { %v1825_v56 = vld [vmem:[#allocation2 + $0x1080] sm:$0xff] }
  0xcb   :  { %2669 = vmatpush1.bf16.msra.mxu1 %v2668_v1  ;;  %v2938_v1 = vpack.c.bf16 %v1816_v53, %v1814_v52  ;;  %v1105_v23 = vld [vmem:[#allocation2 + $0x9e0] sm:$0xff] }
  0xcc   :  { %2925 = vmatpush1.bf16.msra.mxu0 %v2924_v4  ;;  %2671 = vmatprep.subr.bf16.mxu1 %v2670_v5  ;;  %v1086_v4 = vld [vmem:[#allocation2 + $0x948] sm:$0xff]  ;;  %v1088_v5 = vld [vmem:[#allocation2 + $0x958] sm:$0xff] }
  0xcd   :  { %2927 = vmatprep.subr.bf16.mxu0 %v2926_v9  ;;  %v699_v9 = vrot.slane %v665_v3, 2  ;;  %v2718_v15 = vpack.c.bf16 %v1088_v5, %v1086_v4  ;;  %v2728_v3 = vpack.c.bf16 %v1095_v48, %v1093_v34  ;;  %v1097_v5 = vld [vmem:[#allocation2 + $0x9a0] sm:$0xff]  ;;  %v1843_v34 = vld [vmem:[#allocation2 + $0x1110] sm:$0xff] }
  0xcf   :  { %2673 = vmatpush1.bf16.msra.mxu1 %v2672_v46  ;;  %v704_v46 = vsel %vm683_vm1, %v702_v2, %v703_v58  ;;  %v701_v27 = vsel %vm683_vm1, %v699_v9, %v700_v11  ;;  %v1832_v2 = vld [vmem:[#allocation2 + $0x10b8] sm:$0xff] }
  0xd0   :  { %2929 = vmatpush1.bf16.msra.mxu0 %v2928_v18  ;;  %2675 = vmatprep.subr.bf16.mxu1 %v2674_v19  ;;  %v1819_v18 = vld [vmem:[#allocation2 + $0x1050] sm:$0xff]  ;;  %v710_v19 = vrot.slane %v669_v6, 2  ;;  %v2954_v7 = vpack.c.bf16 %v1832_v2, %v1830_v63  ;;  %v1104_v9 = vld [vmem:[#allocation2 + $0x9d8] sm:$0xff]  ;;  %v1113_v2 = vld [vmem:[#allocation2 + $0xa20] sm:$0xff] }
  0xd1   :  { %2931 = vmatprep.subr.bf16.mxu0 %v2930_v24  ;;  %v1092_v24 = vld [vmem:[#allocation2 + $0x978] sm:$0xff]  ;;  %v2944_v17 = vpack.c.bf16 %v1819_v18, %v1817_v16  ;;  %v1099_v6 = vld [vmem:[#allocation2 + $0x9b0] sm:$0xff]  ;;  %v1833_v18 = vld [vmem:[#allocation2 + $0x10c0] sm:$0xff] }
  0xd2   :  { %v711_v32 = vsel %vm683_vm1, %v703_v58, %v710_v19  ;;  %v2722_v33 = vpack.c.bf16 %v1092_v24, %v1090_v22  ;;  %v1039_v58 = vsel %vm1033_vm2, %v1037_v43, %v1038_v30  ;;  %v2732_v13 = vpack.c.bf16 %v1099_v6, %v1097_v5  ;;  %v1103_v16 = vld [vmem:[#allocation2 + $0x9d0] sm:$0xff]  ;;  %v1108_v22 = vld [vmem:[#allocation2 + $0x9f8] sm:$0xff]  ;;  %v1838_v24 = vld [vmem:[#allocation2 + $0x10e8] sm:$0xff] }
  0xd3   :  { %2677 = vmatpush1.bf16.msra.mxu1 %v2676_v29  ;;  %v708_v29 = vrot.slane %v668_v20, 2  ;;  %v1835_v20 = vld [vmem:[#allocation2 + $0x10d0] sm:$0xff]  ;;  %v1842_v43 = vld [vmem:[#allocation2 + $0x1108] sm:$0xff] }
  0xd4   :  { %2933 = vmatpush1.bf16.msra.mxu0 %v2932_v38  ;;  %2711 = vmatprep.subr.bf16.mxu1 %v2710_v41  ;;  %v1089_v38 = vld [vmem:[#allocation2 + $0x960] sm:$0xff]  ;;  %v1091_v41 = vld [vmem:[#allocation2 + $0x970] sm:$0xff] }
  0xd5   :  { %2935 = vmatprep.subr.bf16.mxu0 %v2934_v47  ;;  %v1094_v47 = vld [vmem:[#allocation2 + $0x988] sm:$0xff]  ;;  %v709_v52 = vsel %vm683_vm1, %v700_v11, %v708_v29  ;;  %v2724_v53 = vpack.c.bf16 %v1091_v41, %v1089_v38  ;;  %v1107_v29 = vld [vmem:[#allocation2 + $0x9f0] sm:$0xff]  ;;  %v1112_v41 = vld [vmem:[#allocation2 + $0xa18] sm:$0xff] }
  0xd6   :  { %888 = vmatmul.mubr.f32.vlgmr.msra.gmra.mrb[16].mxu1 %v686_v54  ;;  %v2948_v54 = vpack.c.bf16 %v1823_v45, %v1821_v42  ;;  %v1834_v11 = vld [vmem:[#allocation2 + $0x10c8] sm:$0xff]  ;;  %v1709_v42 = vld [vmem:[%s3901_s0] sm:$0xe0]  ;;  %v2740_v45 = vpack.c.bf16 %v1107_v29, %v1105_v23  ;;  %v1115_v6 = vld [vmem:[#allocation2 + $0xa30] sm:$0xff] }
  0xd7   :  { %2713 = vmatpush1.bf16.msra.mxu1 %v2712_v55  ;;  %893 = vmatprep.mubr.f32.mxu1 %v696_v60  ;;  %v2726_v55 = vpack.c.bf16 %v1096_v49, %v1094_v47  ;;  %v1827_v60 = vld [vmem:[#allocation2 + $0x1090] sm:$0xff]  ;;  %v2958_v19 = vpack.c.bf16 %v1836_v12, %v1834_v11  ;;  %v1110_v38 = vld [vmem:[#allocation2 + $0xa08] sm:$0xff]  ;;  %v1109_v47 = vld [vmem:[#allocation2 + $0xa00] sm:$0xff] }
  0xd8   :  { %2937 = vmatpush1.bf16.msra.mxu0 %v2936_v59  ;;  %2715 = vmatprep.subr.bf16.mxu1 %v2714_v61  ;;  %v2950_v59 = vpack.c.bf16 %v1828_v51, %v1826_v50  ;;  %v1098_v61 = vld [vmem:[#allocation2 + $0x9a8] sm:$0xff]  ;;  %v1713_v49 = vld [vmem:[%s3901_s0 + $0x38] sm:$0x1f]  ;;  %v2742_v51 = vpack.c.bf16 %v1112_v41, %v1110_v38 }
  0xd9   :  { %2939 = vmatprep.subr.bf16.mxu0 %v2938_v1  ;;  %v2952_v1 = vpack.c.bf16 %v1827_v60, %v1825_v56  ;;  %v2730_v4 = vpack.c.bf16 %v1100_v62, %v1098_v61  ;;  %v1114_v56 = vld [vmem:[#allocation2 + $0xa28] sm:$0xff]  ;;  %v1848_v61 = vld [vmem:[#allocation2 + $0x1138] sm:$0xff]  ;;  %v1745_v62 = vrot.slane %v1713_v49, 5  ;;  %v1123_v49 = vld [vmem:[#allocation2 + $0xa70] sm:$0xff] }
  0xda   :  { %894 = vmatmul.mubr.f32.gmra.mrb[18].mxu1 %v694_v36  ;;  %v1831_v36 = vld [vmem:[#allocation2 + $0x10b0] sm:$0xff]  ;;  %v1846_v60 = vld [vmem:[#allocation2 + $0x1128] sm:$0xff]  ;;  %v1120_v11 = vld [vmem:[#allocation2 + $0xa58] sm:$0xff] }
  0xdb   :  { %2717 = vmatpush1.bf16.msra.mxu1 %v2716_v8  ;;  %899 = vmatprep.mubr.f32.mxu1 %v704_v46  ;;  %v1102_v8 = vld [vmem:[#allocation2 + $0x9c8] sm:$0xff]  ;;  %v1856_v38 = vld [vmem:[#allocation2 + $0x1178] sm:$0xff] }
  0xdc   :  { %2941 = vmatpush1.bf16.msra.mxu0 %v2940_v14  ;;  %2719 = vmatprep.subr.bf16.mxu1 %v2718_v15  ;;  %v2956_v14 = vpack.c.bf16 %v1831_v36, %v1829_v39  ;;  %v2734_v46 = vpack.c.bf16 %v1104_v9, %v1102_v8  ;;  %v1101_v15 = vld [vmem:[#allocation2 + $0x9c0] sm:$0xff]  ;;  %v2970_v8 = vpack.c.bf16 %v1848_v61, %v1846_v60  ;;  %v1118_v9 = vld [vmem:[#allocation2 + $0xa48] sm:$0xff] }
  0xdd   :  { %2943 = vmatprep.subr.bf16.mxu0 %v2942_v21  ;;  %v1106_v21 = vld [vmem:[#allocation2 + $0x9e8] sm:$0xff]  ;;  %v2736_v26 = vpack.c.bf16 %v1103_v16, %v1101_v15  ;;  %v1845_v39 = vld [vmem:[#allocation2 + $0x1120] sm:$0xff]  ;;  %v1753_v16 = vrot.slane %v3519_v57, 5 }
  0xde   :  { %900 = vmatmul.mubr.f32.gmra.mrb[20].mxu1 %v701_v27  ;;  %v2960_v27 = vpack.c.bf16 %v1835_v20, %v1833_v18  ;;  %v1715_v12 = vld [vmem:[%s3901_s0 + $0x48] sm:$0xe0]  ;;  %v2748_v18 = vpack.c.bf16 %v1115_v6, %v1113_v2  ;;  %v1750_v20 = vrot.slane %v3535_v10, 5  ;;  %v1857_v2 = vld [vmem:[#allocation2 + $0x1180] sm:$0xff]  ;;  %v1132_v6 = vld [vmem:[#allocation2 + $0xab8] sm:$0xff] }
  0xdf   :  { %2721 = vmatpush1.bf16.msra.mxu1 %v2720_v28  ;;  %905 = vmatprep.mubr.f32.mxu1 %v711_v32  ;;  %v2738_v28 = vpack.c.bf16 %v1108_v22, %v1106_v21  ;;  %v1839_v32 = vld [vmem:[#allocation2 + $0x10f0] sm:$0xff]  ;;  %v1719_v21 = vld [vmem:[%s3901_s0 + $0x80] sm:$0x1f]  ;;  %v1122_v29 = vld [vmem:[#allocation2 + $0xa68] sm:$0xff] }
  0xe0   :  { %2945 = vmatpush1.bf16.msra.mxu0 %v2944_v17  ;;  %2723 = vmatprep.subr.bf16.mxu1 %v2722_v33  ;;  %v1837_v17 = vld [vmem:[#allocation2 + $0x10e0] sm:$0xff]  ;;  %v2962_v33 = vpack.c.bf16 %v1840_v25, %v1838_v24  ;;  %v2750_v24 = vpack.c.bf16 %v1120_v11, %v1118_v9  ;;  %v1119_v25 = vld [vmem:[#allocation2 + $0xa50] sm:$0xff] }
  0xe1   :  { %2947 = vmatprep.subr.bf16.mxu0 %v2946_v44  ;;  %v1844_v44 = vld [vmem:[#allocation2 + $0x1118] sm:$0xff]  ;;  %v2964_v50 = vpack.c.bf16 %v1839_v32, %v1837_v17  ;;  %v1129_v11 = vld [vmem:[#allocation2 + $0xaa0] sm:$0xff] }
  0xe2   :  { %906 = vmatmul.mubr.f32.gmra.mrb[22].mxu1 %v709_v52  ;;  %v1111_v52 = vld [vmem:[#allocation2 + $0xa10] sm:$0xff]  ;;  %v2966_v48 = vpack.c.bf16 %v1844_v44, %v1842_v43  ;;  %v1124_v17 = vld [vmem:[#allocation2 + $0xa78] sm:$0xff] }
  0xe3   :  { %2725 = vmatpush1.bf16.msra.mxu1 %v2724_v53  ;;  %1237 = vmatprep.mubr.f32.mxu1 %v1039_v58  ;;  %v1734_v53 = vrot.slane %v1709_v42, 5  ;;  %v1116_v58 = vld [vmem:[#allocation2 + $0xa38] sm:$0xff]  ;;  %v2744_v63 = vpack.c.bf16 %v1111_v52, %v1109_v47  ;;  %v1760_v42 = vrot.slane %v1719_v21, 5  ;;  %v1121_v47 = vld [vmem:[#allocation2 + $0xa60] sm:$0xff] }
  0xe4   :  { %2949 = vmatpush1.bf16.msra.mxu0 %v2948_v54  ;;  %2727 = vmatprep.subr.bf16.mxu1 %v2726_v55  ;;  %v1735_v54 = vrot.slane %v3506_v31, 5  ;;  %v1841_v55 = vld [vmem:[#allocation2 + $0x1100] sm:$0xff]  ;;  %v2746_v5 = vpack.c.bf16 %v1116_v58, %v1114_v56  ;;  %v1718_v32 = vld [vmem:[%s3901_s0 + $0x78] sm:$0x1f] }
  0xe5   :  { %2951 = vmatprep.subr.bf16.mxu0 %v2950_v59  ;;  %v1712_v59 = vld [vmem:[%s3901_s0 + $0x30] sm:$0x1f]  ;;  %v1758_v52 = vrot.slane %v1718_v32, 5  ;;  %v1860_v56 = vld [vmem:[#allocation2 + $0x1198] sm:$0xff]  ;;  %v1761_v58 = vsel %vm1733_vm4, %v1753_v16, %v1760_v42 }
  0xe6   :  { %v1743_v36 = vrot.slane %v1712_v59, 5  ;;  %v2756_v59 = vpack.c.bf16 %v1123_v49, %v1121_v47  ;;  %v1872_v32 = vld [vmem:[#allocation2 + $0x11f8] sm:$0xff]  ;;  %v1139_v42 = vld [vmem:[#allocation2 + $0xaf0] sm:$0xff]  ;;  %v1009_v49 = vld [vmem:[%s3901_s0] sm:$0xf8] }
  0xe7   :  { %2729 = vmatpush1.bf16.msra.mxu1 %v2728_v3  ;;  %v1716_v3 = vld [vmem:[%s3901_s0 + $0x50] sm:$0xe0] }
  0xe8   :  { %2953 = vmatpush1.bf16.msra.mxu0 %v2952_v1  ;;  %2731 = vmatprep.subr.bf16.mxu1 %v2730_v4  ;;  %v1736_v1 = vsel %vm1733_vm4, %v1734_v53, %v1735_v54  ;;  %v2968_v4 = vpack.c.bf16 %v1843_v34, %v1841_v55  ;;  %v1752_v15 = vrot.slane %v1716_v3, 5  ;;  %v1744_v23 = vsel %vm1733_vm4, %v1735_v54, %v1743_v36  ;;  %v1855_v54 = vld [vmem:[#allocation2 + $0x1170] sm:$0xff]  ;;  %v1126_v55 = vld [vmem:[#allocation2 + $0xa88] sm:$0xff]  ;;  %v1128_v34 = vld [vmem:[#allocation2 + $0xa98] sm:$0xff] }
  0xe9   :  { %2955 = vmatprep.subr.bf16.mxu0 %v2954_v7  ;;  %v1847_v7 = vld [vmem:[#allocation2 + $0x1130] sm:$0xff]  ;;  %v2758_v61 = vpack.c.bf16 %v1128_v34, %v1126_v55  ;;  %v1759_v3 = vsel %vm1733_vm4, %v1750_v20, %v1758_v52  ;;  %v1430_v52 = vld [vmem:[#allocation2 + $0xc18] sm:$0xff] }
  0xea   :  { %v2972_v22 = vpack.c.bf16 %v1847_v7, %v1845_v39  ;;  %v1754_v41 = vsel %vm1733_vm4, %v1752_v15, %v1753_v16  ;;  %v1862_v39 = vld [vmem:[#allocation2 + $0x11a8] sm:$0xff]  ;;  %v1864_v7 = vld [vmem:[#allocation2 + $0x11b8] sm:$0xff]  ;;  %v1871_v47 = vld [vmem:[#allocation2 + $0x11f0] sm:$0xff] }
  0xeb   :  { %2733 = vmatpush1.bf16.msra.mxu1 %v2732_v13  ;;  %v1850_v13 = vld [vmem:[#allocation2 + $0x1148] sm:$0xff]  ;;  %v1136_v16 = vld [vmem:[#allocation2 + $0xad8] sm:$0xff] }
  0xec   :  { %2957 = vmatpush1.bf16.msra.mxu0 %v2956_v14  ;;  %2735 = vmatprep.subr.bf16.mxu1 %v2734_v46  ;;  %v1852_v14 = vld [vmem:[#allocation2 + $0x1158] sm:$0xff]  ;;  %v1746_v46 = vsel %vm1733_vm4, %v1738_v37, %v1745_v62  ;;  %v1851_v37 = vld [vmem:[#allocation2 + $0x1150] sm:$0xff]  ;;  %v1125_v62 = vld [vmem:[#allocation2 + $0xa80] sm:$0xff] }
  0xed   :  { %2959 = vmatprep.subr.bf16.mxu0 %v2958_v19  ;;  %v1117_v19 = vld [vmem:[#allocation2 + $0xa40] sm:$0xff]  ;;  %v1134_v15 = vld [vmem:[#allocation2 + $0xac8] sm:$0xff]  ;;  %v2130_v55 = vld [vmem:[#allocation2 + $0x1218] sm:$0xff] }
  0xee   :  { %v2752_v43 = vpack.c.bf16 %v1119_v25, %v1117_v19  ;;  %v1868_v19 = vld [vmem:[#allocation2 + $0x11d8] sm:$0xff]  ;;  %v1135_v25 = vld [vmem:[#allocation2 + $0xad0] sm:$0xff] }
  0xef   :  { %2737 = vmatpush1.bf16.msra.mxu1 %v2736_v26  ;;  %v1849_v26 = vld [vmem:[#allocation2 + $0x1140] sm:$0xff]  ;;  %v1013_v34 = vld [vmem:[%s3901_s0 + $0x38] sm:$0x7] }
  0xf0   :  { %2961 = vmatpush1.bf16.msra.mxu0 %v2960_v27  ;;  %2739 = vmatprep.subr.bf16.mxu1 %v2738_v28  ;;  %v1749_v27 = vrot.slane %v1715_v12, 5  ;;  %v2974_v28 = vpack.c.bf16 %v1852_v14, %v1850_v13  ;;  %v2976_v44 = vpack.c.bf16 %v1851_v37, %v1849_v26  ;;  %v1131_v12 = vld [vmem:[#allocation2 + $0xab0] sm:$0xff]  ;;  %v1861_v13 = vld [vmem:[#allocation2 + $0x11a0] sm:$0xff]  ;;  %v2986_v14 = vpack.c.bf16 %v1864_v7, %v1862_v39  ;;  %v1432_v7 = vld [vmem:[#allocation2 + $0xc28] sm:$0xff] }
  0xf1   :  { %2963 = vmatprep.subr.bf16.mxu0 %v2962_v33  ;;  %v1854_v33 = vld [vmem:[#allocation2 + $0x1168] sm:$0xff]  ;;  %v1865_v26 = vld [vmem:[#allocation2 + $0x11c0] sm:$0xff]  ;;  %v2129_v39 = vld [vmem:[#allocation2 + $0x1210] sm:$0xff] }
  0xf2   :  { %v2978_v53 = vpack.c.bf16 %v1856_v38, %v1854_v33 }
  0xf3   :  { %2741 = vmatpush1.bf16.msra.mxu1 %v2740_v45  ;;  %v2754_v45 = vpack.c.bf16 %v1124_v17, %v1122_v29  ;;  %v1870_v17 = vld [vmem:[#allocation2 + $0x11e8] sm:$0xff] }
  0xf4   :  { %2965 = vmatpush1.bf16.msra.mxu0 %v2964_v50  ;;  %2743 = vmatprep.subr.bf16.mxu1 %v2742_v51  ;;  %v1853_v50 = vld [vmem:[#allocation2 + $0x1160] sm:$0xff]  ;;  %v1751_v51 = vsel %vm1733_vm4, %v1749_v27, %v1750_v20  ;;  %v2764_v20 = vpack.c.bf16 %v1131_v12, %v1129_v11  ;;  %v1138_v27 = vld [vmem:[#allocation2 + $0xae8] sm:$0xff]  ;;  %v2134_v11 = vld [vmem:[#allocation2 + $0x1238] sm:$0xff] }
  0xf5   :  { %2967 = vmatprep.subr.bf16.mxu0 %v2966_v48  ;;  %v1858_v48 = vld [vmem:[#allocation2 + $0x1188] sm:$0xff]  ;;  %v2980_v60 = vpack.c.bf16 %v1855_v54, %v1853_v50  ;;  %v2994_v50 = vpack.c.bf16 %v1872_v32, %v1870_v17  ;;  %v1438_v32 = vld [vmem:[#allocation2 + $0xc58] sm:$0xff] }
  0xf6   :  { %v2128_v54 = vld [vmem:[#allocation2 + $0x1208] sm:$0xff] }
  0xf7   :  { %2745 = vmatpush1.bf16.msra.mxu1 %v2744_v63  ;;  %1938 = vmatmul.mubr.f32.vlgmr.msra.gmra.mrb[32].mxu0 %v1736_v1  ;;  %v1127_v63 = vld [vmem:[#allocation2 + $0xa90] sm:$0xff]  ;;  %v2982_v1 = vpack.c.bf16 %v1860_v56, %v1858_v48  ;;  %v1436_v17 = vld [vmem:[#allocation2 + $0xc48] sm:$0xff] }
  0xf8   :  { %2969 = vmatpush1.bf16.msra.mxu0 %v2968_v4  ;;  %2747 = vmatprep.subr.bf16.mxu1 %v2746_v5  ;;  %v1859_v4 = vld [vmem:[#allocation2 + $0x1190] sm:$0xff]  ;;  %v1130_v5 = vld [vmem:[#allocation2 + $0xaa8] sm:$0xff]  ;;  %v2760_v36 = vpack.c.bf16 %v1127_v63, %v1125_v62 }
  0xf9   :  { %2971 = vmatprep.subr.bf16.mxu0 %v2970_v8  ;;  %1943 = vmatprep.mubr.f32.mxu0 %v1746_v46  ;;  %v2984_v8 = vpack.c.bf16 %v1859_v4, %v1857_v2  ;;  %v2762_v9 = vpack.c.bf16 %v1132_v6, %v1130_v5  ;;  %v1863_v46 = vld [vmem:[#allocation2 + $0x11b0] sm:$0xff]  ;;  %v2127_v4 = vld [vmem:[#allocation2 + $0x1200] sm:$0xff]  ;;  %v2998_v6 = vpack.c.bf16 %v2130_v55, %v2128_v54 }
  0xfa   :  { %v2988_v21 = vpack.c.bf16 %v1863_v46, %v1861_v13  ;;  %v1429_v2 = vld [vmem:[#allocation2 + $0xc10] sm:$0xff]  ;;  %v2814_v55 = vpack.c.bf16 %v1438_v32, %v1436_v17  ;;  %v3677_v32 = vld [vmem:[%s3901_s0 + $0x20] sm:$0xff] }
  0xfb   :  { %2749 = vmatpush1.bf16.msra.mxu1 %v2748_v18  ;;  %1944 = vmatmul.mubr.f32.gmra.mrb[34].mxu0 %v1744_v23  ;;  %v1866_v18 = vld [vmem:[#allocation2 + $0x11c8] sm:$0xff]  ;;  %v1867_v23 = vld [vmem:[#allocation2 + $0x11d0] sm:$0xff] }
  0xfc   :  { %2973 = vmatpush1.bf16.msra.mxu0 %v2972_v22  ;;  %2751 = vmatprep.subr.bf16.mxu1 %v2750_v24  ;;  %v2766_v22 = vpack.c.bf16 %v1136_v16, %v1134_v15  ;;  %v1133_v24 = vld [vmem:[#allocation2 + $0xac0] sm:$0xff]  ;;  %v2990_v37 = vpack.c.bf16 %v1868_v19, %v1866_v18  ;;  %v1012_v5 = vld [vmem:[%s3901_s0 + $0x30] sm:$0x7] }
  0xfd   :  { %2975 = vmatprep.subr.bf16.mxu0 %v2974_v28  ;;  %1949 = vmatprep.mubr.f32.mxu0 %v1754_v41  ;;  %v1140_v28 = vld [vmem:[#allocation2 + $0xaf8] sm:$0xff]  ;;  %v2768_v38 = vpack.c.bf16 %v1135_v25, %v1133_v24  ;;  %v1137_v41 = vld [vmem:[#allocation2 + $0xae0] sm:$0xff]  ;;  %v1043_v46 = vrot.slane %v1012_v5, 3  ;;  %v1433_v16 = vld [vmem:[#allocation2 + $0xc30] sm:$0xff] }
  0xfe   :  { %v2772_v56 = vpack.c.bf16 %v1139_v42, %v1137_v41  ;;  %v1431_v15 = vld [vmem:[#allocation2 + $0xc20] sm:$0xff]  ;;  %v2133_v24 = vld [vmem:[#allocation2 + $0x1230] sm:$0xff]  ;;  %v2136_v41 = vld [vmem:[#allocation2 + $0x1248] sm:$0xff] }
  0xff   :  { %2753 = vmatpush1.bf16.msra.mxu1 %v2752_v43  ;;  %1950 = vmatmul.mubr.f32.gmra.mrb[36].mxu0 %v1751_v51  ;;  %v2992_v43 = vpack.c.bf16 %v1867_v23, %v1865_v26  ;;  %v1428_v51 = vld [vmem:[#allocation2 + $0xc08] sm:$0xff]  ;;  %v1714_v19 = vld [vmem:[%s3901_s0 + $0x40] sm:$0x1f]  ;;  %v1053_v26 = vrot.slane %v3519_v57, 3  ;;  %v1050_v57 = vrot.slane %v3535_v10, 3  ;;  %v2138_v42 = vld [vmem:[#allocation2 + $0x1258] sm:$0xff] }
 0x100   :  { %2977 = vmatpush1.bf16.msra.mxu0 %v2976_v44  ;;  %2755 = vmatprep.subr.bf16.mxu1 %v2754_v45  ;;  %v2770_v44 = vpack.c.bf16 %v1140_v28, %v1138_v27  ;;  %v1869_v45 = vld [vmem:[#allocation2 + $0x11e0] sm:$0xff]  ;;  %v2806_v63 = vpack.c.bf16 %v1430_v52, %v1428_v51  ;;  %v1717_v52 = vld [vmem:[%s3901_s0 + $0x58] sm:$0xe0] }
 0x101   :  { %2979 = vmatprep.subr.bf16.mxu0 %v2978_v53  ;;  %1955 = vmatprep.mubr.f32.mxu0 %v1761_v58  ;;  %v1711_v53 = vld [vmem:[%s3901_s0 + $0x10] sm:$0xe0]  ;;  %v1034_v58 = vrot.slane %v1009_v49, 3  ;;  %v2996_v62 = vpack.c.bf16 %v1871_v47, %v1869_v45  ;;  %v2812_v45 = vpack.c.bf16 %v1433_v16, %v1431_v15  ;;  %v1435_v49 = vld [vmem:[#allocation2 + $0xc40] sm:$0xff] }
 0x102   :  { %v2139_v15 = vld [vmem:[#allocation2 + $0x1260] sm:$0xff] }
 0x103   :  { %2757 = vmatpush1.bf16.msra.mxu1 %v2756_v59  ;;  %1956 = vmatmul.mubr.f32.gmra.mrb[38].mxu0 %v1759_v3  ;;  %v1035_v59 = vrot.slane %v3506_v31, 3  ;;  %v1740_v3 = vrot.slane %v1711_v53, 5  ;;  %v1045_v31 = vrot.slane %v1013_v34, 3  ;;  %v2135_v34 = vld [vmem:[#allocation2 + $0x1240] sm:$0xff] }
 0x104   :  { %2981 = vmatpush1.bf16.msra.mxu0 %v2980_v60  ;;  %2759 = vmatprep.subr.bf16.mxu1 %v2758_v61  ;;  %v1427_v60 = vld [vmem:[#allocation2 + $0xc00] sm:$0xff] }
 0x105   :  { %2983 = vmatprep.subr.bf16.mxu0 %v2982_v1  ;;  %2026 = vmatprep.mubr.f32.mxu0 %v3257_v0  ;;  %v1741_v1 = vrot.slane %v3463_v40, 5  ;;  %v1036_v13 = vsel %vm1033_vm2, %v1034_v58, %v1035_v59  ;;  %v1046_v23 = vsel %vm1033_vm2, %v1038_v30, %v1045_v31  ;;  %v1044_v30 = vsel %vm1033_vm2, %v1035_v59, %v1043_v46  ;;  %v1018_v59 = vld [vmem:[%s3901_s0 + $0x78] sm:$0x7]  ;;  %v1720_v40 = vld [vmem:[%s3901_s0 + $0x88] sm:$0x1f]  ;;  %v1441_v46 = vld [vmem:[#allocation2 + $0xc70] sm:$0xff] }
 0x107   :  { %2761 = vmatpush1.bf16.msra.mxu1 %v2760_v36  ;;  %v1016_v36 = vld [vmem:[%s3901_s0 + $0x50] sm:$0xf8] }
 0x108   :  { %2985 = vmatpush1.bf16.msra.mxu0 %v2984_v8  ;;  %2763 = vmatprep.subr.bf16.mxu1 %v2762_v9  ;;  %v1434_v8 = vld [vmem:[#allocation2 + $0xc38] sm:$0xff]  ;;  %v2132_v9 = vld [vmem:[#allocation2 + $0x1228] sm:$0xff]  ;;  %v1052_v25 = vrot.slane %v1016_v36, 3 }
 0x109   :  { %2987 = vmatprep.subr.bf16.mxu0 %v2986_v14  ;;  %v2808_v14 = vpack.c.bf16 %v1429_v2, %v1427_v60  ;;  %v2810_v27 = vpack.c.bf16 %v1434_v8, %v1432_v7  ;;  %v3002_v28 = vpack.c.bf16 %v2134_v11, %v2132_v9  ;;  %v3006_v60 = vpack.c.bf16 %v2138_v42, %v2136_v41  ;;  %v1360_v2 = vld [vmem:[%s3901_s0 + $0x8] sm:$0xf0]  ;;  %v1439_v9 = vld [vmem:[#allocation2 + $0xc60] sm:$0xff] }
 0x10a   :  { %v3586_v29 = vpop.f32.mrb[0].mxu0  ;;  %v1054_v54 = vsel %vm1033_vm2, %v1052_v25, %v1053_v26  ;;  %v1058_v8 = vrot.slane %v1018_v59, 3  ;;  %v1387_v16 = vrot.slane %v1360_v2, 4  ;;  %v2144_v25 = vld [vmem:[#allocation2 + $0x1288] sm:$0xff]  ;;  %v1447_v59 = vld [vmem:[#allocation2 + $0xca0] sm:$0xff]  ;;  %v2149_v2 = vld [vmem:[#allocation2 + $0x12b0] sm:$0xff] }
 0x10b   :  { %v3588_v33 = vpop.f32.mrb[1].mxu0  ;;  %2765 = vmatpush1.bf16.msra.mxu1 %v2764_v20  ;;  %v1742_v20 = vsel %vm1733_vm4, %v1740_v3, %v1741_v1  ;;  %v2140_v3 = vld [vmem:[#allocation2 + $0x1268] sm:$0xff] }
 0x10c   :  { %2989 = vmatpush1.bf16.msra.mxu0 %v2988_v21  ;;  %2767 = vmatprep.subr.bf16.mxu1 %v2766_v22  ;;  %v3000_v21 = vpack.c.bf16 %v2129_v39, %v2127_v4  ;;  %v2131_v22 = vld [vmem:[#allocation2 + $0x1220] sm:$0xff]  ;;  %v2142_v4 = vld [vmem:[#allocation2 + $0x1278] sm:$0xff]  ;;  %v3655_v39 = vld [vmem:[%s3901_s0 + $0x70] sm:$0xff] }
 0x10d   :  { %2991 = vmatprep.subr.bf16.mxu0 %v2990_v37  ;;  %v1015_v37 = vld [vmem:[%s3901_s0 + $0x48] sm:$0xf8]  ;;  %v3004_v53 = vpack.c.bf16 %v2133_v24, %v2131_v22  ;;  %v1756_v31 = vrot.slane %v3655_v39, 5  ;;  %v1446_v24 = vld [vmem:[#allocation2 + $0xc98] sm:$0xff] }
 0x10e   :  { %v3599_v48 = vpop.f32.mrb[2].mxu0  ;;  %v1049_v47 = vrot.slane %v1015_v37, 3  ;;  %v1444_v22 = vld [vmem:[#allocation2 + $0xc88] sm:$0xff]  ;;  %v2146_v37 = vld [vmem:[#allocation2 + $0x1298] sm:$0xff] }
 0x10f   :  { %2769 = vmatpush1.bf16.msra.mxu1 %v2768_v38  ;;  %v3602_v61 = vpop.f32.mrb[3].mxu0  ;;  %v1019_v38 = vld [vmem:[%s3901_s0 + $0x80] sm:$0x7]  ;;  %v2822_v42 = vpack.c.bf16 %v1446_v24, %v1444_v22  ;;  %v2158_v22 = vld [vmem:[#allocation2 + $0x12f8] sm:$0xff] }
 0x110   :  { %2993 = vmatpush1.bf16.msra.mxu0 %v2992_v43  ;;  %2771 = vmatprep.subr.bf16.mxu1 %v2770_v44  ;;  %v1747_v44 = vrot.slane %v1714_v19, 5  ;;  %v1060_v58 = vrot.slane %v1019_v38, 3  ;;  %v1051_v7 = vsel %vm1033_vm2, %v1049_v47, %v1050_v57  ;;  %v2060_v19 = vld [vmem:[%s3901_s0 + $0x8] sm:$0xc0]  ;;  %v2088_v38 = vrot.slane %v3677_v32, 6  ;;  %v2145_v47 = vld [vmem:[#allocation2 + $0x1290] sm:$0xff] }
 0x111   :  { %2995 = vmatprep.subr.bf16.mxu0 %v2994_v50  ;;  %v1437_v50 = vld [vmem:[#allocation2 + $0xc50] sm:$0xff]  ;;  %v2087_v17 = vrot.slane %v2060_v19, 6  ;;  %v3228_v32 = vld [vmem:[%s3901_s0 + $0x60] sm:$0xff] }
 0x112   :  { %v3611_v12 = vpop.f32.mrb[4].mxu0  ;;  %v1748_v5 = vsel %vm1733_vm4, %v1741_v1, %v1747_v44  ;;  %v2816_v36 = vpack.c.bf16 %v1437_v50, %v1435_v49  ;;  %v1388_v1 = vrot.slane %v3489_v35, 4  ;;  %v1443_v44 = vld [vmem:[#allocation2 + $0xc80] sm:$0xff]  ;;  %v1448_v49 = vld [vmem:[#allocation2 + $0xca8] sm:$0xff]  ;;  %v1450_v50 = vld [vmem:[#allocation2 + $0xcb8] sm:$0xff] }
 0x113   :  { %2773 = vmatpush1.bf16.msra.mxu1 %v2772_v56  ;;  %v3614_v18 = vpop.f32.mrb[5].mxu0  ;;  %v2137_v56 = vld [vmem:[#allocation2 + $0x1250] sm:$0xff]  ;;  %v1369_v35 = vld [vmem:[%s3901_s0 + $0x80] sm:$0xf] }
 0x114   :  { %2997 = vmatpush1.bf16.msra.mxu0 %v2996_v62  ;;  %2807 = vmatprep.subr.bf16.mxu1 %v2806_v63  ;;  %v1440_v62 = vld [vmem:[#allocation2 + $0xc68] sm:$0xff]  ;;  %v1442_v63 = vld [vmem:[#allocation2 + $0xc78] sm:$0xff]  ;;  %v3008_v11 = vpack.c.bf16 %v2137_v56, %v2135_v34  ;;  %v1389_v10 = vsel %vm1383_vm3, %v1387_v16, %v1388_v1  ;;  %v2089_v34 = vsel %vm2083_vm5, %v2087_v17, %v2088_v38 }
 0x115   :  { %2999 = vmatprep.subr.bf16.mxu0 %v2998_v6  ;;  %v1755_v6 = vrot.slane %v1717_v52, 5  ;;  %v2148_v52 = vld [vmem:[#allocation2 + $0x12a8] sm:$0xff] }
 0x116   :  { %1238 = vmatmul.mubr.f32.vlgmr.msra.gmra.mrb[24].mxu1 %v1036_v13  ;;  %v3633_v43 = vpop.f32.mrb[6].mxu0  ;;  %v1061_v13 = vsel %vm1033_vm2, %v1053_v26, %v1060_v58  ;;  %v2826_v58 = vpack.c.bf16 %v1450_v50, %v1448_v49 }
 0x117   :  { %2809 = vmatpush1.bf16.msra.mxu1 %v2808_v14  ;;  %2027 = vmatmul.mubr.f32.vlgmr.msra.gmra.mrb[32].mxu0 %v1742_v20  ;;  %v3636_v51 = vpop.f32.mrb[7].mxu0  ;;  %v2818_v14 = vpack.c.bf16 %v1442_v63, %v1440_v62  ;;  %v3010_v20 = vpack.c.bf16 %v2142_v4, %v2140_v3  ;;  %v1757_v26 = vsel %vm1733_vm4, %v1755_v6, %v1756_v31  ;;  %v2147_v62 = vld [vmem:[#allocation2 + $0x12a0] sm:$0xff]  ;;  %v1452_v3 = vld [vmem:[#allocation2 + $0xcc8] sm:$0xff]  ;;  %v1454_v4 = vld [vmem:[#allocation2 + $0xcd8] sm:$0xff] }
 0x118   :  { %3001 = vmatpush1.bf16.msra.mxu0 %v3000_v21  ;;  %1243 = vmatprep.mubr.f32.mxu1 %v1046_v23  ;;  %v2141_v21 = vld [vmem:[#allocation2 + $0x1270] sm:$0xff]  ;;  %v1762_v23 = vrot.slane %v1720_v40, 5  ;;  %v2154_v6 = vld [vmem:[#allocation2 + $0x12d8] sm:$0xff]  ;;  %v2151_v40 = vld [vmem:[#allocation2 + $0x12c0] sm:$0xff] }
 0x119   :  { %2811 = vmatprep.subr.bf16.mxu1 %v2810_v27  ;;  %3003 = vmatprep.subr.bf16.mxu0 %v3002_v28  ;;  %v1059_v27 = vsel %vm1033_vm2, %v1050_v57, %v1058_v8  ;;  %v2820_v28 = vpack.c.bf16 %v1441_v46, %v1439_v9  ;;  %v3012_v41 = vpack.c.bf16 %v2141_v21, %v2139_v15  ;;  %v1451_v8 = vld [vmem:[#allocation2 + $0xcc0] sm:$0xff]  ;;  %v1453_v9 = vld [vmem:[#allocation2 + $0xcd0] sm:$0xff]  ;;  %v1456_v46 = vld [vmem:[#allocation2 + $0xce8] sm:$0xff] }
 0x11a   :  { %1244 = vmatmul.mubr.f32.gmra.mrb[26].mxu1 %v1044_v30  ;;  %2032 = vmatprep.mubr.f32.mxu0 %v3257_v0  ;;  %v1445_v30 = vld [vmem:[#allocation2 + $0xc90] sm:$0xff]  ;;  %v3014_v57 = vpack.c.bf16 %v2146_v37, %v2144_v25  ;;  %v1458_v15 = vld [vmem:[#allocation2 + $0xcf8] sm:$0xff]  ;;  %v2156_v21 = vld [vmem:[#allocation2 + $0x12e8] sm:$0xff]  ;;  %v2832_v37 = vpack.c.bf16 %v1453_v9, %v1451_v8 }
 0x11b   :  { %2813 = vmatpush1.bf16.msra.mxu1 %v2812_v45  ;;  %1249 = vmatprep.mubr.f32.mxu1 %v1054_v54  ;;  %v2143_v45 = vld [vmem:[#allocation2 + $0x1280] sm:$0xff]  ;;  %v1763_v54 = vsel %vm1733_vm4, %v1756_v31, %v1762_v23  ;;  %v2834_v23 = vpack.c.bf16 %v1458_v15, %v1456_v46 }
 0x11c   :  { %3005 = vmatpush1.bf16.msra.mxu0 %v3004_v53  ;;  %2815 = vmatprep.subr.bf16.mxu1 %v2814_v55  ;;  %v2150_v53 = vld [vmem:[#allocation2 + $0x12b8] sm:$0xff]  ;;  %v2824_v55 = vpack.c.bf16 %v1445_v30, %v1443_v44  ;;  %v3016_v56 = vpack.c.bf16 %v2145_v47, %v2143_v45  ;;  %v1460_v44 = vld [vmem:[#allocation2 + $0xd08] sm:$0xff]  ;;  %v2163_v8 = vld [vmem:[#allocation2 + $0x1320] sm:$0xff] }
 0x11d   :  { %3007 = vmatprep.subr.bf16.mxu0 %v3006_v60  ;;  %2033 = vmatmul.mubr.f32.gmra.mrb[34].mxu0 %v1748_v5  ;;  %v1449_v60 = vld [vmem:[#allocation2 + $0xcb0] sm:$0xff]  ;;  %v3018_v63 = vpack.c.bf16 %v2150_v53, %v2148_v52  ;;  %v2152_v5 = vld [vmem:[#allocation2 + $0x12c8] sm:$0xff]  ;;  %v1462_v30 = vld [vmem:[#allocation2 + $0xd18] sm:$0xff] }
 0x11e   :  { %1250 = vmatmul.mubr.f32.gmra.mrb[28].mxu1 %v1051_v7  ;;  %2038 = vmatprep.mubr.f32.mxu0 %v3257_v0  ;;  %v2828_v31 = vpack.c.bf16 %v1449_v60, %v1447_v59  ;;  %v3020_v7 = vpack.c.bf16 %v2149_v2, %v2147_v62  ;;  %v2838_v52 = vpack.c.bf16 %v1462_v30, %v1460_v44  ;;  %v1459_v53 = vld [vmem:[#allocation2 + $0xd00] sm:$0xff]  ;;  %v1464_v59 = vld [vmem:[#allocation2 + $0xd28] sm:$0xff]  ;;  %v1466_v60 = vld [vmem:[#allocation2 + $0xd38] sm:$0xff] }
 0x11f   :  { %2817 = vmatpush1.bf16.msra.mxu1 %v2816_v36  ;;  %1255 = vmatprep.mubr.f32.mxu1 %v1061_v13  ;;  %v2830_v36 = vpack.c.bf16 %v1454_v4, %v1452_v3  ;;  %v3022_v13 = vpack.c.bf16 %v2154_v6, %v2152_v5  ;;  %v2164_v2 = vld [vmem:[#allocation2 + $0x1328] sm:$0xff]  ;;  %v2166_v3 = vld [vmem:[#allocation2 + $0x1338] sm:$0xff] }
 0x120   :  { %3009 = vmatpush1.bf16.msra.mxu0 %v3008_v11  ;;  %2819 = vmatprep.subr.bf16.mxu1 %v2818_v14  ;;  %v2153_v14 = vld [vmem:[#allocation2 + $0x12d0] sm:$0xff]  ;;  %v1474_v44 = vld [vmem:[#allocation2 + $0xd78] sm:$0xff] }
 0x121   :  { %3011 = vmatprep.subr.bf16.mxu0 %v3010_v20  ;;  %2039 = vmatmul.mubr.f32.gmra.mrb[36].mxu0 %v1757_v26  ;;  %v3024_v26 = vpack.c.bf16 %v2153_v14, %v2151_v40  ;;  %v1470_v14 = vld [vmem:[#allocation2 + $0xd58] sm:$0xff] }
 0x122   :  { %1256 = vmatmul.mubr.f32.gmra.mrb[30].mxu1 %v1059_v27  ;;  %2044 = vmatprep.mubr.f32.mxu0 %v3257_v0  ;;  %v1455_v27 = vld [vmem:[#allocation2 + $0xce0] sm:$0xff] }
 0x123   :  { %2821 = vmatpush1.bf16.msra.mxu1 %v2820_v28  ;;  %1587 = vmatprep.mubr.f32.mxu1 %v1389_v10  ;;  %v1457_v28 = vld [vmem:[#allocation2 + $0xcf0] sm:$0xff]  ;;  %v2160_v10 = vld [vmem:[#allocation2 + $0x1308] sm:$0xff] }
 0x124   :  { %3013 = vmatpush1.bf16.msra.mxu0 %v3012_v41  ;;  %2823 = vmatprep.subr.bf16.mxu1 %v2822_v42  ;;  %v3026_v41 = vpack.c.bf16 %v2158_v22, %v2156_v21  ;;  %v2157_v42 = vld [vmem:[#allocation2 + $0x12f0] sm:$0xff]  ;;  %v2836_v49 = vpack.c.bf16 %v1457_v28, %v1455_v27  ;;  %v2170_v21 = vld [vmem:[#allocation2 + $0x1358] sm:$0xff]  ;;  %v1467_v27 = vld [vmem:[#allocation2 + $0xd40] sm:$0xff] }
 0x125   :  { %3015 = vmatprep.subr.bf16.mxu0 %v3014_v57  ;;  %2045 = vmatmul.mubr.f32.gmra.mrb[38].mxu0 %v1763_v54  ;;  %v2162_v57 = vld [vmem:[#allocation2 + $0x1318] sm:$0xff]  ;;  %v1461_v54 = vld [vmem:[#allocation2 + $0xd10] sm:$0xff] }
 0x126   :  { %2287 = vmatprep.mubr.f32.mxu0 %v2089_v34  ;;  %v2840_v5 = vpack.c.bf16 %v1461_v54, %v1459_v53  ;;  %v1469_v28 = vld [vmem:[#allocation2 + $0xd50] sm:$0xff]  ;;  %v2171_v53 = vld [vmem:[#allocation2 + $0x1360] sm:$0xff] }
 0x127   :  { %2825 = vmatpush1.bf16.msra.mxu1 %v2824_v55  ;;  %v2159_v55 = vld [vmem:[#allocation2 + $0x1300] sm:$0xff] }
 0x128   :  { %3017 = vmatpush1.bf16.msra.mxu0 %v3016_v56  ;;  %2827 = vmatprep.subr.bf16.mxu1 %v2826_v58  ;;  %v2161_v58 = vld [vmem:[#allocation2 + $0x1310] sm:$0xff] }
 0x129   :  { %v369_v11 = vpop.f32.mrb[0].mxu1  ;;  %3019 = vmatprep.subr.bf16.mxu0 %v3018_v63  ;;  %v3032_v6 = vpack.c.bf16 %v2161_v58, %v2159_v55  ;;  %v2173_v55 = vld [vmem:[#allocation2 + $0x1370] sm:$0xff]  ;;  %v2176_v58 = vld [vmem:[#allocation2 + $0x1388] sm:$0xff] }
 0x12a   :  { %v3689_v16 = vadd.f32 %v3586_v29, %v369_v11  ;;  %v3691_v19 = vpop.f32.mrb[8].mxu0  ;;  %v371_v20 = vpop.f32.mrb[1].mxu1  ;;  %v2155_v29 = vld [vmem:[#allocation2 + $0x12e0] sm:$0xff]  ;;  %v2165_v11 = vld [vmem:[#allocation2 + $0x1330] sm:$0xff] }
 0x12b   :  { %v3694_v24 = vadd.f32 %v3588_v33, %v371_v20  ;;  %v3696_v25 = vpop.f32.mrb[9].mxu0  ;;  %2829 = vmatpush1.bf16.msra.mxu1 %v2828_v31  ;;  %v3028_v50 = vpack.c.bf16 %v2157_v42, %v2155_v29  ;;  %v2842_v31 = vpack.c.bf16 %v1466_v60, %v1464_v59  ;;  %v2168_v20 = vld [vmem:[#allocation2 + $0x1348] sm:$0xff]  ;;  %v2167_v29 = vld [vmem:[#allocation2 + $0x1340] sm:$0xff]  ;;  %v2178_v59 = vld [vmem:[#allocation2 + $0x1398] sm:$0xff] }
 0x12c   :  { %3021 = vmatpush1.bf16.msra.mxu0 %v3020_v7  ;;  %2831 = vmatprep.subr.bf16.mxu1 %v2830_v36  ;;  %v1463_v7 = vld [vmem:[#allocation2 + $0xd20] sm:$0xff]  ;;  %v1465_v36 = vld [vmem:[#allocation2 + $0xd30] sm:$0xff]  ;;  %v1472_v42 = vld [vmem:[#allocation2 + $0xd68] sm:$0xff] }
 0x12d   :  { %v375_v17 = vpop.f32.mrb[2].mxu1  ;;  %3023 = vmatprep.subr.bf16.mxu0 %v3022_v13  ;;  %v1468_v13 = vld [vmem:[#allocation2 + $0xd48] sm:$0xff] }
 0x12e   :  { %v3699_v33 = vadd.f32 %v3599_v48, %v375_v17  ;;  %v377_v45 = vpop.f32.mrb[3].mxu1  ;;  %v3030_v48 = vpack.c.bf16 %v2162_v57, %v2160_v10  ;;  %v2848_v10 = vpack.c.bf16 %v1469_v28, %v1467_v27  ;;  %v1486_v27 = vld [vmem:[#allocation2 + $0xdd8] sm:$0xff]  ;;  %v2184_v28 = vld [vmem:[#allocation2 + $0x13c8] sm:$0xff] }
 0x12f   :  { %v3702_v47 = vadd.f32 %v3602_v61, %v377_v45  ;;  %2833 = vmatpush1.bf16.msra.mxu1 %v2832_v37  ;;  %v2844_v37 = vpack.c.bf16 %v1465_v36, %v1463_v7  ;;  %v2174_v45 = vld [vmem:[#allocation2 + $0x1378] sm:$0xff]  ;;  %v2177_v7 = vld [vmem:[#allocation2 + $0x1390] sm:$0xff]  ;;  %v1480_v36 = vld [vmem:[#allocation2 + $0xda8] sm:$0xff] }
 0x130   :  { %3025 = vmatpush1.bf16.msra.mxu0 %v3024_v26  ;;  %2835 = vmatprep.subr.bf16.mxu1 %v2834_v23  ;;  %v3704_v34 = vpop.f32.mrb[10].mxu0  ;;  %v3036_v26 = vpack.c.bf16 %v2165_v11, %v2163_v8  ;;  %v2846_v23 = vpack.c.bf16 %v1470_v14, %v1468_v13  ;;  %v1482_v8 = vld [vmem:[#allocation2 + $0xdb8] sm:$0xff] }
 0x131   :  { %v381_v56 = vpop.f32.mrb[4].mxu1  ;;  %3027 = vmatprep.subr.bf16.mxu0 %v3026_v41  ;;  %v3706_v62 = vpop.f32.mrb[11].mxu0  ;;  %v2169_v41 = vld [vmem:[#allocation2 + $0x1350] sm:$0xff]  ;;  %v2858_v14 = vpack.c.bf16 %v1482_v8, %v1480_v36  ;;  %v1363_v36 = vld [vmem:[%s3901_s0 + $0x38] sm:$0xf] }
 0x132   :  { %v3709_v61 = vadd.f32 %v3611_v12, %v381_v56  ;;  %v383_v63 = vpop.f32.mrb[5].mxu1  ;;  %v3034_v12 = vpack.c.bf16 %v2166_v3, %v2164_v2  ;;  %v3040_v57 = vpack.c.bf16 %v2169_v41, %v2167_v29  ;;  %v1476_v56 = vld [vmem:[#allocation2 + $0xd88] sm:$0xff]  ;;  %v1475_v3 = vld [vmem:[#allocation2 + $0xd80] sm:$0xff]  ;;  %v2186_v29 = vld [vmem:[#allocation2 + $0x13d8] sm:$0xff] }
 0x133   :  { %v3712_v4 = vadd.f32 %v3614_v18, %v383_v63  ;;  %2837 = vmatpush1.bf16.msra.mxu1 %v2836_v49  ;;  %v2850_v49 = vpack.c.bf16 %v1474_v44, %v1472_v42  ;;  %v3044_v63 = vpack.c.bf16 %v2173_v55, %v2171_v53  ;;  %v1483_v44 = vld [vmem:[#allocation2 + $0xdc0] sm:$0xff]  ;;  %v2188_v53 = vld [vmem:[#allocation2 + $0x13e8] sm:$0xff] }
 0x134   :  { %3029 = vmatpush1.bf16.msra.mxu0 %v3028_v50  ;;  %2839 = vmatprep.subr.bf16.mxu1 %v2838_v52  ;;  %v3714_v9 = vpop.f32.mrb[12].mxu0  ;;  %v1471_v50 = vld [vmem:[#allocation2 + $0xd60] sm:$0xff]  ;;  %v1473_v52 = vld [vmem:[#allocation2 + $0xd70] sm:$0xff] }
 0x135   :  { %v387_v40 = vpop.f32.mrb[6].mxu1  ;;  %3031 = vmatprep.subr.bf16.mxu0 %v3030_v48  ;;  %v3716_v46 = vpop.f32.mrb[13].mxu0  ;;  %v1478_v48 = vld [vmem:[#allocation2 + $0xd98] sm:$0xff]  ;;  %v2852_v60 = vpack.c.bf16 %v1473_v52, %v1471_v50 }
 0x136   :  { %v3719_v18 = vadd.f32 %v3633_v43, %v387_v40  ;;  %v389_v15 = vpop.f32.mrb[7].mxu1  ;;  %v3038_v43 = vpack.c.bf16 %v2170_v21, %v2168_v20  ;;  %v2854_v2 = vpack.c.bf16 %v1478_v48, %v1476_v56  ;;  %v2180_v40 = vld [vmem:[#allocation2 + $0x13a8] sm:$0xff]  ;;  %v1481_v20 = vld [vmem:[#allocation2 + $0xdb0] sm:$0xff]  ;;  %v2179_v21 = vld [vmem:[#allocation2 + $0x13a0] sm:$0xff] }
 0x137   :  { %v3722_v22 = vadd.f32 %v3636_v51, %v389_v15  ;;  %2841 = vmatpush1.bf16.msra.mxu1 %v2840_v5  ;;  %v2172_v51 = vld [vmem:[#allocation2 + $0x1368] sm:$0xff]  ;;  %v1477_v5 = vld [vmem:[#allocation2 + $0xd90] sm:$0xff]  ;;  %v1479_v15 = vld [vmem:[#allocation2 + $0xda0] sm:$0xff] }
 0x138   :  { %3033 = vmatpush1.bf16.msra.mxu0 %v3032_v6  ;;  %2843 = vmatprep.subr.bf16.mxu1 %v2842_v31  ;;  %v3724_v17 = vpop.f32.mrb[14].mxu0  ;;  %v3042_v54 = vpack.c.bf16 %v2174_v45, %v2172_v51  ;;  %v2175_v6 = vld [vmem:[#allocation2 + $0x1380] sm:$0xff]  ;;  %v3046_v31 = vpack.c.bf16 %v2178_v59, %v2176_v58  ;;  %v2856_v11 = vpack.c.bf16 %v1477_v5, %v1475_v3  ;;  %v1485_v51 = vld [vmem:[#allocation2 + $0xdd0] sm:$0xff]  ;;  %v1490_v50 = vld [vmem:[#allocation2 + $0xdf8] sm:$0xff] }
 0x139   :  { %3035 = vmatprep.subr.bf16.mxu0 %v3034_v12  ;;  %v3726_v30 = vpop.f32.mrb[15].mxu0  ;;  %v2182_v12 = vld [vmem:[#allocation2 + $0x13b8] sm:$0xff]  ;;  %v3048_v13 = vpack.c.bf16 %v2177_v7, %v2175_v6  ;;  %v2183_v45 = vld [vmem:[#allocation2 + $0x13c0] sm:$0xff]  ;;  %v2864_v56 = vpack.c.bf16 %v1485_v51, %v1483_v44  ;;  %v1489_v58 = vld [vmem:[#allocation2 + $0xdf0] sm:$0xff] }
 0x13a   :  { %v1487_v48 = vld [vmem:[#allocation2 + $0xde0] sm:$0xff]  ;;  %v2194_v7 = vld [vmem:[#allocation2 + $0x1418] sm:$0xff]  ;;  %v1366_v51 = vld [vmem:[%s3901_s0 + $0x50] sm:$0xf0] }
 0x13b   :  { %2845 = vmatpush1.bf16.msra.mxu1 %v2844_v37  ;;  %v3050_v37 = vpack.c.bf16 %v2182_v12, %v2180_v40  ;;  %v1359_v3 = vld [vmem:[%s3901_s0] sm:$0xf0]  ;;  %v2868_v40 = vpack.c.bf16 %v1489_v58, %v1487_v48  ;;  %v2198_v44 = vld [vmem:[#allocation2 + $0x1438] sm:$0xff]  ;;  %v2197_v58 = vld [vmem:[#allocation2 + $0x1430] sm:$0xff] }
 0x13c   :  { %3037 = vmatpush1.bf16.msra.mxu0 %v3036_v26  ;;  %2847 = vmatprep.subr.bf16.mxu1 %v2846_v23  ;;  %v2181_v26 = vld [vmem:[#allocation2 + $0x13b0] sm:$0xff]  ;;  %v1484_v23 = vld [vmem:[#allocation2 + $0xdc8] sm:$0xff]  ;;  %v2059_v6 = vld [vmem:[%s3901_s0] sm:$0xc0]  ;;  %v1384_v12 = vrot.slane %v1359_v3, 4 }
 0x13d   :  { %3039 = vmatprep.subr.bf16.mxu0 %v3038_v43  ;;  %v2860_v43 = vpack.c.bf16 %v1481_v20, %v1479_v15  ;;  %v3052_v41 = vpack.c.bf16 %v2181_v26, %v2179_v21  ;;  %v2862_v42 = vpack.c.bf16 %v1486_v27, %v1484_v23  ;;  %v2084_v21 = vrot.slane %v2059_v6, 6  ;;  %v2191_v23 = vld [vmem:[#allocation2 + $0x1400] sm:$0xff]  ;;  %v2193_v27 = vld [vmem:[#allocation2 + $0x1410] sm:$0xff] }
 0x13e   :  { %v2195_v48 = vld [vmem:[#allocation2 + $0x1420] sm:$0xff] }
 0x13f   :  { %2849 = vmatpush1.bf16.msra.mxu1 %v2848_v10  ;;  %v3054_v10 = vpack.c.bf16 %v2186_v29, %v2184_v28  ;;  %v1362_v28 = vld [vmem:[%s3901_s0 + $0x30] sm:$0xf]  ;;  %v1395_v29 = vrot.slane %v1363_v36, 4 }
 0x140   :  { %3041 = vmatpush1.bf16.msra.mxu0 %v3040_v57  ;;  %2851 = vmatprep.subr.bf16.mxu1 %v2850_v49  ;;  %v2185_v57 = vld [vmem:[#allocation2 + $0x13d0] sm:$0xff]  ;;  %v1488_v49 = vld [vmem:[#allocation2 + $0xde8] sm:$0xff] }
 0x141   :  { %3043 = vmatprep.subr.bf16.mxu0 %v3042_v54  ;;  %v2190_v54 = vld [vmem:[#allocation2 + $0x13f8] sm:$0xff]  ;;  %v3056_v59 = vpack.c.bf16 %v2185_v57, %v2183_v45  ;;  %v3064_v57 = vpack.c.bf16 %v2193_v27, %v2191_v23 }
 0x142   :  { %v3058_v5 = vpack.c.bf16 %v2190_v54, %v2188_v53 }
 0x143   :  { %2853 = vmatpush1.bf16.msra.mxu1 %v2852_v60  ;;  %v2866_v60 = vpack.c.bf16 %v1490_v50, %v1488_v49  ;;  %v1393_v49 = vrot.slane %v1362_v28, 4  ;;  %v2066_v50 = vld [vmem:[%s3901_s0 + $0x50] sm:$0xc0]  ;;  %v2100_v28 = vrot.slane %v3228_v32, 6 }
 0x144   :  { %3045 = vmatpush1.bf16.msra.mxu0 %v3044_v63  ;;  %2855 = vmatprep.subr.bf16.mxu1 %v2854_v2  ;;  %v2187_v63 = vld [vmem:[#allocation2 + $0x13e0] sm:$0xff]  ;;  %v2189_v2 = vld [vmem:[#allocation2 + $0x13f0] sm:$0xff]  ;;  %v2102_v36 = vrot.slane %v2066_v50, 6 }
 0x145   :  { %3047 = vmatprep.subr.bf16.mxu0 %v3046_v31  ;;  %v2192_v31 = vld [vmem:[#allocation2 + $0x1408] sm:$0xff]  ;;  %v3060_v20 = vpack.c.bf16 %v2189_v2, %v2187_v63  ;;  %v1396_v2 = vsel %vm1383_vm3, %v1388_v1, %v1395_v29  ;;  %v2201_v29 = vld [vmem:[#allocation2 + $0x1450] sm:$0xff] }
 0x146   :  { %v3062_v26 = vpack.c.bf16 %v2194_v7, %v2192_v31  ;;  %v1365_v63 = vld [vmem:[%s3901_s0 + $0x48] sm:$0xf0] }
 0x147   :  { %2857 = vmatpush1.bf16.msra.mxu1 %v2856_v11  ;;  %v3226_v11 = vld [vmem:[%s3901_s0 + $0x18] sm:$0xff]  ;;  %v2065_v31 = vld [vmem:[%s3901_s0 + $0x48] sm:$0xc0] }
 0x148   :  { %3049 = vmatpush1.bf16.msra.mxu0 %v3048_v13  ;;  %2859 = vmatprep.subr.bf16.mxu1 %v2858_v14  ;;  %v1385_v13 = vrot.slane %v3226_v11, 4  ;;  %v2063_v14 = vld [vmem:[%s3901_s0 + $0x38] sm:$0x3f]  ;;  %v2099_v27 = vrot.slane %v2065_v31, 6 }
 0x149   :  { %3051 = vmatprep.subr.bf16.mxu0 %v3050_v37  ;;  %v2085_v37 = vrot.slane %v3226_v11, 6  ;;  %v2210_v31 = vld [vmem:[#allocation2 + $0x1498] sm:$0xff] }
 0x14a   :  { %v3728_v52 = vpop.f32.mrb[16].mxu0  ;;  %v1394_v11 = vsel %vm1383_vm3, %v1385_v13, %v1393_v49  ;;  %v2206_v49 = vld [vmem:[#allocation2 + $0x1478] sm:$0xff] }
 0x14b   :  { %v3730_v55 = vpop.f32.mrb[17].mxu0  ;;  %2861 = vmatpush1.bf16.msra.mxu1 %v2860_v43  ;;  %v2062_v43 = vld [vmem:[%s3901_s0 + $0x30] sm:$0x3f]  ;;  %v2086_v54 = vsel %vm2083_vm5, %v2084_v21, %v2085_v37  ;;  %v2069_v21 = vld [vmem:[%s3901_s0 + $0x80] sm:$0x3f] }
 0x14c   :  { %3053 = vmatpush1.bf16.msra.mxu0 %v3052_v41  ;;  %2863 = vmatprep.subr.bf16.mxu1 %v2862_v42  ;;  %v2095_v41 = vrot.slane %v2063_v14, 6  ;;  %v2196_v42 = vld [vmem:[#allocation2 + $0x1428] sm:$0xff]  ;;  %v3068_v14 = vpack.c.bf16 %v2197_v58, %v2195_v48  ;;  %v2101_v48 = vsel %vm2083_vm5, %v2099_v27, %v2100_v28  ;;  %v2218_v27 = vld [vmem:[#allocation2 + $0x14d8] sm:$0xff] }
 0x14d   :  { %3055 = vmatprep.subr.bf16.mxu0 %v3054_v10  ;;  %v1386_v10 = vsel %vm1383_vm3, %v1384_v12, %v1385_v13  ;;  %v3066_v3 = vpack.c.bf16 %v2198_v44, %v2196_v42  ;;  %v2202_v12 = vld [vmem:[#allocation2 + $0x1458] sm:$0xff]  ;;  %v2199_v13 = vld [vmem:[#allocation2 + $0x1440] sm:$0xff]  ;;  %v1410_v44 = vrot.slane %v1369_v35, 4 }
 0x14e   :  { %v3741_v8 = vpop.f32.mrb[18].mxu0  ;;  %v2096_v7 = vsel %vm2083_vm5, %v2088_v38, %v2095_v41  ;;  %v1400_v38 = vrot.slane %v3228_v32, 4 }
 0x14f   :  { %2865 = vmatpush1.bf16.msra.mxu1 %v2864_v56  ;;  %v3749_v15 = vpop.f32.mrb[19].mxu0  ;;  %v2093_v56 = vrot.slane %v2062_v43, 6  ;;  %v1368_v43 = vld [vmem:[%s3901_s0 + $0x78] sm:$0xf] }
 0x150   :  { %3057 = vmatpush1.bf16.msra.mxu0 %v3056_v59  ;;  %2867 = vmatprep.subr.bf16.mxu1 %v2866_v60  ;;  %v3772_v59 = vld [vmem:[%s3901_s0 + $0x68] sm:$0xff] }
 0x151   :  { %3059 = vmatprep.subr.bf16.mxu0 %v3058_v5  ;;  %v1403_v60 = vrot.slane %v3772_v59, 4  ;;  %v1402_v5 = vrot.slane %v1366_v51, 4  ;;  %v2103_v6 = vrot.slane %v3772_v59, 6  ;;  %v2094_v23 = vsel %vm2083_vm5, %v2085_v37, %v2093_v56  ;;  %v2068_v51 = vld [vmem:[%s3901_s0 + $0x78] sm:$0x3f]  ;;  %v2203_v59 = vld [vmem:[#allocation2 + $0x1460] sm:$0xff] }
 0x152   :  { %v3760_v45 = vpop.f32.mrb[20].mxu0  ;;  %v1408_v56 = vrot.slane %v1368_v43, 4  ;;  %v2108_v58 = vrot.slane %v2068_v51, 6  ;;  %v2217_v43 = vld [vmem:[#allocation2 + $0x14d0] sm:$0xff] }
 0x153   :  { %2869 = vmatpush1.bf16.msra.mxu1 %v2868_v40  ;;  %v3766_v53 = vpop.f32.mrb[21].mxu0  ;;  %v2200_v40 = vld [vmem:[#allocation2 + $0x1448] sm:$0xff]  ;;  %v1404_v41 = vsel %vm1383_vm3, %v1402_v5, %v1403_v60  ;;  %v2104_v37 = vsel %vm2083_vm5, %v2102_v36, %v2103_v6 }
 0x154   :  { %3061 = vmatpush1.bf16.msra.mxu0 %v3060_v20  ;;  %3094 = vmatprep.subr.bf16.mxu1 %v3062_v26  ;;  %v1399_v20 = vrot.slane %v1365_v63, 4  ;;  %v3070_v42 = vpack.c.bf16 %v2202_v12, %v2200_v40  ;;  %v2205_v63 = vld [vmem:[#allocation2 + $0x1470] sm:$0xff]  ;;  %v2208_v5 = vld [vmem:[#allocation2 + $0x1488] sm:$0xff]  ;;  %v1409_v36 = vsel %vm1383_vm3, %v1400_v38, %v1408_v56  ;;  %v2109_v12 = vsel %vm2083_vm5, %v2100_v28, %v2108_v58  ;;  %v2219_v56 = vld [vmem:[#allocation2 + $0x14e0] sm:$0xff] }
 0x155   :  { %3063 = vmatprep.subr.bf16.mxu0 %v3062_v26  ;;  %v3076_v40 = vpack.c.bf16 %v2205_v63, %v2203_v59  ;;  %v3078_v35 = vpack.c.bf16 %v2210_v31, %v2208_v5  ;;  %v2067_v58 = vld [vmem:[%s3901_s0 + $0x58] sm:$0xc0] }
 0x156   :  { %1588 = vmatmul.mubr.f32.vlgmr.msra.gmra.mrb[32].mxu1 %v1386_v10  ;;  %v3791_v1 = vpop.f32.mrb[22].mxu0  ;;  %v2110_v10 = vrot.slane %v2069_v21, 6  ;;  %v1401_v50 = vsel %vm1383_vm3, %v1399_v20, %v1400_v38  ;;  %v2214_v20 = vld [vmem:[#allocation2 + $0x14b8] sm:$0xff]  ;;  %v2211_v38 = vld [vmem:[#allocation2 + $0x14a0] sm:$0xff]  ;;  %v2213_v21 = vld [vmem:[#allocation2 + $0x14b0] sm:$0xff] }
 0x157   :  { %2288 = vmatmul.mubr.f32.vlgmr.msra.gmra.mrb[32].mxu0 %v2086_v54  ;;  %3102 = vmatpush1.bf16.msra.mxu1 %v3064_v57  ;;  %v3800_v26 = vpop.f32.mrb[23].mxu0  ;;  %v3072_v54 = vpack.c.bf16 %v2201_v29, %v2199_v13  ;;  %v3084_v28 = vpack.c.bf16 %v2213_v21, %v2211_v38  ;;  %v2215_v29 = vld [vmem:[#allocation2 + $0x14c0] sm:$0xff] }
 0x158   :  { %3065 = vmatpush1.bf16.msra.mxu0 %v3064_v57  ;;  %1593 = vmatprep.mubr.f32.mxu1 %v1396_v2  ;;  %v2204_v57 = vld [vmem:[#allocation2 + $0x1468] sm:$0xff]  ;;  %v1411_v2 = vsel %vm1383_vm3, %v1403_v60, %v1410_v44  ;;  %v2222_v44 = vld [vmem:[#allocation2 + $0x14f8] sm:$0xff] }
 0x159   :  { %2293 = vmatprep.mubr.f32.mxu0 %v2096_v7  ;;  %3067 = vmatprep.subr.bf16.mxu0 %v3066_v3  ;;  %v2111_v7 = vsel %vm2083_vm5, %v2103_v6, %v2110_v10  ;;  %v2212_v60 = vld [vmem:[#allocation2 + $0x14a8] sm:$0xff] }
 0x15a   :  { %1594 = vmatmul.mubr.f32.gmra.mrb[34].mxu1 %v1394_v11  ;;  %3095 = vmatprep.subr.bf16.mxu1 %v3066_v3  ;;  %v3074_v3 = vpack.c.bf16 %v2206_v49, %v2204_v57  ;;  %v2207_v11 = vld [vmem:[#allocation2 + $0x1480] sm:$0xff]  ;;  %v3082_v32 = vpack.c.bf16 %v2214_v20, %v2212_v60 }
 0x15b   :  { %2294 = vmatmul.mubr.f32.gmra.mrb[34].mxu0 %v2094_v23  ;;  %3103 = vmatpush1.bf16.msra.mxu1 %v3068_v14  ;;  %v2216_v23 = vld [vmem:[#allocation2 + $0x14c8] sm:$0xff] }
 0x15c   :  { %3069 = vmatpush1.bf16.msra.mxu0 %v3068_v14  ;;  %1599 = vmatprep.mubr.f32.mxu1 %v1404_v41  ;;  %v2209_v14 = vld [vmem:[#allocation2 + $0x1490] sm:$0xff]  ;;  %v3086_v13 = vpack.c.bf16 %v2218_v27, %v2216_v23 }
 0x15d   :  { %2299 = vmatprep.mubr.f32.mxu0 %v2104_v37  ;;  %3071 = vmatprep.subr.bf16.mxu0 %v3070_v42  ;;  %v3080_v6 = vpack.c.bf16 %v2209_v14, %v2207_v11 }
 0x15e   :  { %1600 = vmatmul.mubr.f32.gmra.mrb[36].mxu1 %v1401_v50  ;;  %3096 = vmatprep.subr.bf16.mxu1 %v3070_v42  ;;  %v2220_v42 = vld [vmem:[#allocation2 + $0x14e8] sm:$0xff]  ;;  %v3088_v50 = vpack.c.bf16 %v2217_v43, %v2215_v29 }
 0x15f   :  { %2300 = vmatmul.mubr.f32.gmra.mrb[36].mxu0 %v2101_v48  ;;  %3104 = vmatpush1.bf16.msra.mxu1 %v3072_v54  ;;  %v2221_v48 = vld [vmem:[#allocation2 + $0x14f0] sm:$0xff] }
 0x160   :  { %3073 = vmatpush1.bf16.msra.mxu0 %v3072_v54  ;;  %1605 = vmatprep.mubr.f32.mxu1 %v1411_v2  ;;  %v3090_v54 = vpack.c.bf16 %v2222_v44, %v2220_v42  ;;  %v3092_v31 = vpack.c.bf16 %v2221_v48, %v2219_v56 }
 0x161   :  { %2305 = vmatprep.mubr.f32.mxu0 %v2111_v7  ;;  %3075 = vmatprep.subr.bf16.mxu0 %v3074_v3  ;;  %v2105_v7 = vrot.slane %v2067_v58, 6 }
 0x162   :  { %1606 = vmatmul.mubr.f32.gmra.mrb[38].mxu1 %v1409_v36  ;;  %3097 = vmatprep.subr.bf16.mxu1 %v3074_v3  ;;  %v2106_v36 = vrot.slane %v3655_v39, 6  ;;  %v2064_v39 = vld [vmem:[%s3901_s0 + $0x40] sm:$0x3f] }
 0x163   :  { %2306 = vmatmul.mubr.f32.gmra.mrb[38].mxu0 %v2109_v12  ;;  %3105 = vmatpush1.bf16.msra.mxu1 %v3076_v40  ;;  %v2097_v21 = vrot.slane %v2064_v39, 6 }
 0x164   :  { %3077 = vmatpush1.bf16.msra.mxu0 %v3076_v40  ;;  %3098 = vmatprep.subr.bf16.mxu1 %v3078_v35  ;;  %v3229_v40 = vld [vmem:[%s3901_s0 + $0x28] sm:$0xff] }
 0x165   :  { %3079 = vmatprep.subr.bf16.mxu0 %v3078_v35  ;;  %2376 = vmatprep.mubr.f32.mxu0 %v3257_v0  ;;  %v2091_v12 = vrot.slane %v3229_v40, 6 }
 0x166   :  { %2388 = vmatprep.mubr.f32.mxu1 %v3257_v0 }
 0x167   :  { %3106 = vmatpush1.bf16.msra.mxu1 %v3080_v6 }
 0x168   :  { %3081 = vmatpush1.bf16.msra.mxu0 %v3080_v6  ;;  %3099 = vmatprep.subr.bf16.mxu1 %v3082_v32 }
 0x169   :  { %v547_v41 = vpop.f32.mrb[8].mxu1  ;;  %3083 = vmatprep.subr.bf16.mxu0 %v3082_v32  ;;  %v2107_v32 = vsel %vm2083_vm5, %v2105_v7, %v2106_v36 }
 0x16a   :  { %v548_v51 = vadd.f32 %v547_v41, %v3689_v16  ;;  %v3820_v37 = vpop.f32.mrb[24].mxu0  ;;  %v549_v10 = vpop.f32.mrb[9].mxu1  ;;  %v2098_v41 = vsel %vm2083_vm5, %v2091_v12, %v2097_v21 }
 0x16b   :  { %v550_v57 = vadd.f32 %v549_v10, %v3694_v24  ;;  %v3823_v49 = vpop.f32.mrb[25].mxu0  ;;  %3107 = vmatpush1.bf16.msra.mxu1 %v3084_v28  ;;  %v2061_v24 = vld [vmem:[%s3901_s0 + $0x10] sm:$0xc0] }
 0x16c   :  { %3085 = vmatpush1.bf16.msra.mxu0 %v3084_v28  ;;  %3100 = vmatprep.subr.bf16.mxu1 %v3086_v13  ;;  %v637_v16 = vadd.f32 %v3691_v19, %v548_v51  ;;  %v2090_v19 = vrot.slane %v2061_v24, 6 }
 0x16d   :  { %v553_v59 = vpop.f32.mrb[10].mxu1  ;;  %3087 = vmatprep.subr.bf16.mxu0 %v3086_v13  ;;  %v639_v63 = vadd.f32 %v3696_v25, %v550_v57  ;;  %v2070_v25 = vld [vmem:[%s3901_s0 + $0x88] sm:$0x3f] }
 0x16e   :  { %v554_v2 = vadd.f32 %v553_v59, %v3699_v33  ;;  %v555_v3 = vpop.f32.mrb[11].mxu1  ;;  %v2112_v38 = vrot.slane %v2070_v25, 6 }
 0x16f   :  { %v556_v5 = vadd.f32 %v555_v3, %v3702_v47  ;;  %3108 = vmatpush1.bf16.msra.mxu1 %v3088_v50 }
 0x170   :  { %3089 = vmatpush1.bf16.msra.mxu0 %v3088_v50  ;;  %3101 = vmatprep.subr.bf16.mxu1 %v3090_v54  ;;  %v3842_v33 = vpop.f32.mrb[26].mxu0  ;;  %v643_v47 = vadd.f32 %v3704_v34, %v554_v2  ;;  %v2092_v34 = vsel %vm2083_vm5, %v2090_v19, %v2091_v12  ;;  %v2113_v43 = vsel %vm2083_vm5, %v2106_v36, %v2112_v38 }
 0x171   :  { %v559_v35 = vpop.f32.mrb[12].mxu1  ;;  %3091 = vmatprep.subr.bf16.mxu0 %v3090_v54  ;;  %v3848_v11 = vpop.f32.mrb[27].mxu0  ;;  %v645_v14 = vadd.f32 %v3706_v62, %v556_v5 }
 0x172   :  { %v560_v60 = vadd.f32 %v559_v35, %v3709_v61  ;;  %v561_v20 = vpop.f32.mrb[13].mxu1 }
 0x173   :  { %v562_v6 = vadd.f32 %v561_v20, %v3712_v4  ;;  %3109 = vmatpush1.bf16.msra.mxu1 %v3092_v31 }
 0x174   :  { %3093 = vmatpush1.bf16.msra.mxu0 %v3092_v31  ;;  %v1340_v23 = vpop.f32.mrb[28].mxu0  ;;  %v649_v27 = vadd.f32 %v3714_v9, %v560_v60 }
 0x175   :  { %v565_v28 = vpop.f32.mrb[14].mxu1  ;;  %v1342_v13 = vpop.f32.mrb[29].mxu0  ;;  %v651_v62 = vadd.f32 %v3716_v46, %v562_v6 }
 0x176   :  { %v566_v61 = vadd.f32 %v565_v28, %v3719_v18  ;;  %v567_v29 = vpop.f32.mrb[15].mxu1  ;;  %2389 = vmatmul.mubr.f32.vlgmr.msra.gmra.mrb[40].mxu1 %v2107_v32 }
 0x177   :  { %v568_v4 = vadd.f32 %v567_v29, %v3722_v22  ;;  %2377 = vmatmul.mubr.f32.vlgmr.msra.gmra.mrb[32].mxu0 %v2092_v34  ;;  %2394 = vmatprep.mubr.f32.mxu1 %v3257_v0 }
 0x178   :  { %2382 = vmatprep.mubr.f32.mxu0 %v3257_v0  ;;  %v1346_v9 = vpop.f32.mrb[30].mxu0  ;;  %v655_v42 = vadd.f32 %v3724_v17, %v566_v61 }
 0x179   :  { %v1348_v44 = vpop.f32.mrb[31].mxu0  ;;  %v657_v46 = vadd.f32 %v3726_v30, %v568_v4 }
 0x17a   :  { %2395 = vmatmul.mubr.f32.gmra.mrb[42].mxu1 %v2113_v43 }
 0x17b   :  { %2383 = vmatmul.mubr.f32.gmra.mrb[34].mxu0 %v2098_v41 }
 0x1a9   :  { %v889_v18 = vpop.f32.mrb[16].mxu1 }
 0x1aa   :  { %v3113_v51 = vadd.f32 %v889_v18, %v637_v16  ;;  %v891_v22 = vpop.f32.mrb[17].mxu1 }
 0x1ab   :  { %v3122_v10 = vadd.f32 %v891_v22, %v639_v63 }
 0x1ac   :  { %v3114_v57 = vadd.f32 %v3113_v51, %v3728_v52 }
 0x1ad   :  { %v895_v50 = vpop.f32.mrb[18].mxu1  ;;  %v3123_v54 = vadd.f32 %v3122_v10, %v3730_v55 }
 0x1ae   :  { %v3131_v0 = vadd.f32 %v895_v50, %v643_v47  ;;  %v897_v56 = vpop.f32.mrb[19].mxu1 }
 0x1af   :  { %v3140_v48 = vadd.f32 %v897_v56, %v645_v14 }
 0x1b0   :  { %v3132_v58 = vadd.f32 %v3131_v0, %v3741_v8 }
 0x1b1   :  { %v901_v17 = vpop.f32.mrb[20].mxu1  ;;  %v3141_v59 = vadd.f32 %v3140_v48, %v3749_v15 }
 0x1b2   :  { %v3149_v30 = vadd.f32 %v901_v17, %v649_v27  ;;  %v903_v24 = vpop.f32.mrb[21].mxu1 }
 0x1b3   :  { %v3159_v2 = vadd.f32 %v903_v24, %v651_v62 }
 0x1b4   :  { %v3150_v16 = vadd.f32 %v3149_v30, %v3760_v45 }
 0x1b5   :  { %v907_v3 = vpop.f32.mrb[22].mxu1  ;;  %v3160_v63 = vadd.f32 %v3159_v2, %v3766_v53 }
 0x1b6   :  { %v3169_v52 = vadd.f32 %v907_v3, %v655_v42  ;;  %v909_v5 = vpop.f32.mrb[23].mxu1 }
 0x1b7   :  { %v3179_v31 = vadd.f32 %v909_v5, %v657_v46 }
 0x1b8   :  { %v3170_v55 = vadd.f32 %v3169_v52, %v3791_v1 }
 0x1b9   :  { %v3180_v7 = vadd.f32 %v3179_v31, %v3800_v26 }
 0x1e9   :  { %v1239_v36 = vpop.f32.mrb[24].mxu1 }
 0x1ea   :  { %v3115_v8 = vadd.f32 %v3114_v57, %v1239_v36  ;;  %v1241_v19 = vpop.f32.mrb[25].mxu1 }
 0x1eb   :  { %v3124_v40 = vadd.f32 %v3123_v54, %v1241_v19 }
 0x1ec   :  { %v3116_v15 = vadd.f32 %v3115_v8, %v3820_v37 }
 0x1ed   :  { %v1245_v12 = vpop.f32.mrb[26].mxu1  ;;  %v3125_v25 = vadd.f32 %v3124_v40, %v3823_v49 }
 0x1ee   :  { %v3133_v45 = vadd.f32 %v3132_v58, %v1245_v12  ;;  %v1247_v47 = vpop.f32.mrb[27].mxu1 }
 0x1ef   :  { %v3142_v35 = vadd.f32 %v3141_v59, %v1247_v47 }
 0x1f0   :  { %v3134_v53 = vadd.f32 %v3133_v45, %v3842_v33 }
 0x1f1   :  { %v1251_v39 = vpop.f32.mrb[28].mxu1  ;;  %v3143_v14 = vadd.f32 %v3142_v35, %v3848_v11 }
 0x1f2   :  { %v3151_v1 = vadd.f32 %v3150_v16, %v1251_v39  ;;  %v1253_v60 = vpop.f32.mrb[29].mxu1 }
 0x1f3   :  { %v3161_v26 = vadd.f32 %v3160_v63, %v1253_v60 }
 0x1f4   :  { %v3152_v20 = vadd.f32 %v3151_v1, %v1340_v23 }
 0x1f5   :  { %v1257_v6 = vpop.f32.mrb[30].mxu1  ;;  %v3162_v32 = vadd.f32 %v3161_v26, %v1342_v13 }
 0x1f6   :  { %v3171_v38 = vadd.f32 %v3170_v55, %v1257_v6  ;;  %v1259_v34 = vpop.f32.mrb[31].mxu1 }
 0x1f7   :  { %v3181_v37 = vadd.f32 %v3180_v7, %v1259_v34 }
 0x1f8   :  { %v3172_v21 = vadd.f32 %v3171_v38, %v1346_v9 }
 0x1f9   :  { %v3182_v27 = vadd.f32 %v3181_v37, %v1348_v44 }
 0x229   :  { %v1589_v49 = vpop.f32.mrb[32].mxu1 }
 0x22a   :  { %v3117_v28 = vadd.f32 %v3116_v15, %v1589_v49  ;;  %v1591_v62 = vpop.f32.mrb[33].mxu1 }
 0x22b   :  { %v3126_v61 = vadd.f32 %v3125_v25, %v1591_v62 }
 0x22d   :  { %v1595_v29 = vpop.f32.mrb[34].mxu1 }
 0x22e   :  { %v3135_v33 = vadd.f32 %v3134_v53, %v1595_v29  ;;  %v1597_v4 = vpop.f32.mrb[35].mxu1 }
 0x22f   :  { %v3144_v43 = vadd.f32 %v3143_v14, %v1597_v4 }
 0x231   :  { %v1601_v11 = vpop.f32.mrb[36].mxu1 }
 0x232   :  { %v3153_v41 = vadd.f32 %v3152_v20, %v1601_v11  ;;  %v2301_v42 = vpop.f32.mrb[36].mxu0  ;;  %v1603_v46 = vpop.f32.mrb[37].mxu1 }
 0x233   :  { %v3163_v23 = vadd.f32 %v3162_v32, %v1603_v46  ;;  %v2303_v18 = vpop.f32.mrb[37].mxu0 }
 0x234   :  { %v3154_v13 = vadd.f32 %v3153_v41, %v2301_v42 }
 0x235   :  { %v3164_v51 = vadd.f32 %v3163_v23, %v2303_v18  ;;  %v1607_v22 = vpop.f32.mrb[38].mxu1 }
 0x236   :  { %v3173_v10 = vadd.f32 %v3172_v21, %v1607_v22  ;;  %v2307_v9 = vpop.f32.mrb[38].mxu0  ;;  %v1609_v44 = vpop.f32.mrb[39].mxu1 }
 0x237   :  { %v3183_v57 = vadd.f32 %v3182_v27, %v1609_v44  ;;  %v2309_v50 = vpop.f32.mrb[39].mxu0 }
 0x238   :  { %v3174_v54 = vadd.f32 %v3173_v10, %v2307_v9 }
 0x239   :  { %v3184_v0 = vadd.f32 %v3183_v57, %v2309_v50 }
 0x249   :  { %v2390_v56 = vpop.f32.mrb[40].mxu1 }
 0x24a   :  { %v2378_v48 = vpop.f32.mrb[32].mxu0  ;;  %v3155_v58 = vadd.f32 %v3154_v13, %v2390_v56  ;;  %v2392_v17 = vpop.f32.mrb[41].mxu1 }
 0x24b   :  { %v3118_v59 = vadd.f32 %v3117_v28, %v2378_v48  ;;  %v2380_v30 = vpop.f32.mrb[33].mxu0  ;;  %v3165_v24 = vadd.f32 %v3164_v51, %v2392_v17 }
 0x24c   :  { %2413 = vst [vmem:[%s3903_s2 + $0x20] sm:$0xff] %v3155_v58  ;;  %v3127_v2 = vadd.f32 %v3126_v61, %v2380_v30 }
 0x24d   :  { %2409 = vst [vmem:[%s3903_s2] sm:$0xff] %v3118_v59  ;;  %2414 = vst [vmem:[%s3903_s2 + $0x28] sm:$0xff] %v3165_v24  ;;  %v2396_v16 = vpop.f32.mrb[42].mxu1 }
 0x24e   :  { %2410 = vst [vmem:[%s3903_s2 + $0x8] sm:$0xff] %v3127_v2  ;;  %v2384_v3 = vpop.f32.mrb[34].mxu0  ;;  %v3175_v63 = vadd.f32 %v3174_v54, %v2396_v16  ;;  %v2398_v52 = vpop.f32.mrb[43].mxu1 }
 0x24f   :  { %v3136_v5 = vadd.f32 %v3135_v33, %v2384_v3  ;;  %v2386_v31 = vpop.f32.mrb[35].mxu0  ;;  %v3185_v55 = vadd.f32 %v3184_v0, %v2398_v52 }
 0x250   :  { %2415 = vst [vmem:[%s3903_s2 + $0x30] sm:$0xff] %v3175_v63  ;;  %v3145_v7 = vadd.f32 %v3144_v43, %v2386_v31 }
 0x251   :  { %2411 = vst [vmem:[%s3903_s2 + $0x10] sm:$0xff] %v3136_v5  ;;  %2416 = vst [vmem:[%s3903_s2 + $0x38] sm:$0xff] %v3185_v55 }
 0x252   :  { %2412 = vst [vmem:[%s3903_s2 + $0x18] sm:$0xff] %v3145_v7 }
 0x253   :  { %2421 = vsyncpa [#allocation3], 1 }

</bundles_post_ra>
